<compile_context>
chip_gen: v7x
topology: tpu7x:2x2x1
jax: 0.10.0
libtpu: 0.0.40
codegen_flags: <defaults>
</compile_context>

<pallas_src>
import functools
import math

import jax
import jax.numpy as jnp
from jax import lax
from jax.experimental import pallas as pl
from jax.experimental.pallas import tpu as pltpu


# -----------------------------------------------------------------------------
# Pallas kernel.  One grid step = (batch, gaussian-tile, camera, HW-tile).
# -----------------------------------------------------------------------------
def _gaussian_encoder_kernel(
    cidx_ref,    # (1, 1, 1, 4P, TG) int32  linearized corner indices (-1 = miss)
    cw_ref,      # (1, 1, 1, 4P, TG) f32    bilinear corner weights (already * validity)
    feats_ref,   # (1, 1, C, HWT)           camera features, channels-major (no glue transpose)
    pos2t_ref,   # (1, 1, 2, TG)            gaussians[..., :2]^T
    gfeatT_ref,  # (1, 1, E, TG)            gaussian query features^T
    w1t_ref, b1_ref,       # (2E, 2), (2E, 1)
    w2t_ref, b2_ref,       # (E, 2E), (E, 1)
    gamma_ref, beta_ref,   # (E, 1), (E, 1)
    out_ref,     # (1, 1, E, TG)
    acc_ref,     # (E, TG) f32 scratch accumulator
    *,
    num_corner_points,
):
    cam = pl.program_id(2)
    hw = pl.program_id(3)
    last_cam = pl.num_programs(2) - 1
    last_hw = pl.num_programs(3) - 1

    TG = acc_ref.shape[1]
    HWT = feats_ref.shape[3]

    @pl.when(jnp.logical_and(cam == 0, hw == 0))
    def _init():
        acc_ref[...] = jnp.zeros_like(acc_ref)

    # Corner tables for this (gaussian tile, camera), shifted into this HW tile's frame.
    # The shift is a cheap op on a (4P, TG) table, not on the full (HWT, TG) matrix.
    idx_all = cidx_ref[0, 0, 0] - hw * HWT            # (4P, TG) int32; misses stay negative
    w_all = cw_ref[0, 0, 0]                           # (4P, TG) f32

    # One-hot bilinear weights, built transposed (HW rows in sublanes, gaussians in lanes)
    # and accumulated per corner-point so only ~one (HWT, TG) value is live at a time.
    row = lax.broadcasted_iota(jnp.int32, (HWT, TG), 0)
    wsum_t = jnp.where(row == idx_all[0:1, :], w_all[0:1, :], 0.0)
    for k in range(1, num_corner_points):
        wsum_t = wsum_t + jnp.where(row == idx_all[k:k + 1, :], w_all[k:k + 1, :], 0.0)

    # (C, HWT) @ (HWT, TG) -> (E, TG); bf16 operands on the MXU, f32 accumulation.
    acc_ref[...] += jnp.dot(feats_ref[0, 0], wsum_t.astype(feats_ref.dtype),
                            preferred_element_type=jnp.float32)

    # ---- finalize: pos-MLP residual + sampled-feature residual + LayerNorm (transposed) ----
    @pl.when(jnp.logical_and(cam == last_cam, hw == last_hw))
    def _finalize():
        h = jnp.dot(w1t_ref[...], pos2t_ref[0, 0],
                    preferred_element_type=jnp.float32) + b1_ref[...]      # (2E, TG)
        h = jnp.maximum(h, 0.0)
        pe = jnp.dot(w2t_ref[...], h, preferred_element_type=jnp.float32) + b2_ref[...]  # (E, TG)
        feat = gfeatT_ref[0, 0] + pe + acc_ref[...]                         # (E, TG)
        # LayerNorm over the embedding (sublane) axis.
        mu = jnp.mean(feat, axis=0, keepdims=True)
        d = feat - mu
        var = jnp.mean(d * d, axis=0, keepdims=True)
        normed = d * lax.rsqrt(var + 1e-5)
        out_ref[0, 0] = (normed * gamma_ref[...] + beta_ref[...]).astype(out_ref.dtype)


# -----------------------------------------------------------------------------
# JAX glue: Gaussian sampling, hoisted projection / bilinear-corner tables, pallas_call.
# -----------------------------------------------------------------------------
def _sample_gaussian_points(gaussians, num_points, pc_range, scale_range, key):
    """(B, G, P, 3) sampled points, matching GaussianCrossAttention.sampled_points."""
    lo = jnp.asarray(pc_range[:3], jnp.float32)
    hi = jnp.asarray(pc_range[3:], jnp.float32)
    mean = gaussians[..., :3] * (hi - lo) + lo                        # (B, G, 3)

    slo = jnp.asarray(scale_range[:3], jnp.float32)
    shi = jnp.asarray(scale_range[3:], jnp.float32)
    scales = jax.nn.sigmoid(gaussians[..., 3:6]) * (shi - slo) + slo  # (B, G, 3)

    q = gaussians[..., 6:10]
    q = q / jnp.maximum(jnp.linalg.norm(q, axis=-1, keepdims=True), 1e-12)
    qw, qx, qy, qz = q[..., 0], q[..., 1], q[..., 2], q[..., 3]
    r0 = jnp.stack([1 - 2 * (qy**2 + qz**2), 2 * (qx * qy - qz * qw), 2 * (qx * qz + qy * qw)], -1)
    r1 = jnp.stack([2 * (qx * qy + qz * qw), 1 - 2 * (qx**2 + qz**2), 2 * (qy * qz - qx * qw)], -1)
    r2 = jnp.stack([2 * (qx * qz - qy * qw), 2 * (qy * qz + qx * qw), 1 - 2 * (qx**2 + qy**2)], -1)
    R = jnp.stack([r0, r1, r2], axis=-2)                              # (B, G, 3, 3)
    L = R * scales[..., None, :]                                      # R @ diag(scales)

    eps = jax.random.normal(key, mean.shape[:-1] + (num_points, 3), jnp.float32)
    pts = mean[..., None, :] + jnp.einsum('bgpj,bgij->bgpi', eps, L)  # (B, G, P, 3)
    return pts


def _precompute_corner_tables(pts, lidar2img, feat_h, feat_w, img_h, img_w, GT, TG):
    """Hoisted (hw-invariant) projection + bilinear corner math.

    Returns per (batch, gaussian-tile, camera) the 4 bilinear corners of every sampled point
    as linearized feature-map indices (-1 = out of image / behind camera) and matching weights
    (already multiplied by the z>eps validity mask), shaped (B, GT, N, 4*P, TG).
    """
    B, G, P, _ = pts.shape
    N = lidar2img.shape[1]

    # Fold the image -> feature-map scaling into lidar2img rows 0/1.
    row_scale = jnp.array([feat_w / img_w, feat_h / img_h, 1.0, 1.0], jnp.float32)
    l2i = lidar2img.astype(jnp.float32) * row_scale[None, None, :, None]      # (B, N, 4, 4)

    pts_h = jnp.concatenate([pts.astype(jnp.float32),
                             jnp.ones(pts.shape[:-1] + (1,), jnp.float32)], axis=-1)
    proj = jnp.einsum('bnij,bgpj->bngpi', l2i, pts_h)                         # (B, N, G, P, 4)

    eps = 1e-5
    zs = proj[..., 2]
    valid = (zs > eps).astype(jnp.float32)
    z = jnp.maximum(zs, eps)
    # grid_sample(align_corners=False) centre offset; clamp so floor/int cast is always safe.
    px = jnp.clip(proj[..., 0] / z - 0.5, -4.0, float(feat_w) + 4.0)
    py = jnp.clip(proj[..., 1] / z - 0.5, -4.0, float(feat_h) + 4.0)
    x0f = jnp.floor(px)
    y0f = jnp.floor(py)
    wx1 = px - x0f
    wx0 = 1.0 - wx1
    wy1 = py - y0f
    wy0 = 1.0 - wy1
    x0 = x0f.astype(jnp.int32)
    y0 = y0f.astype(jnp.int32)

    def lin(cx, cy):  # linearized index, -1 when the corner falls outside the feature map
        ok = (cx >= 0) & (cx < feat_w) & (cy >= 0) & (cy < feat_h)
        return jnp.where(ok, cy * feat_w + cx, -1)

    idx = jnp.stack([lin(x0, y0), lin(x0 + 1, y0),
                     lin(x0, y0 + 1), lin(x0 + 1, y0 + 1)], axis=-1)          # (B, N, G, P, 4)
    wgt = jnp.stack([wx0 * wy0, wx1 * wy0, wx0 * wy1, wx1 * wy1], axis=-1)
    wgt = wgt * valid[..., None]

    def tile(a, dtype):
        a = a.reshape(B, N, GT, TG, P, 4)
        a = jnp.transpose(a, (0, 2, 1, 4, 5, 3))      # (B, GT, N, P, 4, TG)
        return a.reshape(B, GT, N, P * 4, TG).astype(dtype)

    return tile(idx, jnp.int32), tile(wgt, jnp.float32)


def _pick_tile(total, pref, mult):
    """Largest t <= pref dividing `total` and multiple of `mult`; fallback: total."""
    for t in range(min(pref, total), 0, -1):
        if total % t == 0 and t % mult == 0:
            return t
    return total


def init_params(embed_dims, key):
    mid = 2 * embed_dims
    k1, k2 = jax.random.split(key)
    return {
        "w1": (jax.random.normal(k1, (2, mid), jnp.float32) * 0.1),
        "b1": jnp.zeros((1, mid), jnp.float32),
        "w2": (jax.random.normal(k2, (mid, embed_dims), jnp.float32) * 0.1),
        "b2": jnp.zeros((1, embed_dims), jnp.float32),
        "gamma": jnp.ones((1, embed_dims), jnp.float32),
        "beta": jnp.zeros((1, embed_dims), jnp.float32),
    }


def gaussian_encoder_layer(mlvl_feats, lidar2img, gaussians, gaussians_feat, params, *,
                           num_points, img_h, img_w, pc_range, scale_range, sample_key,
                           g_tile=None, hw_tile=None, feat_dtype=jnp.bfloat16):
    feats_nchw = mlvl_feats[0]                       # single level
    B, N, C, H, W = feats_nchw.shape
    _, G, E = gaussians_feat.shape
    assert C == E, "sampled features are added to gaussian features"
    P = num_points
    HW = H * W

    if g_tile is None:
        pref = 128
        if B == 1 and G >= 16:
            pref = min(pref, G // 2)     # keep >= 2 parallel grid units for v7x's two TCs
        g_tile = _pick_tile(G, pref, 8)
    TG = g_tile
    HWT = hw_tile if hw_tile is not None else _pick_tile(HW, 1024, 128)
    assert G % TG == 0 and TG % 8 == 0, "gaussian tile must divide G and be a multiple of 8"
    assert HW % HWT == 0 and (HWT % 128 == 0 or HWT == HW), "HW tile must be lane-aligned"
    GT = G // TG

    # Random Gaussian point sampling (glue; stochastic anyway).
    pts = _sample_gaussian_points(gaussians, P, pc_range, scale_range, sample_key)  # (B,G,P,3)
    sampled_points = pts[:, :, None, :, :]           # (B, G, 1, P, 3)  == unsqueeze(2)

    # Hoisted, hw-invariant projection + corner math (done ONCE, not per HW tile).
    cidx, cw = _precompute_corner_tables(pts, lidar2img, H, W, img_h, img_w, GT, TG)

    # Features: contiguous reshape only (no HBM transpose of the largest tensor); bf16 path.
    feats = feats_nchw.reshape(B, N, C, HW).astype(feat_dtype)

    # Small transposed per-tile tensors (gaussian axis in lanes).
    pos2t = jnp.transpose(gaussians[..., :2].astype(jnp.float32).reshape(B, GT, TG, 2),
                          (0, 1, 3, 2))              # (B, GT, 2, TG)
    gfeatT = jnp.transpose(gaussians_feat.astype(jnp.float32).reshape(B, GT, TG, E),
                           (0, 1, 3, 2))             # (B, GT, E, TG)

    w1t = params["w1"].T                              # (2E, 2)
    b1t = params["b1"].T                              # (2E, 1)
    w2t = params["w2"].T                              # (E, 2E)
    b2t = params["b2"].T                              # (E, 1)
    gammat = params["gamma"].T                        # (E, 1)
    betat = params["beta"].T                          # (E, 1)

    kernel = functools.partial(_gaussian_encoder_kernel, num_corner_points=4 * P)

    out_t = pl.pallas_call(
        kernel,
        out_shape=jax.ShapeDtypeStruct((B, GT, E, TG), jnp.float32),
        grid_spec=pltpu.PrefetchScalarGridSpec(
            num_scalar_prefetch=0,
            grid=(B, GT, N, HW // HWT),
            in_specs=[
                pl.BlockSpec((1, 1, 1, 4 * P, TG), lambda b, gt, n, hw: (b, gt, n, 0, 0)),
                pl.BlockSpec((1, 1, 1, 4 * P, TG), lambda b, gt, n, hw: (b, gt, n, 0, 0)),
                pl.BlockSpec((1, 1, C, HWT), lambda b, gt, n, hw: (b, n, 0, hw)),
                pl.BlockSpec((1, 1, 2, TG), lambda b, gt, n, hw: (b, gt, 0, 0)),
                pl.BlockSpec((1, 1, E, TG), lambda b, gt, n, hw: (b, gt, 0, 0)),
                pl.BlockSpec((2 * E, 2), lambda b, gt, n, hw: (0, 0)),
                pl.BlockSpec((2 * E, 1), lambda b, gt, n, hw: (0, 0)),
                pl.BlockSpec((E, 2 * E), lambda b, gt, n, hw: (0, 0)),
                pl.BlockSpec((E, 1), lambda b, gt, n, hw: (0, 0)),
                pl.BlockSpec((E, 1), lambda b, gt, n, hw: (0, 0)),
                pl.BlockSpec((E, 1), lambda b, gt, n, hw: (0, 0)),
            ],
            out_specs=pl.BlockSpec((1, 1, E, TG), lambda b, gt, n, hw: (b, gt, 0, 0)),
            scratch_shapes=[pltpu.VMEM((E, TG), jnp.float32)],
        ),
        compiler_params=pltpu.CompilerParams(
            dimension_semantics=("parallel", "parallel", "arbitrary", "arbitrary"),
            vmem_limit_bytes=32 * 1024 * 1024,
        ),
    )(cidx, cw, feats, pos2t, gfeatT, w1t, b1t, w2t, b2t, gammat, betat)

    # Tiny output: transpose back to (B, G, E) in glue.
    out_feat = jnp.transpose(out_t, (0, 1, 3, 2)).reshape(B, G, E)
    return out_feat, sampled_points


def make_lidar2img(B, N, img_h, img_w):
    mats = []
    for n in range(N):
        ang = 2.0 * math.pi * n / N
        c, s = math.cos(ang), math.sin(ang)
        R = jnp.array([[-s, c, 0.0],
                       [0.0, 0.0, -1.0],
                       [c, s, 0.0]], jnp.float32)
        t = jnp.array([[0.0], [0.0], [1.0]], jnp.float32)
        Ext = jnp.concatenate(
            [jnp.concatenate([R, t], axis=1),
             jnp.array([[0.0, 0.0, 0.0, 1.0]], jnp.float32)], axis=0)
        K = jnp.array([[img_w * 0.5, 0.0, img_w * 0.5, 0.0],
                       [0.0, img_h * 0.5, img_h * 0.5, 0.0],
                       [0.0, 0.0, 1.0, 0.0],
                       [0.0, 0.0, 0.0, 1.0]], jnp.float32)
        mats.append(K @ Ext)
    M = jnp.stack(mats)                               # (N, 4, 4)
    return jnp.broadcast_to(M, (B, N, 4, 4))


if __name__ == "__main__":
    B, G, P, E, N = 2, 64, 8, 32, 2
    H = W = 16
    img_h = img_w = 16
    pc_range = [-10.0, -10.0, -2.0, 10.0, 10.0, 2.0]
    scale_range = [0.1, 0.1, 0.1, 1.0, 1.0, 1.0]

    key = jax.random.PRNGKey(0)
    k_g, k_f, k_feat, k_p, k_s = jax.random.split(key, 5)

    gaussians = jax.random.uniform(k_g, (B, G, 10), jnp.float32)
    gaussians_feat = jax.random.normal(k_f, (B, G, E), jnp.float32) * 0.1
    mlvl_feats = [jax.random.normal(k_feat, (B, N, E, H, W), jnp.float32) * 0.1]  # NCHW per cam
    lidar2img = make_lidar2img(B, N, img_h, img_w)
    params = init_params(E, k_p)

    out_feat, sampled_points = gaussian_encoder_layer(
        mlvl_feats, lidar2img, gaussians, gaussians_feat, params,
        num_points=P, img_h=img_h, img_w=img_w,
        pc_range=pc_range, scale_range=scale_range, sample_key=k_s,
        hw_tile=128)   # exercise the HW-tile reduction axis (HW=256 -> 2 steps)

    jax.block_until_ready((out_feat, sampled_points))
    assert out_feat.shape == (B, G, E)
    assert sampled_points.shape == (B, G, 1, P, 3)
    print("KERNEL_OK")
</pallas_src>

<mosaic_0001>
module attributes {stable_mosaic.version = 11 : i64} {
  func.func @_gaussian_encoder_kernel(%arg0: i32, %arg1: i32, %arg2: i32, %arg3: i32, %arg4: memref<1x1x1x32x64xi32, #tpu.memory_space<vmem>>, %arg5: memref<1x1x1x32x64xf32, #tpu.memory_space<vmem>>, %arg6: memref<1x1x32x128xbf16, #tpu.memory_space<vmem>>, %arg7: memref<1x1x2x64xf32, #tpu.memory_space<vmem>>, %arg8: memref<1x1x32x64xf32, #tpu.memory_space<vmem>>, %arg9: memref<64x2xf32, #tpu.memory_space<vmem>>, %arg10: memref<64x1xf32, #tpu.memory_space<vmem>>, %arg11: memref<32x64xf32, #tpu.memory_space<vmem>>, %arg12: memref<32x1xf32, #tpu.memory_space<vmem>>, %arg13: memref<32x1xf32, #tpu.memory_space<vmem>>, %arg14: memref<32x1xf32, #tpu.memory_space<vmem>>, %arg15: memref<1x1x32x64xf32, #tpu.memory_space<vmem>>, %arg16: memref<32x64xf32, #tpu.memory_space<vmem>>) attributes {dimension_semantics = [#tpu.dimension_semantics<parallel>, #tpu.dimension_semantics<parallel>, #tpu.dimension_semantics<arbitrary>, #tpu.dimension_semantics<arbitrary>], iteration_bounds = array<i64: 2, 1, 2, 2>, scalar_prefetch = 0 : i64, scratch_operands = 1 : i64, tpu.core_type = #tpu.core_type<tc>, window_params = [{transform_indices = @transform_0, window_bounds = array<i64: 1, 1, 1, 32, 64>}, {transform_indices = @transform_1, window_bounds = array<i64: 1, 1, 1, 32, 64>}, {transform_indices = @transform_2, window_bounds = array<i64: 1, 1, 32, 128>}, {transform_indices = @transform_3, window_bounds = array<i64: 1, 1, 2, 64>}, {transform_indices = @transform_4, window_bounds = array<i64: 1, 1, 32, 64>}, {pipeline_mode = #tpu.pipeline_mode<synchronous>, transform_indices = @transform_5, window_bounds = array<i64: 64, 2>}, {pipeline_mode = #tpu.pipeline_mode<synchronous>, transform_indices = @transform_6, window_bounds = array<i64: 64, 1>}, {pipeline_mode = #tpu.pipeline_mode<synchronous>, transform_indices = @transform_7, window_bounds = array<i64: 32, 64>}, {pipeline_mode = #tpu.pipeline_mode<synchronous>, transform_indices = @transform_8, window_bounds = array<i64: 32, 1>}, {pipeline_mode = #tpu.pipeline_mode<synchronous>, transform_indices = @transform_9, window_bounds = array<i64: 32, 1>}, {pipeline_mode = #tpu.pipeline_mode<synchronous>, transform_indices = @transform_10, window_bounds = array<i64: 32, 1>}, {transform_indices = @transform_11, window_bounds = array<i64: 1, 1, 32, 64>}]} {
    %c0_i32 = arith.constant 0 : i32
    %0 = arith.cmpi eq, %arg2, %c0_i32 : i32
    %c0_i32_0 = arith.constant 0 : i32
    %1 = arith.cmpi eq, %arg3, %c0_i32_0 : i32
    %2 = arith.andi %0, %1 : i1
    %3 = arith.extui %2 : i1 to i32
    %c0_i32_1 = arith.constant 0 : i32
    %4 = arith.cmpi ne, %3, %c0_i32_1 : i32
    scf.if %4 {
      %cst_53 = arith.constant 0.000000e+00 : f32
      %312 = vector.broadcast %cst_53 : f32 to vector<32x64xf32>
      %c0_54 = arith.constant 0 : index
      %c0_55 = arith.constant 0 : index
      %313 = vector.load %arg16[%c0_54, %c0_55] : memref<32x64xf32, #tpu.memory_space<vmem>>, vector<32x64xf32>
      tpu.vector_store %arg16[%c0_54, %c0_55], %312 {strides = array<i32>} : memref<32x64xf32, #tpu.memory_space<vmem>>, vector<32x64xf32>,
    } else {
    }
    %c0 = arith.constant 0 : index
    %c0_2 = arith.constant 0 : index
    %c0_3 = arith.constant 0 : index
    %c0_4 = arith.constant 0 : index
    %c0_5 = arith.constant 0 : index
    %5 = vector.load %arg4[%c0, %c0_2, %c0_3, %c0_4, %c0_5] : memref<1x1x1x32x64xi32, #tpu.memory_space<vmem>>, vector<1x1x1x32x64xi32>
    %6 = vector.shape_cast %5 : vector<1x1x1x32x64xi32> to vector<32x64xi32>
    %c128_i32 = arith.constant 128 : i32
    %7 = arith.muli %arg3, %c128_i32 : i32
    %8 = vector.broadcast %7 : i32 to vector<32x64xi32>
    %9 = arith.subi %6, %8 : vector<32x64xi32>
    %c0_6 = arith.constant 0 : index
    %c0_7 = arith.constant 0 : index
    %c0_8 = arith.constant 0 : index
    %c0_9 = arith.constant 0 : index
    %c0_10 = arith.constant 0 : index
    %10 = vector.load %arg5[%c0_6, %c0_7, %c0_8, %c0_9, %c0_10] : memref<1x1x1x32x64xf32, #tpu.memory_space<vmem>>, vector<1x1x1x32x64xf32>
    %11 = vector.shape_cast %10 : vector<1x1x1x32x64xf32> to vector<32x64xf32>
    %12 = tpu.iota {dimensions = array<i32: 0>} : vector<128x64xi32>
    %13 = vector.extract_strided_slice %9 {offsets = [0, 0], sizes = [1, 64], strides = [1, 1]} : vector<32x64xi32> to vector<1x64xi32>
    %14 = vector.broadcast %13 : vector<1x64xi32> to vector<128x64xi32>
    %15 = arith.cmpi eq, %12, %14 : vector<128x64xi32>
    %16 = vector.extract_strided_slice %11 {offsets = [0, 0], sizes = [1, 64], strides = [1, 1]} : vector<32x64xf32> to vector<1x64xf32>
    %cst = arith.constant 0.000000e+00 : f32
    %17 = vector.shape_cast %16 : vector<1x64xf32> to vector<1x64xf32>
    %18 = vector.broadcast %17 : vector<1x64xf32> to vector<128x64xf32>
    %19 = vector.broadcast %cst : f32 to vector<128x64xf32>
    %20 = arith.select %15, %18, %19 : vector<128x64xi1>, vector<128x64xf32>
    %21 = vector.extract_strided_slice %9 {offsets = [1, 0], sizes = [1, 64], strides = [1, 1]} : vector<32x64xi32> to vector<1x64xi32>
    %22 = vector.broadcast %21 : vector<1x64xi32> to vector<128x64xi32>
    %23 = arith.cmpi eq, %12, %22 : vector<128x64xi32>
    %24 = vector.extract_strided_slice %11 {offsets = [1, 0], sizes = [1, 64], strides = [1, 1]} : vector<32x64xf32> to vector<1x64xf32>
    %cst_11 = arith.constant 0.000000e+00 : f32
    %25 = vector.shape_cast %24 : vector<1x64xf32> to vector<1x64xf32>
    %26 = vector.broadcast %25 : vector<1x64xf32> to vector<128x64xf32>
    %27 = vector.broadcast %cst_11 : f32 to vector<128x64xf32>
    %28 = arith.select %23, %26, %27 : vector<128x64xi1>, vector<128x64xf32>
    %29 = arith.addf %20, %28 : vector<128x64xf32>
    %30 = vector.extract_strided_slice %9 {offsets = [2, 0], sizes = [1, 64], strides = [1, 1]} : vector<32x64xi32> to vector<1x64xi32>
    %31 = vector.broadcast %30 : vector<1x64xi32> to vector<128x64xi32>
    %32 = arith.cmpi eq, %12, %31 : vector<128x64xi32>
    %33 = vector.extract_strided_slice %11 {offsets = [2, 0], sizes = [1, 64], strides = [1, 1]} : vector<32x64xf32> to vector<1x64xf32>
    %cst_12 = arith.constant 0.000000e+00 : f32
    %34 = vector.shape_cast %33 : vector<1x64xf32> to vector<1x64xf32>
    %35 = vector.broadcast %34 : vector<1x64xf32> to vector<128x64xf32>
    %36 = vector.broadcast %cst_12 : f32 to vector<128x64xf32>
    %37 = arith.select %32, %35, %36 : vector<128x64xi1>, vector<128x64xf32>
    %38 = arith.addf %29, %37 : vector<128x64xf32>
    %39 = vector.extract_strided_slice %9 {offsets = [3, 0], sizes = [1, 64], strides = [1, 1]} : vector<32x64xi32> to vector<1x64xi32>
    %40 = vector.broadcast %39 : vector<1x64xi32> to vector<128x64xi32>
    %41 = arith.cmpi eq, %12, %40 : vector<128x64xi32>
    %42 = vector.extract_strided_slice %11 {offsets = [3, 0], sizes = [1, 64], strides = [1, 1]} : vector<32x64xf32> to vector<1x64xf32>
    %cst_13 = arith.constant 0.000000e+00 : f32
    %43 = vector.shape_cast %42 : vector<1x64xf32> to vector<1x64xf32>
    %44 = vector.broadcast %43 : vector<1x64xf32> to vector<128x64xf32>
    %45 = vector.broadcast %cst_13 : f32 to vector<128x64xf32>
    %46 = arith.select %41, %44, %45 : vector<128x64xi1>, vector<128x64xf32>
    %47 = arith.addf %38, %46 : vector<128x64xf32>
    %48 = vector.extract_strided_slice %9 {offsets = [4, 0], sizes = [1, 64], strides = [1, 1]} : vector<32x64xi32> to vector<1x64xi32>
    %49 = vector.broadcast %48 : vector<1x64xi32> to vector<128x64xi32>
    %50 = arith.cmpi eq, %12, %49 : vector<128x64xi32>
    %51 = vector.extract_strided_slice %11 {offsets = [4, 0], sizes = [1, 64], strides = [1, 1]} : vector<32x64xf32> to vector<1x64xf32>
    %cst_14 = arith.constant 0.000000e+00 : f32
    %52 = vector.shape_cast %51 : vector<1x64xf32> to vector<1x64xf32>
    %53 = vector.broadcast %52 : vector<1x64xf32> to vector<128x64xf32>
    %54 = vector.broadcast %cst_14 : f32 to vector<128x64xf32>
    %55 = arith.select %50, %53, %54 : vector<128x64xi1>, vector<128x64xf32>
    %56 = arith.addf %47, %55 : vector<128x64xf32>
    %57 = vector.extract_strided_slice %9 {offsets = [5, 0], sizes = [1, 64], strides = [1, 1]} : vector<32x64xi32> to vector<1x64xi32>
    %58 = vector.broadcast %57 : vector<1x64xi32> to vector<128x64xi32>
    %59 = arith.cmpi eq, %12, %58 : vector<128x64xi32>
    %60 = vector.extract_strided_slice %11 {offsets = [5, 0], sizes = [1, 64], strides = [1, 1]} : vector<32x64xf32> to vector<1x64xf32>
    %cst_15 = arith.constant 0.000000e+00 : f32
    %61 = vector.shape_cast %60 : vector<1x64xf32> to vector<1x64xf32>
    %62 = vector.broadcast %61 : vector<1x64xf32> to vector<128x64xf32>
    %63 = vector.broadcast %cst_15 : f32 to vector<128x64xf32>
    %64 = arith.select %59, %62, %63 : vector<128x64xi1>, vector<128x64xf32>
    %65 = arith.addf %56, %64 : vector<128x64xf32>
    %66 = vector.extract_strided_slice %9 {offsets = [6, 0], sizes = [1, 64], strides = [1, 1]} : vector<32x64xi32> to vector<1x64xi32>
    %67 = vector.broadcast %66 : vector<1x64xi32> to vector<128x64xi32>
    %68 = arith.cmpi eq, %12, %67 : vector<128x64xi32>
    %69 = vector.extract_strided_slice %11 {offsets = [6, 0], sizes = [1, 64], strides = [1, 1]} : vector<32x64xf32> to vector<1x64xf32>
    %cst_16 = arith.constant 0.000000e+00 : f32
    %70 = vector.shape_cast %69 : vector<1x64xf32> to vector<1x64xf32>
    %71 = vector.broadcast %70 : vector<1x64xf32> to vector<128x64xf32>
    %72 = vector.broadcast %cst_16 : f32 to vector<128x64xf32>
    %73 = arith.select %68, %71, %72 : vector<128x64xi1>, vector<128x64xf32>
    %74 = arith.addf %65, %73 : vector<128x64xf32>
    %75 = vector.extract_strided_slice %9 {offsets = [7, 0], sizes = [1, 64], strides = [1, 1]} : vector<32x64xi32> to vector<1x64xi32>
    %76 = vector.broadcast %75 : vector<1x64xi32> to vector<128x64xi32>
    %77 = arith.cmpi eq, %12, %76 : vector<128x64xi32>
    %78 = vector.extract_strided_slice %11 {offsets = [7, 0], sizes = [1, 64], strides = [1, 1]} : vector<32x64xf32> to vector<1x64xf32>
    %cst_17 = arith.constant 0.000000e+00 : f32
    %79 = vector.shape_cast %78 : vector<1x64xf32> to vector<1x64xf32>
    %80 = vector.broadcast %79 : vector<1x64xf32> to vector<128x64xf32>
    %81 = vector.broadcast %cst_17 : f32 to vector<128x64xf32>
    %82 = arith.select %77, %80, %81 : vector<128x64xi1>, vector<128x64xf32>
    %83 = arith.addf %74, %82 : vector<128x64xf32>
    %84 = vector.extract_strided_slice %9 {offsets = [8, 0], sizes = [1, 64], strides = [1, 1]} : vector<32x64xi32> to vector<1x64xi32>
    %85 = vector.broadcast %84 : vector<1x64xi32> to vector<128x64xi32>
    %86 = arith.cmpi eq, %12, %85 : vector<128x64xi32>
    %87 = vector.extract_strided_slice %11 {offsets = [8, 0], sizes = [1, 64], strides = [1, 1]} : vector<32x64xf32> to vector<1x64xf32>
    %cst_18 = arith.constant 0.000000e+00 : f32
    %88 = vector.shape_cast %87 : vector<1x64xf32> to vector<1x64xf32>
    %89 = vector.broadcast %88 : vector<1x64xf32> to vector<128x64xf32>
    %90 = vector.broadcast %cst_18 : f32 to vector<128x64xf32>
    %91 = arith.select %86, %89, %90 : vector<128x64xi1>, vector<128x64xf32>
    %92 = arith.addf %83, %91 : vector<128x64xf32>
    %93 = vector.extract_strided_slice %9 {offsets = [9, 0], sizes = [1, 64], strides = [1, 1]} : vector<32x64xi32> to vector<1x64xi32>
    %94 = vector.broadcast %93 : vector<1x64xi32> to vector<128x64xi32>
    %95 = arith.cmpi eq, %12, %94 : vector<128x64xi32>
    %96 = vector.extract_strided_slice %11 {offsets = [9, 0], sizes = [1, 64], strides = [1, 1]} : vector<32x64xf32> to vector<1x64xf32>
    %cst_19 = arith.constant 0.000000e+00 : f32
    %97 = vector.shape_cast %96 : vector<1x64xf32> to vector<1x64xf32>
    %98 = vector.broadcast %97 : vector<1x64xf32> to vector<128x64xf32>
    %99 = vector.broadcast %cst_19 : f32 to vector<128x64xf32>
    %100 = arith.select %95, %98, %99 : vector<128x64xi1>, vector<128x64xf32>
    %101 = arith.addf %92, %100 : vector<128x64xf32>
    %102 = vector.extract_strided_slice %9 {offsets = [10, 0], sizes = [1, 64], strides = [1, 1]} : vector<32x64xi32> to vector<1x64xi32>
    %103 = vector.broadcast %102 : vector<1x64xi32> to vector<128x64xi32>
    %104 = arith.cmpi eq, %12, %103 : vector<128x64xi32>
    %105 = vector.extract_strided_slice %11 {offsets = [10, 0], sizes = [1, 64], strides = [1, 1]} : vector<32x64xf32> to vector<1x64xf32>
    %cst_20 = arith.constant 0.000000e+00 : f32
    %106 = vector.shape_cast %105 : vector<1x64xf32> to vector<1x64xf32>
    %107 = vector.broadcast %106 : vector<1x64xf32> to vector<128x64xf32>
    %108 = vector.broadcast %cst_20 : f32 to vector<128x64xf32>
    %109 = arith.select %104, %107, %108 : vector<128x64xi1>, vector<128x64xf32>
    %110 = arith.addf %101, %109 : vector<128x64xf32>
    %111 = vector.extract_strided_slice %9 {offsets = [11, 0], sizes = [1, 64], strides = [1, 1]} : vector<32x64xi32> to vector<1x64xi32>
    %112 = vector.broadcast %111 : vector<1x64xi32> to vector<128x64xi32>
    %113 = arith.cmpi eq, %12, %112 : vector<128x64xi32>
    %114 = vector.extract_strided_slice %11 {offsets = [11, 0], sizes = [1, 64], strides = [1, 1]} : vector<32x64xf32> to vector<1x64xf32>
    %cst_21 = arith.constant 0.000000e+00 : f32
    %115 = vector.shape_cast %114 : vector<1x64xf32> to vector<1x64xf32>
    %116 = vector.broadcast %115 : vector<1x64xf32> to vector<128x64xf32>
    %117 = vector.broadcast %cst_21 : f32 to vector<128x64xf32>
    %118 = arith.select %113, %116, %117 : vector<128x64xi1>, vector<128x64xf32>
    %119 = arith.addf %110, %118 : vector<128x64xf32>
    %120 = vector.extract_strided_slice %9 {offsets = [12, 0], sizes = [1, 64], strides = [1, 1]} : vector<32x64xi32> to vector<1x64xi32>
    %121 = vector.broadcast %120 : vector<1x64xi32> to vector<128x64xi32>
    %122 = arith.cmpi eq, %12, %121 : vector<128x64xi32>
    %123 = vector.extract_strided_slice %11 {offsets = [12, 0], sizes = [1, 64], strides = [1, 1]} : vector<32x64xf32> to vector<1x64xf32>
    %cst_22 = arith.constant 0.000000e+00 : f32
    %124 = vector.shape_cast %123 : vector<1x64xf32> to vector<1x64xf32>
    %125 = vector.broadcast %124 : vector<1x64xf32> to vector<128x64xf32>
    %126 = vector.broadcast %cst_22 : f32 to vector<128x64xf32>
    %127 = arith.select %122, %125, %126 : vector<128x64xi1>, vector<128x64xf32>
    %128 = arith.addf %119, %127 : vector<128x64xf32>
    %129 = vector.extract_strided_slice %9 {offsets = [13, 0], sizes = [1, 64], strides = [1, 1]} : vector<32x64xi32> to vector<1x64xi32>
    %130 = vector.broadcast %129 : vector<1x64xi32> to vector<128x64xi32>
    %131 = arith.cmpi eq, %12, %130 : vector<128x64xi32>
    %132 = vector.extract_strided_slice %11 {offsets = [13, 0], sizes = [1, 64], strides = [1, 1]} : vector<32x64xf32> to vector<1x64xf32>
    %cst_23 = arith.constant 0.000000e+00 : f32
    %133 = vector.shape_cast %132 : vector<1x64xf32> to vector<1x64xf32>
    %134 = vector.broadcast %133 : vector<1x64xf32> to vector<128x64xf32>
    %135 = vector.broadcast %cst_23 : f32 to vector<128x64xf32>
    %136 = arith.select %131, %134, %135 : vector<128x64xi1>, vector<128x64xf32>
    %137 = arith.addf %128, %136 : vector<128x64xf32>
    %138 = vector.extract_strided_slice %9 {offsets = [14, 0], sizes = [1, 64], strides = [1, 1]} : vector<32x64xi32> to vector<1x64xi32>
    %139 = vector.broadcast %138 : vector<1x64xi32> to vector<128x64xi32>
    %140 = arith.cmpi eq, %12, %139 : vector<128x64xi32>
    %141 = vector.extract_strided_slice %11 {offsets = [14, 0], sizes = [1, 64], strides = [1, 1]} : vector<32x64xf32> to vector<1x64xf32>
    %cst_24 = arith.constant 0.000000e+00 : f32
    %142 = vector.shape_cast %141 : vector<1x64xf32> to vector<1x64xf32>
    %143 = vector.broadcast %142 : vector<1x64xf32> to vector<128x64xf32>
    %144 = vector.broadcast %cst_24 : f32 to vector<128x64xf32>
    %145 = arith.select %140, %143, %144 : vector<128x64xi1>, vector<128x64xf32>
    %146 = arith.addf %137, %145 : vector<128x64xf32>
    %147 = vector.extract_strided_slice %9 {offsets = [15, 0], sizes = [1, 64], strides = [1, 1]} : vector<32x64xi32> to vector<1x64xi32>
    %148 = vector.broadcast %147 : vector<1x64xi32> to vector<128x64xi32>
    %149 = arith.cmpi eq, %12, %148 : vector<128x64xi32>
    %150 = vector.extract_strided_slice %11 {offsets = [15, 0], sizes = [1, 64], strides = [1, 1]} : vector<32x64xf32> to vector<1x64xf32>
    %cst_25 = arith.constant 0.000000e+00 : f32
    %151 = vector.shape_cast %150 : vector<1x64xf32> to vector<1x64xf32>
    %152 = vector.broadcast %151 : vector<1x64xf32> to vector<128x64xf32>
    %153 = vector.broadcast %cst_25 : f32 to vector<128x64xf32>
    %154 = arith.select %149, %152, %153 : vector<128x64xi1>, vector<128x64xf32>
    %155 = arith.addf %146, %154 : vector<128x64xf32>
    %156 = vector.extract_strided_slice %9 {offsets = [16, 0], sizes = [1, 64], strides = [1, 1]} : vector<32x64xi32> to vector<1x64xi32>
    %157 = vector.broadcast %156 : vector<1x64xi32> to vector<128x64xi32>
    %158 = arith.cmpi eq, %12, %157 : vector<128x64xi32>
    %159 = vector.extract_strided_slice %11 {offsets = [16, 0], sizes = [1, 64], strides = [1, 1]} : vector<32x64xf32> to vector<1x64xf32>
    %cst_26 = arith.constant 0.000000e+00 : f32
    %160 = vector.shape_cast %159 : vector<1x64xf32> to vector<1x64xf32>
    %161 = vector.broadcast %160 : vector<1x64xf32> to vector<128x64xf32>
    %162 = vector.broadcast %cst_26 : f32 to vector<128x64xf32>
    %163 = arith.select %158, %161, %162 : vector<128x64xi1>, vector<128x64xf32>
    %164 = arith.addf %155, %163 : vector<128x64xf32>
    %165 = vector.extract_strided_slice %9 {offsets = [17, 0], sizes = [1, 64], strides = [1, 1]} : vector<32x64xi32> to vector<1x64xi32>
    %166 = vector.broadcast %165 : vector<1x64xi32> to vector<128x64xi32>
    %167 = arith.cmpi eq, %12, %166 : vector<128x64xi32>
    %168 = vector.extract_strided_slice %11 {offsets = [17, 0], sizes = [1, 64], strides = [1, 1]} : vector<32x64xf32> to vector<1x64xf32>
    %cst_27 = arith.constant 0.000000e+00 : f32
    %169 = vector.shape_cast %168 : vector<1x64xf32> to vector<1x64xf32>
    %170 = vector.broadcast %169 : vector<1x64xf32> to vector<128x64xf32>
    %171 = vector.broadcast %cst_27 : f32 to vector<128x64xf32>
    %172 = arith.select %167, %170, %171 : vector<128x64xi1>, vector<128x64xf32>
    %173 = arith.addf %164, %172 : vector<128x64xf32>
    %174 = vector.extract_strided_slice %9 {offsets = [18, 0], sizes = [1, 64], strides = [1, 1]} : vector<32x64xi32> to vector<1x64xi32>
    %175 = vector.broadcast %174 : vector<1x64xi32> to vector<128x64xi32>
    %176 = arith.cmpi eq, %12, %175 : vector<128x64xi32>
    %177 = vector.extract_strided_slice %11 {offsets = [18, 0], sizes = [1, 64], strides = [1, 1]} : vector<32x64xf32> to vector<1x64xf32>
    %cst_28 = arith.constant 0.000000e+00 : f32
    %178 = vector.shape_cast %177 : vector<1x64xf32> to vector<1x64xf32>
    %179 = vector.broadcast %178 : vector<1x64xf32> to vector<128x64xf32>
    %180 = vector.broadcast %cst_28 : f32 to vector<128x64xf32>
    %181 = arith.select %176, %179, %180 : vector<128x64xi1>, vector<128x64xf32>
    %182 = arith.addf %173, %181 : vector<128x64xf32>
    %183 = vector.extract_strided_slice %9 {offsets = [19, 0], sizes = [1, 64], strides = [1, 1]} : vector<32x64xi32> to vector<1x64xi32>
    %184 = vector.broadcast %183 : vector<1x64xi32> to vector<128x64xi32>
    %185 = arith.cmpi eq, %12, %184 : vector<128x64xi32>
    %186 = vector.extract_strided_slice %11 {offsets = [19, 0], sizes = [1, 64], strides = [1, 1]} : vector<32x64xf32> to vector<1x64xf32>
    %cst_29 = arith.constant 0.000000e+00 : f32
    %187 = vector.shape_cast %186 : vector<1x64xf32> to vector<1x64xf32>
    %188 = vector.broadcast %187 : vector<1x64xf32> to vector<128x64xf32>
    %189 = vector.broadcast %cst_29 : f32 to vector<128x64xf32>
    %190 = arith.select %185, %188, %189 : vector<128x64xi1>, vector<128x64xf32>
    %191 = arith.addf %182, %190 : vector<128x64xf32>
    %192 = vector.extract_strided_slice %9 {offsets = [20, 0], sizes = [1, 64], strides = [1, 1]} : vector<32x64xi32> to vector<1x64xi32>
    %193 = vector.broadcast %192 : vector<1x64xi32> to vector<128x64xi32>
    %194 = arith.cmpi eq, %12, %193 : vector<128x64xi32>
    %195 = vector.extract_strided_slice %11 {offsets = [20, 0], sizes = [1, 64], strides = [1, 1]} : vector<32x64xf32> to vector<1x64xf32>
    %cst_30 = arith.constant 0.000000e+00 : f32
    %196 = vector.shape_cast %195 : vector<1x64xf32> to vector<1x64xf32>
    %197 = vector.broadcast %196 : vector<1x64xf32> to vector<128x64xf32>
    %198 = vector.broadcast %cst_30 : f32 to vector<128x64xf32>
    %199 = arith.select %194, %197, %198 : vector<128x64xi1>, vector<128x64xf32>
    %200 = arith.addf %191, %199 : vector<128x64xf32>
    %201 = vector.extract_strided_slice %9 {offsets = [21, 0], sizes = [1, 64], strides = [1, 1]} : vector<32x64xi32> to vector<1x64xi32>
    %202 = vector.broadcast %201 : vector<1x64xi32> to vector<128x64xi32>
    %203 = arith.cmpi eq, %12, %202 : vector<128x64xi32>
    %204 = vector.extract_strided_slice %11 {offsets = [21, 0], sizes = [1, 64], strides = [1, 1]} : vector<32x64xf32> to vector<1x64xf32>
    %cst_31 = arith.constant 0.000000e+00 : f32
    %205 = vector.shape_cast %204 : vector<1x64xf32> to vector<1x64xf32>
    %206 = vector.broadcast %205 : vector<1x64xf32> to vector<128x64xf32>
    %207 = vector.broadcast %cst_31 : f32 to vector<128x64xf32>
    %208 = arith.select %203, %206, %207 : vector<128x64xi1>, vector<128x64xf32>
    %209 = arith.addf %200, %208 : vector<128x64xf32>
    %210 = vector.extract_strided_slice %9 {offsets = [22, 0], sizes = [1, 64], strides = [1, 1]} : vector<32x64xi32> to vector<1x64xi32>
    %211 = vector.broadcast %210 : vector<1x64xi32> to vector<128x64xi32>
    %212 = arith.cmpi eq, %12, %211 : vector<128x64xi32>
    %213 = vector.extract_strided_slice %11 {offsets = [22, 0], sizes = [1, 64], strides = [1, 1]} : vector<32x64xf32> to vector<1x64xf32>
    %cst_32 = arith.constant 0.000000e+00 : f32
    %214 = vector.shape_cast %213 : vector<1x64xf32> to vector<1x64xf32>
    %215 = vector.broadcast %214 : vector<1x64xf32> to vector<128x64xf32>
    %216 = vector.broadcast %cst_32 : f32 to vector<128x64xf32>
    %217 = arith.select %212, %215, %216 : vector<128x64xi1>, vector<128x64xf32>
    %218 = arith.addf %209, %217 : vector<128x64xf32>
    %219 = vector.extract_strided_slice %9 {offsets = [23, 0], sizes = [1, 64], strides = [1, 1]} : vector<32x64xi32> to vector<1x64xi32>
    %220 = vector.broadcast %219 : vector<1x64xi32> to vector<128x64xi32>
    %221 = arith.cmpi eq, %12, %220 : vector<128x64xi32>
    %222 = vector.extract_strided_slice %11 {offsets = [23, 0], sizes = [1, 64], strides = [1, 1]} : vector<32x64xf32> to vector<1x64xf32>
    %cst_33 = arith.constant 0.000000e+00 : f32
    %223 = vector.shape_cast %222 : vector<1x64xf32> to vector<1x64xf32>
    %224 = vector.broadcast %223 : vector<1x64xf32> to vector<128x64xf32>
    %225 = vector.broadcast %cst_33 : f32 to vector<128x64xf32>
    %226 = arith.select %221, %224, %225 : vector<128x64xi1>, vector<128x64xf32>
    %227 = arith.addf %218, %226 : vector<128x64xf32>
    %228 = vector.extract_strided_slice %9 {offsets = [24, 0], sizes = [1, 64], strides = [1, 1]} : vector<32x64xi32> to vector<1x64xi32>
    %229 = vector.broadcast %228 : vector<1x64xi32> to vector<128x64xi32>
    %230 = arith.cmpi eq, %12, %229 : vector<128x64xi32>
    %231 = vector.extract_strided_slice %11 {offsets = [24, 0], sizes = [1, 64], strides = [1, 1]} : vector<32x64xf32> to vector<1x64xf32>
    %cst_34 = arith.constant 0.000000e+00 : f32
    %232 = vector.shape_cast %231 : vector<1x64xf32> to vector<1x64xf32>
    %233 = vector.broadcast %232 : vector<1x64xf32> to vector<128x64xf32>
    %234 = vector.broadcast %cst_34 : f32 to vector<128x64xf32>
    %235 = arith.select %230, %233, %234 : vector<128x64xi1>, vector<128x64xf32>
    %236 = arith.addf %227, %235 : vector<128x64xf32>
    %237 = vector.extract_strided_slice %9 {offsets = [25, 0], sizes = [1, 64], strides = [1, 1]} : vector<32x64xi32> to vector<1x64xi32>
    %238 = vector.broadcast %237 : vector<1x64xi32> to vector<128x64xi32>
    %239 = arith.cmpi eq, %12, %238 : vector<128x64xi32>
    %240 = vector.extract_strided_slice %11 {offsets = [25, 0], sizes = [1, 64], strides = [1, 1]} : vector<32x64xf32> to vector<1x64xf32>
    %cst_35 = arith.constant 0.000000e+00 : f32
    %241 = vector.shape_cast %240 : vector<1x64xf32> to vector<1x64xf32>
    %242 = vector.broadcast %241 : vector<1x64xf32> to vector<128x64xf32>
    %243 = vector.broadcast %cst_35 : f32 to vector<128x64xf32>
    %244 = arith.select %239, %242, %243 : vector<128x64xi1>, vector<128x64xf32>
    %245 = arith.addf %236, %244 : vector<128x64xf32>
    %246 = vector.extract_strided_slice %9 {offsets = [26, 0], sizes = [1, 64], strides = [1, 1]} : vector<32x64xi32> to vector<1x64xi32>
    %247 = vector.broadcast %246 : vector<1x64xi32> to vector<128x64xi32>
    %248 = arith.cmpi eq, %12, %247 : vector<128x64xi32>
    %249 = vector.extract_strided_slice %11 {offsets = [26, 0], sizes = [1, 64], strides = [1, 1]} : vector<32x64xf32> to vector<1x64xf32>
    %cst_36 = arith.constant 0.000000e+00 : f32
    %250 = vector.shape_cast %249 : vector<1x64xf32> to vector<1x64xf32>
    %251 = vector.broadcast %250 : vector<1x64xf32> to vector<128x64xf32>
    %252 = vector.broadcast %cst_36 : f32 to vector<128x64xf32>
    %253 = arith.select %248, %251, %252 : vector<128x64xi1>, vector<128x64xf32>
    %254 = arith.addf %245, %253 : vector<128x64xf32>
    %255 = vector.extract_strided_slice %9 {offsets = [27, 0], sizes = [1, 64], strides = [1, 1]} : vector<32x64xi32> to vector<1x64xi32>
    %256 = vector.broadcast %255 : vector<1x64xi32> to vector<128x64xi32>
    %257 = arith.cmpi eq, %12, %256 : vector<128x64xi32>
    %258 = vector.extract_strided_slice %11 {offsets = [27, 0], sizes = [1, 64], strides = [1, 1]} : vector<32x64xf32> to vector<1x64xf32>
    %cst_37 = arith.constant 0.000000e+00 : f32
    %259 = vector.shape_cast %258 : vector<1x64xf32> to vector<1x64xf32>
    %260 = vector.broadcast %259 : vector<1x64xf32> to vector<128x64xf32>
    %261 = vector.broadcast %cst_37 : f32 to vector<128x64xf32>
    %262 = arith.select %257, %260, %261 : vector<128x64xi1>, vector<128x64xf32>
    %263 = arith.addf %254, %262 : vector<128x64xf32>
    %264 = vector.extract_strided_slice %9 {offsets = [28, 0], sizes = [1, 64], strides = [1, 1]} : vector<32x64xi32> to vector<1x64xi32>
    %265 = vector.broadcast %264 : vector<1x64xi32> to vector<128x64xi32>
    %266 = arith.cmpi eq, %12, %265 : vector<128x64xi32>
    %267 = vector.extract_strided_slice %11 {offsets = [28, 0], sizes = [1, 64], strides = [1, 1]} : vector<32x64xf32> to vector<1x64xf32>
    %cst_38 = arith.constant 0.000000e+00 : f32
    %268 = vector.shape_cast %267 : vector<1x64xf32> to vector<1x64xf32>
    %269 = vector.broadcast %268 : vector<1x64xf32> to vector<128x64xf32>
    %270 = vector.broadcast %cst_38 : f32 to vector<128x64xf32>
    %271 = arith.select %266, %269, %270 : vector<128x64xi1>, vector<128x64xf32>
    %272 = arith.addf %263, %271 : vector<128x64xf32>
    %273 = vector.extract_strided_slice %9 {offsets = [29, 0], sizes = [1, 64], strides = [1, 1]} : vector<32x64xi32> to vector<1x64xi32>
    %274 = vector.broadcast %273 : vector<1x64xi32> to vector<128x64xi32>
    %275 = arith.cmpi eq, %12, %274 : vector<128x64xi32>
    %276 = vector.extract_strided_slice %11 {offsets = [29, 0], sizes = [1, 64], strides = [1, 1]} : vector<32x64xf32> to vector<1x64xf32>
    %cst_39 = arith.constant 0.000000e+00 : f32
    %277 = vector.shape_cast %276 : vector<1x64xf32> to vector<1x64xf32>
    %278 = vector.broadcast %277 : vector<1x64xf32> to vector<128x64xf32>
    %279 = vector.broadcast %cst_39 : f32 to vector<128x64xf32>
    %280 = arith.select %275, %278, %279 : vector<128x64xi1>, vector<128x64xf32>
    %281 = arith.addf %272, %280 : vector<128x64xf32>
    %282 = vector.extract_strided_slice %9 {offsets = [30, 0], sizes = [1, 64], strides = [1, 1]} : vector<32x64xi32> to vector<1x64xi32>
    %283 = vector.broadcast %282 : vector<1x64xi32> to vector<128x64xi32>
    %284 = arith.cmpi eq, %12, %283 : vector<128x64xi32>
    %285 = vector.extract_strided_slice %11 {offsets = [30, 0], sizes = [1, 64], strides = [1, 1]} : vector<32x64xf32> to vector<1x64xf32>
    %cst_40 = arith.constant 0.000000e+00 : f32
    %286 = vector.shape_cast %285 : vector<1x64xf32> to vector<1x64xf32>
    %287 = vector.broadcast %286 : vector<1x64xf32> to vector<128x64xf32>
    %288 = vector.broadcast %cst_40 : f32 to vector<128x64xf32>
    %289 = arith.select %284, %287, %288 : vector<128x64xi1>, vector<128x64xf32>
    %290 = arith.addf %281, %289 : vector<128x64xf32>
    %291 = vector.extract_strided_slice %9 {offsets = [31, 0], sizes = [1, 64], strides = [1, 1]} : vector<32x64xi32> to vector<1x64xi32>
    %292 = vector.broadcast %291 : vector<1x64xi32> to vector<128x64xi32>
    %293 = arith.cmpi eq, %12, %292 : vector<128x64xi32>
    %294 = vector.extract_strided_slice %11 {offsets = [31, 0], sizes = [1, 64], strides = [1, 1]} : vector<32x64xf32> to vector<1x64xf32>
    %cst_41 = arith.constant 0.000000e+00 : f32
    %295 = vector.shape_cast %294 : vector<1x64xf32> to vector<1x64xf32>
    %296 = vector.broadcast %295 : vector<1x64xf32> to vector<128x64xf32>
    %297 = vector.broadcast %cst_41 : f32 to vector<128x64xf32>
    %298 = arith.select %293, %296, %297 : vector<128x64xi1>, vector<128x64xf32>
    %299 = arith.addf %290, %298 : vector<128x64xf32>
    %c0_42 = arith.constant 0 : index
    %c0_43 = arith.constant 0 : index
    %300 = vector.load %arg16[%c0_42, %c0_43] : memref<32x64xf32, #tpu.memory_space<vmem>>, vector<32x64xf32>
    %c0_44 = arith.constant 0 : index
    %c0_45 = arith.constant 0 : index
    %c0_46 = arith.constant 0 : index
    %c0_47 = arith.constant 0 : index
    %301 = vector.load %arg6[%c0_44, %c0_45, %c0_46, %c0_47] : memref<1x1x32x128xbf16, #tpu.memory_space<vmem>>, vector<1x1x32x128xbf16>
    %302 = vector.shape_cast %301 : vector<1x1x32x128xbf16> to vector<32x128xbf16>
    %303 = arith.truncf %299 : vector<128x64xf32> to vector<128x64xbf16>
    %cst_48 = arith.constant dense<0.000000e+00> : vector<32x64xf32>
    %304 = tpu.matmul %302, %303, %cst_48 {dimension_numbers = #tpu.dot_dimension_numbers<[1], [0], [0], [1], [0, 0, 1, 1], [], []>} : vector<32x128xbf16>, vector<128x64xbf16>, vector<32x64xf32> -> vector<32x64xf32>
    %305 = arith.addf %300, %304 : vector<32x64xf32>
    %c0_49 = arith.constant 0 : index
    %c0_50 = arith.constant 0 : index
    %306 = vector.load %arg16[%c0_49, %c0_50] : memref<32x64xf32, #tpu.memory_space<vmem>>, vector<32x64xf32>
    tpu.vector_store %arg16[%c0_49, %c0_50], %305 {strides = array<i32>} : memref<32x64xf32, #tpu.memory_space<vmem>>, vector<32x64xf32>,
    %c1_i32 = arith.constant 1 : i32
    %307 = arith.cmpi eq, %arg2, %c1_i32 : i32
    %c1_i32_51 = arith.constant 1 : i32
    %308 = arith.cmpi eq, %arg3, %c1_i32_51 : i32
    %309 = arith.andi %307, %308 : i1
    %310 = arith.extui %309 : i1 to i32
    %c0_i32_52 = arith.constant 0 : i32
    %311 = arith.cmpi ne, %310, %c0_i32_52 : i32
    scf.if %311 {
      %c0_53 = arith.constant 0 : index
      %c0_54 = arith.constant 0 : index
      %312 = vector.load %arg9[%c0_53, %c0_54] : memref<64x2xf32, #tpu.memory_space<vmem>>, vector<64x2xf32>
      %c0_55 = arith.constant 0 : index
      %c0_56 = arith.constant 0 : index
      %c0_57 = arith.constant 0 : index
      %c0_58 = arith.constant 0 : index
      %313 = vector.load %arg7[%c0_55, %c0_56, %c0_57, %c0_58] : memref<1x1x2x64xf32, #tpu.memory_space<vmem>>, vector<1x1x2x64xf32>
      %314 = vector.shape_cast %313 : vector<1x1x2x64xf32> to vector<2x64xf32>
      %cst_59 = arith.constant dense<0.000000e+00> : vector<64x64xf32>
      %315 = tpu.matmul %312, %314, %cst_59 {dimension_numbers = #tpu.dot_dimension_numbers<[1], [0], [0], [1], [0, 0, 1, 1], [], []>} : vector<64x2xf32>, vector<2x64xf32>, vector<64x64xf32> -> vector<64x64xf32>
      %c0_60 = arith.constant 0 : index
      %c0_61 = arith.constant 0 : index
      %316 = vector.load %arg10[%c0_60, %c0_61] : memref<64x1xf32, #tpu.memory_space<vmem>>, vector<64x1xf32>
      %317 = vector.broadcast %316 : vector<64x1xf32> to vector<64x64xf32>
      %318 = arith.addf %315, %317 : vector<64x64xf32>
      %cst_62 = arith.constant 0.000000e+00 : f32
      %319 = vector.broadcast %cst_62 : f32 to vector<64x64xf32>
      %320 = arith.maximumf %318, %319 : vector<64x64xf32>
      %c0_63 = arith.constant 0 : index
      %c0_64 = arith.constant 0 : index
      %321 = vector.load %arg11[%c0_63, %c0_64] : memref<32x64xf32, #tpu.memory_space<vmem>>, vector<32x64xf32>
      %cst_65 = arith.constant dense<0.000000e+00> : vector<32x64xf32>
      %322 = tpu.matmul %321, %320, %cst_65 {dimension_numbers = #tpu.dot_dimension_numbers<[1], [0], [0], [1], [0, 0, 1, 1], [], []>} : vector<32x64xf32>, vector<64x64xf32>, vector<32x64xf32> -> vector<32x64xf32>
      %c0_66 = arith.constant 0 : index
      %c0_67 = arith.constant 0 : index
      %323 = vector.load %arg12[%c0_66, %c0_67] : memref<32x1xf32, #tpu.memory_space<vmem>>, vector<32x1xf32>
      %324 = vector.broadcast %323 : vector<32x1xf32> to vector<32x64xf32>
      %325 = arith.addf %322, %324 : vector<32x64xf32>
      %c0_68 = arith.constant 0 : index
      %c0_69 = arith.constant 0 : index
      %c0_70 = arith.constant 0 : index
      %c0_71 = arith.constant 0 : index
      %326 = vector.load %arg8[%c0_68, %c0_69, %c0_70, %c0_71] : memref<1x1x32x64xf32, #tpu.memory_space<vmem>>, vector<1x1x32x64xf32>
      %327 = vector.shape_cast %326 : vector<1x1x32x64xf32> to vector<32x64xf32>
      %328 = arith.addf %327, %325 : vector<32x64xf32>
      %c0_72 = arith.constant 0 : index
      %c0_73 = arith.constant 0 : index
      %329 = vector.load %arg16[%c0_72, %c0_73] : memref<32x64xf32, #tpu.memory_space<vmem>>, vector<32x64xf32>
      %330 = arith.addf %328, %329 : vector<32x64xf32>
      %cst_74 = arith.constant dense<0.000000e+00> : vector<64xf32>
      %331 = vector.multi_reduction <add>, %330, %cst_74 [0] : vector<32x64xf32> to vector<64xf32>
      %332 = vector.shape_cast %331 : vector<64xf32> to vector<1x64xf32>
      %cst_75 = arith.constant 3.200000e+01 : f32
      %333 = vector.broadcast %cst_75 : f32 to vector<1x64xf32>
      %334 = arith.divf %332, %333 : vector<1x64xf32>
      %335 = vector.broadcast %334 : vector<1x64xf32> to vector<32x64xf32>
      %336 = arith.subf %330, %335 : vector<32x64xf32>
      %337 = arith.mulf %336, %336 : vector<32x64xf32>
      %cst_76 = arith.constant dense<0.000000e+00> : vector<64xf32>
      %338 = vector.multi_reduction <add>, %337, %cst_76 [0] : vector<32x64xf32> to vector<64xf32>
      %339 = vector.shape_cast %338 : vector<64xf32> to vector<1x64xf32>
      %cst_77 = arith.constant 3.200000e+01 : f32
      %340 = vector.broadcast %cst_77 : f32 to vector<1x64xf32>
      %341 = arith.divf %339, %340 : vector<1x64xf32>
      %cst_78 = arith.constant 9.99999974E-6 : f32
      %342 = vector.broadcast %cst_78 : f32 to vector<1x64xf32>
      %343 = arith.addf %341, %342 : vector<1x64xf32>
      %344 = math.rsqrt %343 : vector<1x64xf32>
      %345 = vector.broadcast %344 : vector<1x64xf32> to vector<32x64xf32>
      %346 = arith.mulf %336, %345 : vector<32x64xf32>
      %c0_79 = arith.constant 0 : index
      %c0_80 = arith.constant 0 : index
      %347 = vector.load %arg13[%c0_79, %c0_80] : memref<32x1xf32, #tpu.memory_space<vmem>>, vector<32x1xf32>
      %348 = vector.broadcast %347 : vector<32x1xf32> to vector<32x64xf32>
      %349 = arith.mulf %346, %348 : vector<32x64xf32>
      %c0_81 = arith.constant 0 : index
      %c0_82 = arith.constant 0 : index
      %350 = vector.load %arg14[%c0_81, %c0_82] : memref<32x1xf32, #tpu.memory_space<vmem>>, vector<32x1xf32>
      %351 = vector.broadcast %350 : vector<32x1xf32> to vector<32x64xf32>
      %352 = arith.addf %349, %351 : vector<32x64xf32>
      %c0_83 = arith.constant 0 : index
      %c0_84 = arith.constant 0 : index
      %c0_85 = arith.constant 0 : index
      %c0_86 = arith.constant 0 : index
      %353 = vector.load %arg15[%c0_83, %c0_84, %c0_85, %c0_86] : memref<1x1x32x64xf32, #tpu.memory_space<vmem>>, vector<1x1x32x64xf32>
      %354 = vector.shape_cast %353 : vector<1x1x32x64xf32> to vector<32x64xf32>
      %355 = vector.shape_cast %352 : vector<32x64xf32> to vector<1x1x32x64xf32>
      tpu.vector_store %arg15[%c0_83, %c0_84, %c0_85, %c0_86], %355 {strides = array<i32>} : memref<1x1x32x64xf32, #tpu.memory_space<vmem>>, vector<1x1x32x64xf32>,
    } else {
    }
    return
  }
  func.func @transform_0(%arg0: i32, %arg1: i32, %arg2: i32, %arg3: i32) -> (i32, i32, i32, i32, i32) {
    %c0_i32 = arith.constant 0 : i32
    %c0_i32_0 = arith.constant 0 : i32
    %c0_i32_1 = arith.constant 0 : i32
    return %arg0, %arg1, %arg2, %c0_i32, %c0_i32_0 : i32, i32, i32, i32, i32
  }
  func.func @transform_1(%arg0: i32, %arg1: i32, %arg2: i32, %arg3: i32) -> (i32, i32, i32, i32, i32) {
    %c0_i32 = arith.constant 0 : i32
    %c0_i32_0 = arith.constant 0 : i32
    %c0_i32_1 = arith.constant 0 : i32
    return %arg0, %arg1, %arg2, %c0_i32, %c0_i32_0 : i32, i32, i32, i32, i32
  }
  func.func @transform_2(%arg0: i32, %arg1: i32, %arg2: i32, %arg3: i32) -> (i32, i32, i32, i32) {
    %c0_i32 = arith.constant 0 : i32
    %c0_i32_0 = arith.constant 0 : i32
    return %arg0, %arg2, %c0_i32, %arg3 : i32, i32, i32, i32
  }
  func.func @transform_3(%arg0: i32, %arg1: i32, %arg2: i32, %arg3: i32) -> (i32, i32, i32, i32) {
    %c0_i32 = arith.constant 0 : i32
    %c0_i32_0 = arith.constant 0 : i32
    %c0_i32_1 = arith.constant 0 : i32
    return %arg0, %arg1, %c0_i32, %c0_i32_0 : i32, i32, i32, i32
  }
  func.func @transform_4(%arg0: i32, %arg1: i32, %arg2: i32, %arg3: i32) -> (i32, i32, i32, i32) {
    %c0_i32 = arith.constant 0 : i32
    %c0_i32_0 = arith.constant 0 : i32
    %c0_i32_1 = arith.constant 0 : i32
    return %arg0, %arg1, %c0_i32, %c0_i32_0 : i32, i32, i32, i32
  }
  func.func @transform_5(%arg0: i32, %arg1: i32, %arg2: i32, %arg3: i32) -> (i32, i32) {
    %c0_i32 = arith.constant 0 : i32
    %c0_i32_0 = arith.constant 0 : i32
    %c0_i32_1 = arith.constant 0 : i32
    return %c0_i32, %c0_i32_0 : i32, i32
  }
  func.func @transform_6(%arg0: i32, %arg1: i32, %arg2: i32, %arg3: i32) -> (i32, i32) {
    %c0_i32 = arith.constant 0 : i32
    %c0_i32_0 = arith.constant 0 : i32
    %c0_i32_1 = arith.constant 0 : i32
    return %c0_i32, %c0_i32_0 : i32, i32
  }
  func.func @transform_7(%arg0: i32, %arg1: i32, %arg2: i32, %arg3: i32) -> (i32, i32) {
    %c0_i32 = arith.constant 0 : i32
    %c0_i32_0 = arith.constant 0 : i32
    %c0_i32_1 = arith.constant 0 : i32
    return %c0_i32, %c0_i32_0 : i32, i32
  }
  func.func @transform_8(%arg0: i32, %arg1: i32, %arg2: i32, %arg3: i32) -> (i32, i32) {
    %c0_i32 = arith.constant 0 : i32
    %c0_i32_0 = arith.constant 0 : i32
    %c0_i32_1 = arith.constant 0 : i32
    return %c0_i32, %c0_i32_0 : i32, i32
  }
  func.func @transform_9(%arg0: i32, %arg1: i32, %arg2: i32, %arg3: i32) -> (i32, i32) {
    %c0_i32 = arith.constant 0 : i32
    %c0_i32_0 = arith.constant 0 : i32
    %c0_i32_1 = arith.constant 0 : i32
    return %c0_i32, %c0_i32_0 : i32, i32
  }
  func.func @transform_10(%arg0: i32, %arg1: i32, %arg2: i32, %arg3: i32) -> (i32, i32) {
    %c0_i32 = arith.constant 0 : i32
    %c0_i32_0 = arith.constant 0 : i32
    %c0_i32_1 = arith.constant 0 : i32
    return %c0_i32, %c0_i32_0 : i32, i32
  }
  func.func @transform_11(%arg0: i32, %arg1: i32, %arg2: i32, %arg3: i32) -> (i32, i32, i32, i32) {
    %c0_i32 = arith.constant 0 : i32
    %c0_i32_0 = arith.constant 0 : i32
    %c0_i32_1 = arith.constant 0 : i32
    return %arg0, %arg1, %c0_i32, %c0_i32_0 : i32, i32, i32, i32
  }
}

</mosaic_0001>

<bundles_post_ra>
// kernel: tpu_custom_call.1
= control target key start
LH: loop header
LB: loop body
LE: loop exit
PB: predicated region body
PF: predicated region fallthrough
CT: control target
= control target key end

     0   :  { %s7447_s0 = inlined_call_operand.vmem [shape: s32[2,1,2,32,64], index: 0, kind: input, shape index: {}]   ;;  %s7448_s1 = inlined_call_operand.hbm [shape: f32[2,1,2,32,64], index: 1, kind: input, shape index: {}]   ;;  %s7449_s2 = inlined_call_operand.hbm [shape: bf16[2,2,32,256], index: 2, kind: input, shape index: {}]   ;;  %s7450_s3 = inlined_call_operand.vmem [shape: f32[2,1,2,64], index: 3, kind: input, shape index: {}]   ;;  %s7451_s4 = inlined_call_operand.vmem [shape: f32[2,1,32,64], index: 4, kind: input, shape index: {}]   ;;  %s7452_s5 = inlined_call_operand.vmem [shape: f32[64,2], index: 5, kind: input, shape index: {}]   ;;  %s7453_s6 = inlined_call_operand.vmem [shape: f32[64,1], index: 6, kind: input, shape index: {}]   ;;  %s7454_s7 = inlined_call_operand.vmem [shape: f32[32,64], index: 7, kind: input, shape index: {}]   ;;  %s7455_s8 = inlined_call_operand.vmem [shape: f32[32,1], index: 8, kind: input, shape index: {}]   ;;  %s7456_s9 = inlined_call_operand.vmem [shape: f32[32,1], index: 9, kind: input, shape index: {}]   ;;  %s7457_s10 = inlined_call_operand.vmem [shape: f32[32,1], index: 10, kind: input, shape index: {}]   ;;  %s7458_s11 = inlined_call_operand.hbm [shape: f32[2,1,32,64], index: 11, kind: output, shape index: {}]  }
   0x1   :  { %7663 = sst [smem:[#allocation50_spill]] %s7447_s0 }
   0x2   :  { %7664 = sst [smem:[#allocation51_spill]] %s7448_s1 }
   0x3   :  { %7665 = sst [smem:[#allocation52_spill]] %s7449_s2 }
   0x4   :  { %7666 = sst [smem:[#allocation53_spill]] %s7450_s3 }
   0x5   :  { %7667 = sst [smem:[#allocation54_spill]] %s7451_s4 }
   0x6   :  { %7668 = sst [smem:[#allocation55_spill]] %s7452_s5 }
   0x7   :  { %7669 = sst [smem:[#allocation56_spill]] %s7453_s6 }
   0x8   :  { %7670 = sst [smem:[#allocation57_spill]] %s7454_s7 }
   0x9   :  { %7671 = sst [smem:[#allocation58_spill]] %s7455_s8 }
   0xa   :  { %7672 = sst [smem:[#allocation59_spill]] %s7456_s9 }
   0xb   :  { %7673 = sst [smem:[#allocation60_spill]] %s7457_s10 }
   0xc   :  { %7674 = sst [smem:[#allocation61_spill]] %s7458_s11 }
   0xd   :  { %16 = vsyncpa [#allocation4], 0 }
   0xe   :  { %18 = vsyncpa [#allocation4 + $0x1], 0 }
   0xf   :  { %19 = vsyncpa [#allocation7], 0 }
  0x10   :  { %21 = vsyncpa [#allocation7 + $0x1], 0 }
  0x11   :  { %22 = vsyncpa [#allocation5], 0 }
  0x12   :  { %24 = vsyncpa [#allocation5 + $0x1], 0  ;;  %s3775_s17 = smov 0   ;;  %s3777_s18 = smov 0  }
  0x13   :  { %s3779_s19 = smov 0   ;;  %s3781_s20 = smov 0  }
  0x14   :  { %s3783_s21 = smov 0   ;;  %s3785_s22 = smov 0  }
  0x15   :  { %s3787_s23 = smov 0   ;;  %s3789_s24 = smov 0  }
  0x16   :  { %s3791_s25 = smov 0   ;;  %s3793_s26 = smov 0  }
  0x17   :  { %s3795_s27 = smov 0   ;;  %s3797_s28 = smov 0  }
  0x18   :  { %s3799_s29 = smov 0   ;;  %s3801_s30 = smov 0  }
  0x19   :  { %s3803_s12 = smov 0   ;;  %s3805_s13 = smov 0  }
  0x1a LB: > { %7675 = sst [smem:[#allocation12_spill]] %s3642_s17  ;;  %s3159_s14 = sadd.s32 4294967295, %s3702_s13   ;;  %s3702_s13 = sphi %s3805_s13, %s30_s13   ;;  %s3698_s12 = sphi %s3803_s12, %s7988_s12   ;;  %s3694_s30 = sphi %s3801_s30, %s7995_s30   ;;  %s3690_s29 = sphi %s3799_s29, %s7986_s29   ;;  %s3686_s28 = sphi %s3797_s28, %s7985_s28   ;;  %s3682_s27 = sphi %s3795_s27, %s7984_s27   ;;  %s3678_s26 = sphi %s3793_s26, %s7983_s26   ;;  %s3674_s25 = sphi %s3791_s25, %s7982_s25   ;;  %s3670_s24 = sphi %s3789_s24, %s7994_s24   ;;  %s3666_s23 = sphi %s3787_s23, %s7993_s23   ;;  %s3662_s22 = sphi %s3785_s22, %s7992_s22   ;;  %s3658_s21 = sphi %s3783_s21, %s7991_s21   ;;  %s3654_s20 = sphi %s3781_s20, %s7980_s20   ;;  %s3650_s19 = sphi %s3779_s19, %s7990_s19   ;;  %s3646_s18 = sphi %s3777_s18, %s7989_s18   ;;  %s3642_s17 = sphi %s3775_s17, %s7979_s17  }
  0x1b   : > { %7676 = sst [smem:[#allocation13_spill]] %s3646_s18  ;;  %s3160_s15 = sadd.s32 4294967294, %s3702_s13  }
  0x1c   : > { %7677 = sst [smem:[#allocation14_spill]] %s3658_s21  ;;  %p104_p0 = scmp.ne.s32.totalorder %s3674_s25, %s3670_s24 }
  0x1d   : > { %7678 = sst [smem:[#allocation15_spill]] %s3674_s25  ;;  %p7471_p1 = scmp.eq.s32.totalorder %s3702_s13, 0 }
  0x1e   : > { %7679 = sst [smem:[#allocation16_spill]] %s3678_s26  ;;  %p110_p2 = scmp.ne.s32.totalorder %s3670_s24, %s3666_s23 }
  0x1f   : > { %7680 = sst [smem:[#allocation17_spill]] %s3682_s27  ;;  %p3862_p3 = scmp.eq.s32.totalorder %s3159_s14, 0 }
  0x20   : > { %7681 = sst [smem:[#allocation18_spill]] %s3686_s28  ;;  %p347_p4 = scmp.ne.s32.totalorder %s3650_s19, %s3646_s18 }
  0x21   : > { %7682 = sst [smem:[#allocation19_spill]] %s3690_s29  ;;  %p3870_p5 = por %p7471_p1, %p104_p0 }
  0x22   : > { %7683 = sst [smem:[#allocation20_spill]] %s3694_s30  ;;  %p348_p6 = scmp.eq.s32.totalorder %s3159_s14, 7 }
  0x23   : > { %7684 = sst [smem:[#allocation21_spill]] %s3698_s12  ;;  %p3876_p7 = por %p3862_p3, %p110_p2 }
  0x24   : > { %p353_p8 = scmp.ne.s32.totalorder %s3646_s18, %s3642_s17  ;;  %p3882_p9 = por %p348_p6, %p347_p4 }
  0x25   : > { %s7687_s7 = scalar_select %p3876_p7, 1, 0 }
  0x26   : > { %s7688_s23 = scalar_select %p3882_p9, 1, 0 }
  0x27   : > { %p354_p10 = scmp.eq.s32.totalorder %s3160_s15, 7  ;;  %p7470_p11 = scmp.lt.s32.totalorder %s3702_s13, 8 }
  0x28   : > { %7689 = sst [smem:[#allocation22_spill]] %s7688_s23  ;;  %s408_s16 = sand.u32 1, %s3674_s25  }
  0x29   : > { %p3887_p12 = por %p354_p10, %p353_p8  ;;  %s3163_s14 = sshll.u32 %s408_s16, 5 }
  0x2a   : > { %s3164_s8 = sshll.u32 %s3694_s30, 2  ;;  %s3165_s6 = sshll.u32 %s3698_s12, 3 }
  0x2b   : > { %s7690_s11 = scalar_select %p3887_p12, 1, 0 }
  0x2c   : > { %s412_s5 = scalar_lea.vmem [#allocation3], %s3163_s14  ;;  %s420_s4 = sadd.s32 %s3165_s6, %s3164_s8 }
  0x2d   : > { %7691 = sst [smem:[#allocation23_spill]] %s7690_s11  ;;  %s423_s0 = sshll.u32 %s412_s5, 4  ;;  %s3894_s0 = int_to_ptr.vmem [resolvable:$true] %s423_s0 }
  0x2e   : > { %s3166_s17 = sshll.u32 %s420_s4, 7  ;;  %p3900_p13 = pnand %p7470_p11, %p3870_p5 }
  0x2f   : > { %s7693_s1 = sld [smem:[#allocation51_spill]]  ;;  %s3909_s5 = scalar_lea.sflag [#allocation4], %s408_s16 }
  0x30   : > { %p3478_p2 = pneg %p3900_p13 }
  0x35   : > { %s3907_s11 = scalar_lea.hbm %s7693_s1, %s3166_s17  ;;  %s3481_s8 = scalar_lea.hbm %s7693_s1, 2048 }
  0x36   : > { %s3476_s4 = scalar_lea.hbm %s3907_s11, 512  ;;  %p3482_p6 = scmp.lt.u32.totalorder %s3907_s11, %s7693_s1 }
  0x37   : > { %p3477_p0 = scmp.ne.s32.totalorder %s3907_s11, %s3476_s4  ;;  %p3483_p8 = scmp.lt.u32.totalorder %s3481_s8, %s3476_s4 }
  0x38   : > { %p3485_p11 = scmp.lt.u32.totalorder %s3476_s4, %s3907_s11 }
  0x39   : > { %p3479_p4 = pnand %p3478_p2, %p3477_p0  ;;  %p3484_p10 = por %p3483_p8, %p3482_p6 }
  0x3b   : > { %p3480_p5 = pneg %p3479_p4  ;;  %p3486_p1 = por %p3485_p11, %p3484_p10 }
  0x3d   : > { %p3487_p12 = pnand %p3486_p1, %p3480_p5 }
  0x3f   : > { %3490 = shalt.err (!%p3487_p12)
}
  0x40   : > { %s3491_s16 = scalar_lea.vmem %s3894_s0, 512  ;;  %s3704_s14 = smov [#allocation3]  }
  0x41   : > { %p3492_p0 = scmp.ne.s32.totalorder %s3894_s0, %s3491_s16  ;;  %s3496_s15 = sshll.u32 %s3704_s14, 4  ;;  %s3497_s15 = int_to_ptr.vmem [resolvable:$false] %s3496_s15 }
  0x42   : > { %s3498_s6 = scalar_lea.vmem %s3497_s15, 1024  ;;  %p3499_p7 = scmp.lt.s32.totalorder %s3894_s0, %s3497_s15 }
  0x43   : > { %p3494_p4 = pnand %p3492_p0, %p3478_p2  ;;  %p3500_p6 = scmp.lt.s32.totalorder %s3498_s6, %s3491_s16 }
  0x45   : > { %p3495_p9 = pneg %p3494_p4  ;;  %p3501_p8 = por %p3500_p6, %p3499_p7 }
  0x47   : > { %p3502_p11 = pnand %p3501_p8, %p3495_p9 }
  0x49   : > { %3505 = shalt.err (!%p3502_p11)
}
  0x4a   : > { %s7474_s4 = smov 128   ;;  %s3706_s3 = smov 8  }
  0x4b   : > { %3324 = dma.hbm_to_vmem [thread:$0]  (!%p3900_p13), %s3907_s11, 512, %s3894_s0, %s3909_s5, %s7474_s4, %s7474_s4, %s3706_s3  }
  0x4c   : > { %p3171_p1 = scmp.ge.s32.totalorder %s3702_s13, 1  ;;  %p477_p7 = scmp.lt.s32.totalorder %s3702_s13, 9 }
  0x4d   : > { %s45_s9 = sadd.s32 1, %s3690_s29  ;;  %p134_p2 = scmp.ne.s32.totalorder %s3662_s22, %s3658_s21 }
  0x4e   : > { %p3941_p9 = pnand %p3171_p1, %p477_p7  ;;  %p46_p12 = scmp.ge.s32.totalorder %s45_s9, 2 }
  0x4f   : > { %p140_p5 = scmp.ne.s32.totalorder %s3658_s21, %s3654_s20  ;;  %s7696_s0 = sadd.s32 1, %s3694_s30 }
  0x50   : > { %s7997_s9 = smov (%p46_p12, %s45_s9), 0  ;;  %s7999_s0 = smov (!%p46_p12, %s7696_s0), %s3694_s30 }
  0x51   : > { %7695 = sst [smem:[#allocation24_spill]] %s7997_s9  ;;  %s123_s11 = ssub.s32 %s3690_s29, %s7997_s9 }
  0x52   : > { %p7697_p13 = scmp.eq.s32.totalorder %s3702_s13, 0  ;;  %p50_p0 = scmp.ge.s32.totalorder %s7999_s0, 2 }
  0x53   : > { %p3966_p4 = por %p140_p5, %p3862_p3  ;;  %s337_s20 = sadd.s32 1, %s3650_s19 }
  0x54   : > { %p3960_p10 = por %p134_p2, %p7697_p13  ;;  %s433_s16 = sand.u32 1, %s3662_s22  }
  0x55   : > { %s7699_s5 = scalar_select %p3966_p4, 1, 0 }
  0x56   : > { %s8001_s0 = smov (%p50_p0, %s7999_s0), 0  ;;  %s7702_s14 = sadd.s32 1, %s3698_s12 }
  0x57   : > { %7700 = sst [smem:[#allocation25_spill]] %s7699_s5  ;;  %s8003_s14 = smov (!%p50_p0, %s7702_s14), %s3698_s12 }
  0x58   : > { %7701 = sst [smem:[#allocation26_spill]] %s8001_s0  ;;  %s93_s15 = ssub.s32 %s3694_s30, %s8001_s0 }
  0x59   : > { %p58_p6 = scmp.ge.s32.totalorder %s8003_s14, 2  ;;  %s3167_s6 = sshll.u32 %s433_s16, 4 }
  0x5a   : > { %s3168_s10 = sshll.u32 %s3694_s30, 3  ;;  %s3169_s4 = sshll.u32 %s3698_s12, 4 }
  0x5b   : > { %s8005_s14 = smov (%p58_p6, %s8003_s14), 0  ;;  %s442_s3 = sadd.s32 %s3690_s29, %s3168_s10 }
  0x5c   : > { %7703 = sst [smem:[#allocation27_spill]] %s8005_s14  ;;  %s90_s17 = ssub.s32 %s3698_s12, %s8005_s14 }
  0x5d   : > { %s444_s1 = sadd.s32 %s3169_s4, %s442_s3  ;;  %s94_s9 = sor.u32 %s93_s15, %s90_s17 }
  0x5e   : > { %p335_p3 = scmp.eq.s32.totalorder %s90_s17, 0  ;;  %p95_p8 = scmp.eq.s32.totalorder %s94_s9, 0 }
  0x5f   : > { %s124_s26 = sor.u32 %s123_s11, %s94_s9  ;;  %s3170_s0 = sshll.u32 %s444_s1, 6 }
  0x60   : > { %p125_p11 = scmp.eq.s32.totalorder %s124_s26, 0  ;;  %s7704_s27 = sadd.s32 1, %s3674_s25 }
  0x61   : > { %s3989_s28 = scalar_select %p95_p8, %s3674_s25, %s7704_s27  }
  0x62   : > { %s7706_s18 = sadd.s32 1, %s3662_s22  ;;  %s7707_s2 = sld [smem:[#allocation52_spill]] }
  0x63   : > { %7705 = sst [smem:[#allocation28_spill]] %s3989_s28  ;;  %s437_s4 = scalar_lea.vmem [#allocation6], %s3167_s6 }
  0x64   : > { %s3994_s30 = scalar_select %p125_p11, %s3662_s22, %s7706_s18  }
  0x65   : > { %s3997_s5 = scalar_select %p335_p3, %s3650_s19, %s337_s20  }
  0x66   : > { %s447_s26 = sshll.u32 %s437_s4, 4  ;;  %p7708_p1 = scmp.lt.s32.totalorder %s3702_s13, 8  ;;  %s4004_s26 = int_to_ptr.vmem [resolvable:$true] %s447_s26 }
  0x67   : > { %s4014_s18 = scalar_lea.sflag [#allocation7], %s433_s16 }
  0x68   : > { %s4002_s21 = scalar_lea.hbm %s7707_s2, %s3170_s0  ;;  %p4010_p7 = pnand %p7708_p1, %p3960_p10 }
  0x69   : > { %s3506_s27 = scalar_lea.hbm %s4002_s21, 256  ;;  %s3511_s17 = scalar_lea.hbm %s7707_s2, 2048 }
  0x6a   : > { %p3507_p12 = scmp.ne.s32.totalorder %s4002_s21, %s3506_s27  ;;  %p3508_p2 = pneg %p4010_p7 }
  0x6b   : > { %p3512_p10 = scmp.lt.u32.totalorder %s4002_s21, %s7707_s2  ;;  %p3513_p0 = scmp.lt.u32.totalorder %s3511_s17, %s3506_s27 }
  0x6c   : > { %p3509_p5 = pnand %p3508_p2, %p3507_p12  ;;  %p3515_p3 = scmp.lt.u32.totalorder %s3506_s27, %s4002_s21 }
  0x6d   : > { %p3514_p6 = por %p3513_p0, %p3512_p10 }
  0x6e   : > { %p3510_p13 = pneg %p3509_p5 }
  0x6f   : > { %p3516_p8 = por %p3515_p3, %p3514_p6 }
  0x71   : > { %p3517_p11 = pnand %p3516_p8, %p3510_p13 }
  0x73   : > { %3520 = shalt.err (!%p3517_p11)
}
  0x74   : > { %s3521_s23 = scalar_lea.vmem %s4004_s26, 256  ;;  %s3707_s20 = smov [#allocation6]  }
  0x75   : > { %p3522_p1 = scmp.ne.s32.totalorder %s4004_s26, %s3521_s23  ;;  %s3526_s16 = sshll.u32 %s3707_s20, 4  ;;  %s3527_s16 = int_to_ptr.vmem [resolvable:$false] %s3526_s16 }
  0x76   : > { %s3528_s15 = scalar_lea.vmem %s3527_s16, 512  ;;  %p3529_p4 = scmp.lt.s32.totalorder %s4004_s26, %s3527_s16 }
  0x77   : > { %p3524_p12 = pnand %p3522_p1, %p3508_p2  ;;  %p3530_p10 = scmp.lt.s32.totalorder %s3528_s15, %s3521_s23 }
  0x79   : > { %p3525_p5 = pneg %p3524_p12  ;;  %p3531_p0 = por %p3530_p10, %p3529_p4 }
  0x7b   : > { %p3532_p6 = pnand %p3531_p0, %p3525_p5 }
  0x7d   : > { %3535 = shalt.err (!%p3532_p6)
}
  0x7e   : > { %s3708_s6 = smov 64   ;;  %s3709_s3 = smov 4  }
  0x7f   : > { %s7710_s10 = smov 128   ;;  %481 = sbr.rel (%p3941_p9) target bundleno = 1362 (0x552), region = 64 }
  0x80   : > { %3327 = dma.hbm_to_vmem [thread:$0]  (!%p4010_p7), %s4002_s21, 256, %s4004_s26, %s4014_s18, %s7710_s10, %s3708_s6, %s3709_s3  }
  0x86   : > { %s483_s4 = sand.u32 1, %s3670_s24   ;;  %p7711_p4 = scmp.ne.s32.totalorder %s7687_s7, 0 }
  0x87   : > { %s3172_s27 = sshll.u32 %s483_s4, 5  ;;  %s484_s29 = scalar_lea.sflag [#allocation4], %s483_s4 }
  0x88   : > { %s4046_s9 = scalar_lea.vmem [#allocation3], %s3172_s27 }
  0x89   : > { %3629 = dma.done.wait (%p7711_p4), %s484_s29, 512  }
  0x8a   : > { %3631 = vsyncadd (%p7711_p4), %s484_s29, 4294966784  ;;  %s7712_s17 = sld [smem:[#allocation14_spill]]  ;;  %s7713_s0 = sld [smem:[#allocation25_spill]] }
  0x90   : > { %s492_s1 = sand.u32 1, %s7712_s17   ;;  %p7714_p9 = scmp.ne.s32.totalorder %s7713_s0, 0 }
  0x91   : > { %s4053_s11 = sshll.u32 %s492_s1, 4  ;;  %s493_s21 = scalar_lea.sflag [#allocation7], %s492_s1 }
  0x92   : > { %3633 = dma.done.wait (%p7714_p9), %s493_s21, 256  }
  0x93   : > { %3635 = vsyncadd (%p7714_p9), %s493_s21, 4294967040  ;;  %s7715_s26 = sld [smem:[#allocation13_spill]]  ;;  %s7716_s18 = sld [smem:[#allocation18_spill]] }
  0x94   : > { %s7717_s23 = sld [smem:[#allocation17_spill]]  ;;  %s7718_s20 = sld [smem:[#allocation16_spill]] }
  0x95   : > { %s7719_s29 = sld [smem:[#allocation53_spill]]  ;;  %s7721_s28 = sld [smem:[#allocation50_spill]] }
  0x99   : > { %s7489_s7 = sand.u32 1, %s7715_s26   ;;  %p569_p7 = scmp.lt.s32.totalorder %s7716_s18, 1 }
  0x9a   : > { %s3174_s16 = sshll.u32 %s7489_s7, 5  ;;  %p573_p2 = scmp.lt.s32.totalorder %s7717_s23, 1 }
  0x9b   : > { %p599_p13 = scmp.eq.s32.totalorder %s7717_s23, 0  ;;  %s8007_s18 = smov (!%p569_p7, %s7716_s18), 1 }
  0x9c   : > { %s574_s15 = scalar_select %p573_p2, %s7717_s23, 1 }
  0x9d   : > { %s3176_s6 = sshll.u32 %s8007_s18, 3  ;;  %s3178_s3 = sshll.u32 %s8007_s18, 1 }
  0x9e   : > { %s3175_s10 = sshll.u32 %s574_s15, 2  ;;  %s4071_s17 = scalar_lea.vmem %s7719_s29, %s3178_s3 }
  0x9f   : > { %s579_s0 = sadd.s32 %s3176_s6, %s3175_s10  ;;  %s3202_s1 = sshll.u32 %s8007_s18, 5 }
  0xa0   : > { %s3177_s21 = sshll.u32 %s579_s0, 3  ;;  %s7720_s26 = sld [smem:[#allocation54_spill]] }
  0xa1   : > { %s581_s25 = scalar_lea.vmem %s7721_s28, %s3177_s21  ;;  %p600_p3 = scmp.eq.s32.totalorder %s7718_s20, 0 }
  0xa2   : > { %s4084_s15 = scalar_lea.vmem [#allocation8], %s3174_s16 }
  0xa3   : > { %p601_p8 = pnand %p600_p3, %p599_p13 }
  0xa4   : > { %vm605_vm0 = vcmask (!%p601_p8), 523264   ;;  %v3710_v0 = vmov (!%p601_p8), 0.0  }
  0xa5   : > { %604 = sbr.rel (%p601_p8) target bundleno = 172 (0xac), region = 76  ;;  %606 = vst.msk [vmem:[#allocation2] sm:$0xff] (!%p601_p8), %vm605_vm0, %v3710_v0  ;;  %607 = vst.msk [vmem:[#allocation2 + $0x8] sm:$0xff] (!%p601_p8), %vm605_vm0, %v3710_v0 }
  0xa6   : > { %s4076_s14 = scalar_lea.vmem %s7720_s26, %s3202_s1  ;;  %608 = vst.msk [vmem:[#allocation2 + $0x10] sm:$0xff] (!%p601_p8), %vm605_vm0, %v3710_v0  ;;  %609 = vst.msk [vmem:[#allocation2 + $0x18] sm:$0xff] (!%p601_p8), %vm605_vm0, %v3710_v0 }
  0xac PF: > { %v624_v1 = vlaneseq  ;;  %s7722_s2 = sld [smem:[#allocation16_spill]]  ;;  %v610_v3 = vld [vmem:[%s581_s25] sm:$0xff]  ;;  %v611_v4 = vld [vmem:[%s581_s25 + $0x8] sm:$0xff]  ;;  %v612_v5 = vld [vmem:[%s581_s25 + $0x10] sm:$0xff]  ;;  %s7954_s28 = sld [smem:[#allocation17_spill]] }
  0xad   : > { %v613_v7 = vld [vmem:[%s581_s25 + $0x18] sm:$0xff]  ;;  %v4122_v20 = vld [vmem:[%s4046_s9] sm:$0xff]  ;;  %s7881_s25 = scalar_lea.vmem [#allocation6], %s4053_s11 }
  0xae   : > { %v4087_v2 = vshrl.u32 %v624_v1, 7  ;;  %7728 = vst [vmem:[#allocation34_spill] sm:$0xff] %v4122_v20  ;;  %s7955_s12 = smov %s7881_s25 }
  0xb0   : > { %v4096_v11 = vsub.s32 0, %v4087_v2  ;;  %v4101_v13 = vadd.s32 8, %v4087_v2  ;;  %v4104_v14 = vadd.s32 16, %v4087_v2  ;;  %v4107_v15 = vadd.s32 24, %v4087_v2 }
  0xb1   : > { %v4110_v16 = vadd.s32 32, %v4087_v2  ;;  %v4113_v17 = vadd.s32 40, %v4087_v2  ;;  %v4116_v18 = vadd.s32 48, %v4087_v2  ;;  %v4119_v19 = vadd.s32 56, %v4087_v2 }
  0xb2   : > { %s3181_s8 = sshll.u32 %s7722_s2, 7  ;;  %7726 = vst [vmem:[#allocation32_spill] sm:$0xff] %v4096_v11  ;;  %v4125_v21 = vadd.s32 64, %v4087_v2  ;;  %v4128_v22 = vadd.s32 72, %v4087_v2  ;;  %v4131_v23 = vsub.s32 1, %v4087_v2  ;;  %v4134_v24 = vsub.s32 2, %v4087_v2 }
  0xb3   : > { %v615_v6 = vstv %s3181_s8  ;;  %v4137_v25 = vadd.s32 80, %v4087_v2  ;;  %v4140_v26 = vadd.s32 88, %v4087_v2  ;;  %v4143_v27 = vadd.s32 96, %v4087_v2  ;;  %p2503_p11 = scmp.eq.s32.totalorder %s7954_s28, 1  ;;  %p2504_p1 = scmp.eq.s32.totalorder %s7722_s2, 1 }
  0xb4   : > { %v4089_v8 = vsub.s32 %v610_v3, %v615_v6  ;;  %v4091_v9 = vsub.s32 %v611_v4, %v615_v6  ;;  %v4093_v10 = vsub.s32 %v612_v5, %v615_v6  ;;  %v4098_v12 = vsub.s32 %v613_v7, %v615_v6  ;;  %7729 = vst [vmem:[#allocation35_spill] sm:$0xff] %v4131_v23 }
  0xb5   : > { %7730 = vst [vmem:[#allocation36_spill] sm:$0xff] %v4134_v24  ;;  %7731 = vst [vmem:[#allocation37_spill] sm:$0xff] %v4140_v26  ;;  %v4148_v29 = vadd.s32 104, %v4087_v2  ;;  %v4151_v30 = vadd.s32 112, %v4087_v2  ;;  %v4154_v31 = vadd.s32 120, %v4087_v2  ;;  %v4157_v32 = vsub.s32 3, %v4087_v2  ;;  %p7215_p12 = pnand %p2504_p1, %p2503_p11 }
  0xb6   : > { %7723 = vst [vmem:[#allocation29_spill] sm:$0xff] %v4089_v8  ;;  %7724 = vst [vmem:[#allocation30_spill] sm:$0xff] %v4091_v9  ;;  %v644_v28 = vrot.slane %v4089_v8, %v4096_v11  ;;  %v664_v33 = vrot.slane %v4122_v20, %v4096_v11  ;;  %v4162_v34 = vsub.s32 4, %v4087_v2  ;;  %v4165_v35 = vsub.s32 5, %v4087_v2  ;;  %s7957_s23 = sld [smem:[#allocation55_spill]] (!%p7215_p12)  ;;  %s7959_s27 = sld [smem:[#allocation56_spill]] (!%p7215_p12) }
  0xb7   : > { %7725 = vst [vmem:[#allocation31_spill] sm:$0xff] %v4093_v10  ;;  %7727 = vst [vmem:[#allocation33_spill] sm:$0xff] %v4098_v12  ;;  %v4168_v36 = vsub.s32 6, %v4087_v2  ;;  %v4172_v37 = vrot.slane %v4089_v8, %v4131_v23  ;;  %v4176_v38 = vrot.slane %v4122_v20, %v4131_v23  ;;  %v4180_v39 = vrot.slane %v4089_v8, %v4134_v24  ;;  %s7961_s2 = sld [smem:[#allocation58_spill]] (!%p7215_p12)  ;;  %s7962_s20 = sld [smem:[#allocation59_spill]] (!%p7215_p12) }
  0xb8   : > { %7732 = vst [vmem:[#allocation38_spill] sm:$0xff] %v4143_v27  ;;  %7733 = vst [vmem:[#allocation39_spill] sm:$0xff] %v4148_v29  ;;  %v4184_v40 = vrot.slane %v4122_v20, %v4134_v24  ;;  %vm645_vm1 = vcmp.eq.s32.totalorder %v4087_v2, %v644_v28  ;;  %vm646_vm2 = vcmp.eq.s32.totalorder %v4101_v13, %v644_v28  ;;  %s7964_s21 = sld [smem:[#allocation60_spill]] (!%p7215_p12) }
  0xb9   : > { %7734 = vst [vmem:[#allocation40_spill] sm:$0xff] %v4151_v30  ;;  %7735 = vst [vmem:[#allocation41_spill] sm:$0xff] %v4157_v32  ;;  %vm647_vm3 = vcmp.eq.s32.totalorder %v4104_v14, %v644_v28  ;;  %vm648_vm4 = vcmp.eq.s32.totalorder %v4107_v15, %v644_v28  ;;  %vm649_vm5 = vcmp.eq.s32.totalorder %v4110_v16, %v644_v28  ;;  %v665_v41 = vsel %vm645_vm1, %v664_v33, 0.0 }
  0xba   : > { %7736 = vst [vmem:[#allocation42_spill] sm:$0xff] %v4162_v34  ;;  %7737 = vst [vmem:[#allocation43_spill] sm:$0xff] %v4165_v35  ;;  %vm650_vm6 = vcmp.eq.s32.totalorder %v4113_v17, %v644_v28  ;;  %vm651_vm7 = vcmp.eq.s32.totalorder %v4116_v18, %v644_v28  ;;  %vm652_vm8 = vcmp.eq.s32.totalorder %v4119_v19, %v644_v28  ;;  %v666_v42 = vsel %vm646_vm2, %v664_v33, 0.0 }
  0xbb   : > { %7738 = vst [vmem:[#allocation44_spill] sm:$0xff] %v4168_v36  ;;  %7739 = vst [vmem:[#allocation45_spill] sm:$0xff] %v4184_v40  ;;  %vm653_vm9 = vcmp.eq.s32.totalorder %v4125_v21, %v644_v28  ;;  %vm654_vm10 = vcmp.eq.s32.totalorder %v4128_v22, %v644_v28  ;;  %vm655_vm11 = vcmp.eq.s32.totalorder %v4137_v25, %v644_v28  ;;  %v667_v43 = vsel %vm647_vm3, %v664_v33, 0.0 }
  0xbc   : > { %vm656_vm12 = vcmp.eq.s32.totalorder %v4140_v26, %v644_v28  ;;  %vm657_vm13 = vcmp.eq.s32.totalorder %v4143_v27, %v644_v28  ;;  %vm658_vm14 = vcmp.eq.s32.totalorder %v4148_v29, %v644_v28  ;;  %vm659_vm15 = vcmp.eq.s32.totalorder %v4151_v30, %v644_v28  ;;  %s7958_s7 = smov (!%p7215_p12), %s7957_s23  ;;  %s7960_s0 = smov (!%p7215_p12), %s7959_s27 }
  0xbd   : > { %vm660_vm0 = vcmp.eq.s32.totalorder %v4154_v31, %v644_v28  ;;  %v668_v44 = vsel %vm648_vm4, %v664_v33, 0.0  ;;  %v669_v45 = vsel %vm649_vm5, %v664_v33, 0.0  ;;  %v670_v46 = vsel %vm650_vm6, %v664_v33, 0.0  ;;  %s7963_s16 = smov (!%p7215_p12), %s7962_s20 }
  0xbe   : > { %v671_v47 = vsel %vm651_vm7, %v664_v33, 0.0  ;;  %v672_v48 = vsel %vm652_vm8, %v664_v33, 0.0  ;;  %v673_v49 = vsel %vm653_vm9, %v664_v33, 0.0  ;;  %v674_v50 = vsel %vm654_vm10, %v664_v33, 0.0  ;;  %s7965_s8 = smov (!%p7215_p12), %s7964_s21 }
  0xbf   : > { %v675_v51 = vsel %vm655_vm11, %v664_v33, 0.0  ;;  %v676_v52 = vsel %vm656_vm12, %v664_v33, 0.0  ;;  %v677_v53 = vsel %vm657_vm13, %v664_v33, 0.0  ;;  %v678_v54 = vsel %vm658_vm14, %v664_v33, 0.0 }
  0xc0   : > { %v679_v55 = vsel %vm659_vm15, %v664_v33, 0.0  ;;  %v680_v56 = vsel %vm660_vm0, %v664_v33, 0.0  ;;  %vm685_vm1 = vcmp.eq.s32.totalorder %v4087_v2, %v4172_v37  ;;  %vm686_vm2 = vcmp.eq.s32.totalorder %v4101_v13, %v4172_v37 }
  0xc1   : > { %vm687_vm3 = vcmp.eq.s32.totalorder %v4104_v14, %v4172_v37  ;;  %vm688_vm4 = vcmp.eq.s32.totalorder %v4107_v15, %v4172_v37  ;;  %vm689_vm5 = vcmp.eq.s32.totalorder %v4110_v16, %v4172_v37  ;;  %vm690_vm6 = vcmp.eq.s32.totalorder %v4113_v17, %v4172_v37 }
  0xc2   : > { %vm691_vm7 = vcmp.eq.s32.totalorder %v4116_v18, %v4172_v37  ;;  %vm692_vm8 = vcmp.eq.s32.totalorder %v4119_v19, %v4172_v37  ;;  %vm693_vm9 = vcmp.eq.s32.totalorder %v4125_v21, %v4172_v37  ;;  %vm694_vm10 = vcmp.eq.s32.totalorder %v4128_v22, %v4172_v37 }
  0xc3   : > { %vm695_vm11 = vcmp.eq.s32.totalorder %v4137_v25, %v4172_v37  ;;  %vm696_vm12 = vcmp.eq.s32.totalorder %v4140_v26, %v4172_v37  ;;  %vm697_vm13 = vcmp.eq.s32.totalorder %v4143_v27, %v4172_v37  ;;  %vm698_vm14 = vcmp.eq.s32.totalorder %v4148_v29, %v4172_v37 }
  0xc4   : > { %vm699_vm15 = vcmp.eq.s32.totalorder %v4151_v30, %v4172_v37  ;;  %vm700_vm0 = vcmp.eq.s32.totalorder %v4154_v31, %v4172_v37  ;;  %v705_v57 = vsel %vm685_vm1, %v4176_v38, 0.0  ;;  %v706_v58 = vsel %vm686_vm2, %v4176_v38, 0.0  ;;  %v7740_v37 = vld [vmem:[#allocation38_spill] sm:$0xff] }
  0xc5   : > { %v707_v59 = vsel %vm687_vm3, %v4176_v38, 0.0  ;;  %v708_v60 = vsel %vm688_vm4, %v4176_v38, 0.0  ;;  %v709_v61 = vsel %vm689_vm5, %v4176_v38, 0.0  ;;  %v710_v62 = vsel %vm690_vm6, %v4176_v38, 0.0 }
  0xc6   : > { %v711_v63 = vsel %vm691_vm7, %v4176_v38, 0.0  ;;  %v712_v0 = vsel %vm692_vm8, %v4176_v38, 0.0  ;;  %v713_v1 = vsel %vm693_vm9, %v4176_v38, 0.0  ;;  %v714_v3 = vsel %vm694_vm10, %v4176_v38, 0.0 }
  0xc7   : > { %v715_v4 = vsel %vm695_vm11, %v4176_v38, 0.0  ;;  %v716_v5 = vsel %vm696_vm12, %v4176_v38, 0.0  ;;  %v717_v6 = vsel %vm697_vm13, %v4176_v38, 0.0  ;;  %v718_v7 = vsel %vm698_vm14, %v4176_v38, 0.0 }
  0xc8   : > { %v719_v28 = vsel %vm699_vm15, %v4176_v38, 0.0  ;;  %v720_v33 = vsel %vm700_vm0, %v4176_v38, 0.0  ;;  %v721_v12 = vadd.f32 %v705_v57, %v665_v41  ;;  %v722_v10 = vadd.f32 %v706_v58, %v666_v42  ;;  %v7741_v38 = vld [vmem:[#allocation39_spill] sm:$0xff]  ;;  %v7742_v41 = vld [vmem:[#allocation40_spill] sm:$0xff]  ;;  %v7743_v42 = vld [vmem:[#allocation45_spill] sm:$0xff] }
  0xc9   : > { %v723_v24 = vadd.f32 %v707_v59, %v667_v43  ;;  %v724_v23 = vadd.f32 %v708_v60, %v668_v44  ;;  %v725_v9 = vadd.f32 %v709_v61, %v669_v45  ;;  %v726_v11 = vadd.f32 %v710_v62, %v670_v46 }
  0xca   : > { %v727_v36 = vadd.f32 %v711_v63, %v671_v47  ;;  %v728_v35 = vadd.f32 %v712_v0, %v672_v48  ;;  %v729_v34 = vadd.f32 %v713_v1, %v673_v49  ;;  %v730_v20 = vadd.f32 %v714_v3, %v674_v50 }
  0xcb   : > { %v731_v8 = vadd.f32 %v715_v4, %v675_v51  ;;  %v732_v32 = vadd.f32 %v716_v5, %v676_v52  ;;  %v733_v40 = vadd.f32 %v717_v6, %v677_v53  ;;  %v734_v30 = vadd.f32 %v718_v7, %v678_v54  ;;  %v7744_v7 = vld [vmem:[#allocation41_spill] sm:$0xff] }
  0xcc   : > { %v735_v29 = vadd.f32 %v719_v28, %v679_v55  ;;  %v736_v27 = vadd.f32 %v720_v33, %v680_v56  ;;  %vm741_vm1 = vcmp.eq.s32.totalorder %v4087_v2, %v4180_v39  ;;  %vm742_vm2 = vcmp.eq.s32.totalorder %v4101_v13, %v4180_v39  ;;  %v7745_v28 = vld [vmem:[#allocation29_spill] sm:$0xff] }
  0xcd   : > { %vm743_vm3 = vcmp.eq.s32.totalorder %v4104_v14, %v4180_v39  ;;  %vm744_vm4 = vcmp.eq.s32.totalorder %v4107_v15, %v4180_v39  ;;  %vm745_vm5 = vcmp.eq.s32.totalorder %v4110_v16, %v4180_v39  ;;  %vm746_vm6 = vcmp.eq.s32.totalorder %v4113_v17, %v4180_v39 }
  0xce   : > { %vm747_vm7 = vcmp.eq.s32.totalorder %v4116_v18, %v4180_v39  ;;  %vm748_vm8 = vcmp.eq.s32.totalorder %v4119_v19, %v4180_v39  ;;  %vm749_vm9 = vcmp.eq.s32.totalorder %v4125_v21, %v4180_v39  ;;  %vm750_vm10 = vcmp.eq.s32.totalorder %v4128_v22, %v4180_v39 }
  0xcf   : > { %vm751_vm11 = vcmp.eq.s32.totalorder %v4137_v25, %v4180_v39  ;;  %vm752_vm12 = vcmp.eq.s32.totalorder %v4140_v26, %v4180_v39  ;;  %vm753_vm13 = vcmp.eq.s32.totalorder %v7740_v37, %v4180_v39  ;;  %vm754_vm14 = vcmp.eq.s32.totalorder %v7741_v38, %v4180_v39 }
  0xd0   : > { %vm755_vm15 = vcmp.eq.s32.totalorder %v7742_v41, %v4180_v39  ;;  %vm756_vm0 = vcmp.eq.s32.totalorder %v4154_v31, %v4180_v39  ;;  %v761_v43 = vsel %vm741_vm1, %v7743_v42, 0.0  ;;  %v762_v44 = vsel %vm742_vm2, %v7743_v42, 0.0 }
  0xd1   : > { %v763_v45 = vsel %vm743_vm3, %v7743_v42, 0.0  ;;  %v764_v46 = vsel %vm744_vm4, %v7743_v42, 0.0  ;;  %v765_v47 = vsel %vm745_vm5, %v7743_v42, 0.0  ;;  %v766_v48 = vsel %vm746_vm6, %v7743_v42, 0.0 }
  0xd2   : > { %v767_v49 = vsel %vm747_vm7, %v7743_v42, 0.0  ;;  %v768_v50 = vsel %vm748_vm8, %v7743_v42, 0.0  ;;  %v769_v51 = vsel %vm749_vm9, %v7743_v42, 0.0  ;;  %v770_v52 = vsel %vm750_vm10, %v7743_v42, 0.0 }
  0xd3   : > { %v771_v53 = vsel %vm751_vm11, %v7743_v42, 0.0  ;;  %v772_v54 = vsel %vm752_vm12, %v7743_v42, 0.0  ;;  %v773_v55 = vsel %vm753_vm13, %v7743_v42, 0.0  ;;  %v774_v56 = vsel %vm754_vm14, %v7743_v42, 0.0 }
  0xd4   : > { %v775_v57 = vsel %vm755_vm15, %v7743_v42, 0.0  ;;  %v776_v58 = vsel %vm756_vm0, %v7743_v42, 0.0  ;;  %v777_v59 = vadd.f32 %v761_v43, %v721_v12  ;;  %v778_v60 = vadd.f32 %v762_v44, %v722_v10  ;;  %v7746_v12 = vld [vmem:[#allocation34_spill] sm:$0xff] }
  0xd5   : > { %v779_v61 = vadd.f32 %v763_v45, %v723_v24  ;;  %v780_v62 = vadd.f32 %v764_v46, %v724_v23  ;;  %v781_v63 = vadd.f32 %v765_v47, %v725_v9  ;;  %v782_v0 = vadd.f32 %v766_v48, %v726_v11  ;;  %v7747_v24 = vld [vmem:[#allocation42_spill] sm:$0xff] }
  0xd6   : > { %v783_v1 = vadd.f32 %v767_v49, %v727_v36  ;;  %v784_v3 = vadd.f32 %v768_v50, %v728_v35  ;;  %v785_v4 = vadd.f32 %v769_v51, %v729_v34  ;;  %v786_v5 = vadd.f32 %v770_v52, %v730_v20  ;;  %v7756_v34 = vld [vmem:[#allocation38_spill] sm:$0xff]  ;;  %v7757_v35 = vld [vmem:[#allocation39_spill] sm:$0xff]  ;;  %v7758_v36 = vld [vmem:[#allocation40_spill] sm:$0xff] }
  0xd7   : > { %v787_v6 = vadd.f32 %v771_v53, %v731_v8  ;;  %v796_v33 = vrot.slane %v7745_v28, %v7744_v7  ;;  %v788_v41 = vadd.f32 %v772_v54, %v732_v32  ;;  %v789_v38 = vadd.f32 %v773_v55, %v733_v40  ;;  %v7749_v8 = vld [vmem:[#allocation43_spill] sm:$0xff]  ;;  %v7755_v32 = vld [vmem:[#allocation37_spill] sm:$0xff] }
  0xd8   : > { %v790_v37 = vadd.f32 %v774_v56, %v734_v30  ;;  %v791_v26 = vadd.f32 %v775_v57, %v735_v29  ;;  %v792_v39 = vadd.f32 %v776_v58, %v736_v27  ;;  %v816_v10 = vrot.slane %v7746_v12, %v7744_v7  ;;  %v7752_v27 = vld [vmem:[#allocation44_spill] sm:$0xff] }
  0xd9   : > { %v4432_v9 = vrot.slane %v7745_v28, %v7747_v24  ;;  %v4436_v11 = vrot.slane %v7746_v12, %v7747_v24  ;;  %v4440_v20 = vrot.slane %v7745_v28, %v7749_v8  ;;  %v4444_v23 = vrot.slane %v7746_v12, %v7749_v8 }
  0xda   : > { %v4448_v29 = vrot.slane %v7745_v28, %v7752_v27  ;;  %v4452_v30 = vrot.slane %v7746_v12, %v7752_v27  ;;  %vm797_vm1 = vcmp.eq.s32.totalorder %v4087_v2, %v796_v33  ;;  %vm798_vm2 = vcmp.eq.s32.totalorder %v4101_v13, %v796_v33 }
  0xdb   : > { %7748 = vst [vmem:[#allocation45_spill] sm:$0xff] %v4436_v11  ;;  %7750 = vst [vmem:[#allocation46_spill] sm:$0xff] %v4440_v20  ;;  %vm799_vm3 = vcmp.eq.s32.totalorder %v4104_v14, %v796_v33  ;;  %vm800_vm4 = vcmp.eq.s32.totalorder %v4107_v15, %v796_v33  ;;  %vm801_vm5 = vcmp.eq.s32.totalorder %v4110_v16, %v796_v33  ;;  %v817_v40 = vsel %vm797_vm1, %v816_v10, 0.0 }
  0xdc   : > { %7751 = vst [vmem:[#allocation47_spill] sm:$0xff] %v4444_v23  ;;  %7753 = vst [vmem:[#allocation48_spill] sm:$0xff] %v4448_v29  ;;  %vm802_vm6 = vcmp.eq.s32.totalorder %v4113_v17, %v796_v33  ;;  %vm803_vm7 = vcmp.eq.s32.totalorder %v4116_v18, %v796_v33  ;;  %vm804_vm8 = vcmp.eq.s32.totalorder %v4119_v19, %v796_v33  ;;  %v818_v42 = vsel %vm798_vm2, %v816_v10, 0.0 }
  0xdd   : > { %7754 = vst [vmem:[#allocation49_spill] sm:$0xff] %v4452_v30  ;;  %vm805_vm9 = vcmp.eq.s32.totalorder %v4125_v21, %v796_v33  ;;  %vm806_vm10 = vcmp.eq.s32.totalorder %v4128_v22, %v796_v33  ;;  %vm807_vm11 = vcmp.eq.s32.totalorder %v4137_v25, %v796_v33  ;;  %vm808_vm12 = vcmp.eq.s32.totalorder %v7755_v32, %v796_v33 }
  0xde   : > { %vm809_vm13 = vcmp.eq.s32.totalorder %v7756_v34, %v796_v33  ;;  %vm810_vm14 = vcmp.eq.s32.totalorder %v7757_v35, %v796_v33  ;;  %vm811_vm15 = vcmp.eq.s32.totalorder %v7758_v36, %v796_v33  ;;  %vm812_vm0 = vcmp.eq.s32.totalorder %v4154_v31, %v796_v33 }
  0xdf   : > { %v819_v43 = vsel %vm799_vm3, %v816_v10, 0.0  ;;  %v820_v44 = vsel %vm800_vm4, %v816_v10, 0.0  ;;  %v821_v45 = vsel %vm801_vm5, %v816_v10, 0.0  ;;  %v822_v46 = vsel %vm802_vm6, %v816_v10, 0.0 }
  0xe0   : > { %v823_v47 = vsel %vm803_vm7, %v816_v10, 0.0  ;;  %v824_v48 = vsel %vm804_vm8, %v816_v10, 0.0  ;;  %v825_v49 = vsel %vm805_vm9, %v816_v10, 0.0  ;;  %v826_v50 = vsel %vm806_vm10, %v816_v10, 0.0 }
  0xe1   : > { %v827_v51 = vsel %vm807_vm11, %v816_v10, 0.0  ;;  %v828_v52 = vsel %vm808_vm12, %v816_v10, 0.0  ;;  %v829_v53 = vsel %vm809_vm13, %v816_v10, 0.0  ;;  %v830_v54 = vsel %vm810_vm14, %v816_v10, 0.0 }
  0xe2   : > { %v831_v55 = vsel %vm811_vm15, %v816_v10, 0.0  ;;  %v832_v56 = vsel %vm812_vm0, %v816_v10, 0.0  ;;  %v833_v57 = vadd.f32 %v817_v40, %v777_v59  ;;  %v834_v58 = vadd.f32 %v818_v42, %v778_v60 }
  0xe3   : > { %v835_v27 = vadd.f32 %v819_v43, %v779_v61  ;;  %v836_v8 = vadd.f32 %v820_v44, %v780_v62  ;;  %v837_v24 = vadd.f32 %v821_v45, %v781_v63  ;;  %v838_v7 = vadd.f32 %v822_v46, %v782_v0 }
  0xe4   : > { %v839_v12 = vadd.f32 %v823_v47, %v783_v1  ;;  %v840_v28 = vadd.f32 %v824_v48, %v784_v3  ;;  %v841_v30 = vadd.f32 %v825_v49, %v785_v4  ;;  %v842_v29 = vadd.f32 %v826_v50, %v786_v5 }
  0xe5   : > { %v843_v23 = vadd.f32 %v827_v51, %v787_v6  ;;  %v844_v20 = vadd.f32 %v828_v52, %v788_v41  ;;  %v845_v11 = vadd.f32 %v829_v53, %v789_v38  ;;  %v846_v35 = vadd.f32 %v830_v54, %v790_v37  ;;  %v7760_v37 = vld [vmem:[#allocation39_spill] sm:$0xff]  ;;  %v7761_v38 = vld [vmem:[#allocation40_spill] sm:$0xff]  ;;  %v7762_v41 = vld [vmem:[#allocation45_spill] sm:$0xff] }
  0xe6   : > { %v847_v34 = vadd.f32 %v831_v55, %v791_v26  ;;  %v848_v36 = vadd.f32 %v832_v56, %v792_v39  ;;  %vm853_vm1 = vcmp.eq.s32.totalorder %v4087_v2, %v4432_v9  ;;  %vm854_vm2 = vcmp.eq.s32.totalorder %v4101_v13, %v4432_v9  ;;  %v7759_v26 = vld [vmem:[#allocation38_spill] sm:$0xff] }
  0xe7   : > { %vm855_vm3 = vcmp.eq.s32.totalorder %v4104_v14, %v4432_v9  ;;  %vm856_vm4 = vcmp.eq.s32.totalorder %v4107_v15, %v4432_v9  ;;  %vm857_vm5 = vcmp.eq.s32.totalorder %v4110_v16, %v4432_v9  ;;  %vm858_vm6 = vcmp.eq.s32.totalorder %v4113_v17, %v4432_v9 }
  0xe8   : > { %vm859_vm7 = vcmp.eq.s32.totalorder %v4116_v18, %v4432_v9  ;;  %vm860_vm8 = vcmp.eq.s32.totalorder %v4119_v19, %v4432_v9  ;;  %vm861_vm9 = vcmp.eq.s32.totalorder %v4125_v21, %v4432_v9  ;;  %vm862_vm10 = vcmp.eq.s32.totalorder %v4128_v22, %v4432_v9 }
  0xe9   : > { %vm863_vm11 = vcmp.eq.s32.totalorder %v4137_v25, %v4432_v9  ;;  %vm864_vm12 = vcmp.eq.s32.totalorder %v7755_v32, %v4432_v9  ;;  %vm865_vm13 = vcmp.eq.s32.totalorder %v7759_v26, %v4432_v9  ;;  %vm866_vm14 = vcmp.eq.s32.totalorder %v7760_v37, %v4432_v9  ;;  %v7763_v26 = vld [vmem:[#allocation46_spill] sm:$0xff] }
  0xea   : > { %vm867_vm15 = vcmp.eq.s32.totalorder %v7761_v38, %v4432_v9  ;;  %vm868_vm0 = vcmp.eq.s32.totalorder %v4154_v31, %v4432_v9  ;;  %v873_v59 = vsel %vm853_vm1, %v7762_v41, 0.0  ;;  %v874_v60 = vsel %vm854_vm2, %v7762_v41, 0.0 }
  0xeb   : > { %v875_v61 = vsel %vm855_vm3, %v7762_v41, 0.0  ;;  %v876_v62 = vsel %vm856_vm4, %v7762_v41, 0.0  ;;  %v877_v63 = vsel %vm857_vm5, %v7762_v41, 0.0  ;;  %v878_v0 = vsel %vm858_vm6, %v7762_v41, 0.0 }
  0xec   : > { %v879_v1 = vsel %vm859_vm7, %v7762_v41, 0.0  ;;  %v880_v3 = vsel %vm860_vm8, %v7762_v41, 0.0  ;;  %v881_v4 = vsel %vm861_vm9, %v7762_v41, 0.0  ;;  %v882_v5 = vsel %vm862_vm10, %v7762_v41, 0.0 }
  0xed   : > { %v883_v6 = vsel %vm863_vm11, %v7762_v41, 0.0  ;;  %v884_v33 = vsel %vm864_vm12, %v7762_v41, 0.0  ;;  %v885_v39 = vsel %vm865_vm13, %v7762_v41, 0.0  ;;  %v886_v10 = vsel %vm866_vm14, %v7762_v41, 0.0 }
  0xee   : > { %v887_v40 = vsel %vm867_vm15, %v7762_v41, 0.0  ;;  %v888_v42 = vsel %vm868_vm0, %v7762_v41, 0.0  ;;  %v889_v43 = vadd.f32 %v873_v59, %v833_v57  ;;  %v890_v44 = vadd.f32 %v874_v60, %v834_v58 }
  0xef   : > { %v891_v45 = vadd.f32 %v875_v61, %v835_v27  ;;  %v892_v46 = vadd.f32 %v876_v62, %v836_v8  ;;  %v893_v47 = vadd.f32 %v877_v63, %v837_v24  ;;  %v894_v48 = vadd.f32 %v878_v0, %v838_v7  ;;  %v7764_v7 = vld [vmem:[#allocation38_spill] sm:$0xff]  ;;  %v7767_v24 = vld [vmem:[#allocation47_spill] sm:$0xff] }
  0xf0   : > { %v895_v49 = vadd.f32 %v879_v1, %v839_v12  ;;  %v896_v50 = vadd.f32 %v880_v3, %v840_v28  ;;  %v897_v51 = vadd.f32 %v881_v4, %v841_v30  ;;  %v898_v52 = vadd.f32 %v882_v5, %v842_v29  ;;  %v7765_v28 = vld [vmem:[#allocation39_spill] sm:$0xff]  ;;  %v7766_v12 = vld [vmem:[#allocation40_spill] sm:$0xff] }
  0xf1   : > { %v899_v53 = vadd.f32 %v883_v6, %v843_v23  ;;  %v900_v54 = vadd.f32 %v884_v33, %v844_v20  ;;  %v901_v55 = vadd.f32 %v885_v39, %v845_v11  ;;  %v902_v56 = vadd.f32 %v886_v10, %v846_v35 }
  0xf2   : > { %v903_v38 = vadd.f32 %v887_v40, %v847_v34  ;;  %v904_v37 = vadd.f32 %v888_v42, %v848_v36  ;;  %vm909_vm1 = vcmp.eq.s32.totalorder %v4087_v2, %v7763_v26  ;;  %vm910_vm2 = vcmp.eq.s32.totalorder %v4101_v13, %v7763_v26 }
  0xf3   : > { %vm911_vm3 = vcmp.eq.s32.totalorder %v4104_v14, %v7763_v26  ;;  %vm912_vm4 = vcmp.eq.s32.totalorder %v4107_v15, %v7763_v26  ;;  %vm913_vm5 = vcmp.eq.s32.totalorder %v4110_v16, %v7763_v26  ;;  %vm914_vm6 = vcmp.eq.s32.totalorder %v4113_v17, %v7763_v26 }
  0xf4   : > { %vm915_vm7 = vcmp.eq.s32.totalorder %v4116_v18, %v7763_v26  ;;  %vm916_vm8 = vcmp.eq.s32.totalorder %v4119_v19, %v7763_v26  ;;  %vm917_vm9 = vcmp.eq.s32.totalorder %v4125_v21, %v7763_v26  ;;  %vm918_vm10 = vcmp.eq.s32.totalorder %v4128_v22, %v7763_v26 }
  0xf5   : > { %vm919_vm11 = vcmp.eq.s32.totalorder %v4137_v25, %v7763_v26  ;;  %vm920_vm12 = vcmp.eq.s32.totalorder %v7755_v32, %v7763_v26  ;;  %vm921_vm13 = vcmp.eq.s32.totalorder %v7764_v7, %v7763_v26  ;;  %vm922_vm14 = vcmp.eq.s32.totalorder %v7765_v28, %v7763_v26  ;;  %v7768_v7 = vld [vmem:[#allocation48_spill] sm:$0xff] }
  0xf6   : > { %vm923_vm15 = vcmp.eq.s32.totalorder %v7766_v12, %v7763_v26  ;;  %vm924_vm0 = vcmp.eq.s32.totalorder %v4154_v31, %v7763_v26  ;;  %v929_v9 = vsel %vm909_vm1, %v7767_v24, 0.0  ;;  %v930_v11 = vsel %vm910_vm2, %v7767_v24, 0.0  ;;  %v7769_v26 = vld [vmem:[#allocation38_spill] sm:$0xff] }
  0xf7   : > { %v931_v8 = vsel %vm911_vm3, %v7767_v24, 0.0  ;;  %v932_v20 = vsel %vm912_vm4, %v7767_v24, 0.0  ;;  %v933_v23 = vsel %vm913_vm5, %v7767_v24, 0.0  ;;  %v934_v27 = vsel %vm914_vm6, %v7767_v24, 0.0 }
  0xf8   : > { %v935_v29 = vsel %vm915_vm7, %v7767_v24, 0.0  ;;  %v936_v30 = vsel %vm916_vm8, %v7767_v24, 0.0  ;;  %v937_v34 = vsel %vm917_vm9, %v7767_v24, 0.0  ;;  %v938_v35 = vsel %vm918_vm10, %v7767_v24, 0.0 }
  0xf9   : > { %v939_v36 = vsel %vm919_vm11, %v7767_v24, 0.0  ;;  %v940_v57 = vsel %vm920_vm12, %v7767_v24, 0.0  ;;  %v941_v58 = vsel %vm921_vm13, %v7767_v24, 0.0  ;;  %v942_v41 = vsel %vm922_vm14, %v7767_v24, 0.0 }
  0xfa   : > { %v943_v59 = vsel %vm923_vm15, %v7767_v24, 0.0  ;;  %v944_v60 = vsel %vm924_vm0, %v7767_v24, 0.0  ;;  %v945_v61 = vadd.f32 %v929_v9, %v889_v43  ;;  %v946_v62 = vadd.f32 %v930_v11, %v890_v44  ;;  %v7772_v43 = vld [vmem:[#allocation49_spill] sm:$0xff] }
  0xfb   : > { %v947_v63 = vadd.f32 %v931_v8, %v891_v45  ;;  %v948_v0 = vadd.f32 %v932_v20, %v892_v46  ;;  %v949_v1 = vadd.f32 %v933_v23, %v893_v47  ;;  %v950_v3 = vadd.f32 %v934_v27, %v894_v48 }
  0xfc   : > { %v951_v4 = vadd.f32 %v935_v29, %v895_v49  ;;  %v952_v5 = vadd.f32 %v936_v30, %v896_v50  ;;  %v953_v6 = vadd.f32 %v937_v34, %v897_v51  ;;  %v954_v33 = vadd.f32 %v938_v35, %v898_v52  ;;  %v4800_v29 = vld [vmem:[%s4046_s9 + $0x8] sm:$0xff] }
  0xfd   : > { %v955_v39 = vadd.f32 %v939_v36, %v899_v53  ;;  %v956_v10 = vadd.f32 %v940_v57, %v900_v54  ;;  %v957_v40 = vadd.f32 %v941_v58, %v901_v55  ;;  %v958_v42 = vadd.f32 %v942_v41, %v902_v56  ;;  %7774 = vst [vmem:[#allocation46_spill] sm:$0xff] %v4800_v29  ;;  %v7775_v41 = vld [vmem:[#allocation29_spill] sm:$0xff] }
  0xfe   : > { %v959_v12 = vadd.f32 %v943_v59, %v903_v38  ;;  %v960_v28 = vadd.f32 %v944_v60, %v904_v37  ;;  %vm965_vm1 = vcmp.eq.s32.totalorder %v4087_v2, %v7768_v7  ;;  %vm966_vm2 = vcmp.eq.s32.totalorder %v4101_v13, %v7768_v7  ;;  %v7770_v37 = vld [vmem:[#allocation39_spill] sm:$0xff]  ;;  %v7771_v38 = vld [vmem:[#allocation40_spill] sm:$0xff] }
  0xff   : > { %vm967_vm3 = vcmp.eq.s32.totalorder %v4104_v14, %v7768_v7  ;;  %vm968_vm4 = vcmp.eq.s32.totalorder %v4107_v15, %v7768_v7  ;;  %vm969_vm5 = vcmp.eq.s32.totalorder %v4110_v16, %v7768_v7  ;;  %vm970_vm6 = vcmp.eq.s32.totalorder %v4113_v17, %v7768_v7 }
 0x100   : > { %vm971_vm7 = vcmp.eq.s32.totalorder %v4116_v18, %v7768_v7  ;;  %vm972_vm8 = vcmp.eq.s32.totalorder %v4119_v19, %v7768_v7  ;;  %vm973_vm9 = vcmp.eq.s32.totalorder %v4125_v21, %v7768_v7  ;;  %vm974_vm10 = vcmp.eq.s32.totalorder %v4128_v22, %v7768_v7 }
 0x101   : > { %vm975_vm11 = vcmp.eq.s32.totalorder %v4137_v25, %v7768_v7  ;;  %vm976_vm12 = vcmp.eq.s32.totalorder %v7755_v32, %v7768_v7  ;;  %vm977_vm13 = vcmp.eq.s32.totalorder %v7769_v26, %v7768_v7  ;;  %vm978_vm14 = vcmp.eq.s32.totalorder %v7770_v37, %v7768_v7 }
 0x102   : > { %vm979_vm15 = vcmp.eq.s32.totalorder %v7771_v38, %v7768_v7  ;;  %vm980_vm0 = vcmp.eq.s32.totalorder %v4154_v31, %v7768_v7  ;;  %v985_v44 = vsel %vm965_vm1, %v7772_v43, 0.0  ;;  %v986_v45 = vsel %vm966_vm2, %v7772_v43, 0.0 }
 0x103   : > { %v987_v46 = vsel %vm967_vm3, %v7772_v43, 0.0  ;;  %v988_v47 = vsel %vm968_vm4, %v7772_v43, 0.0  ;;  %v989_v48 = vsel %vm969_vm5, %v7772_v43, 0.0  ;;  %v990_v49 = vsel %vm970_vm6, %v7772_v43, 0.0 }
 0x104   : > { %v991_v50 = vsel %vm971_vm7, %v7772_v43, 0.0  ;;  %v992_v51 = vsel %vm972_vm8, %v7772_v43, 0.0  ;;  %v993_v52 = vsel %vm973_vm9, %v7772_v43, 0.0  ;;  %v994_v53 = vsel %vm974_vm10, %v7772_v43, 0.0 }
 0x105   : > { %v995_v54 = vsel %vm975_vm11, %v7772_v43, 0.0  ;;  %v4771_v55 = vsub.s32 7, %v4087_v2  ;;  %v996_v56 = vsel %vm976_vm12, %v7772_v43, 0.0  ;;  %v997_v24 = vsel %vm977_vm13, %v7772_v43, 0.0 }
 0x106   : > { %v998_v9 = vsel %vm978_vm14, %v7772_v43, 0.0  ;;  %v999_v11 = vsel %vm979_vm15, %v7772_v43, 0.0  ;;  %v1000_v8 = vsel %vm980_vm0, %v7772_v43, 0.0  ;;  %v4793_v20 = vadd.f32 %v985_v44, %v945_v61  ;;  %v7776_v43 = vld [vmem:[#allocation32_spill] sm:$0xff] }
 0x107   : > { %7773 = vst [vmem:[#allocation45_spill] sm:$0xff] %v4771_v55  ;;  %v4795_v23 = vadd.f32 %v986_v45, %v946_v62  ;;  %v4797_v27 = vadd.f32 %v987_v46, %v947_v63  ;;  %v4802_v30 = vadd.f32 %v988_v47, %v948_v0  ;;  %v4804_v34 = vadd.f32 %v989_v48, %v949_v1 }
 0x108   : > { %v4806_v35 = vadd.f32 %v990_v49, %v950_v3  ;;  %v4808_v36 = vadd.f32 %v991_v50, %v951_v4  ;;  %v4810_v57 = vadd.f32 %v992_v51, %v952_v5  ;;  %v4812_v7 = vadd.f32 %v993_v52, %v953_v6  ;;  %v7777_v3 = vld [vmem:[#allocation30_spill] sm:$0xff]  ;;  %v7778_v5 = vld [vmem:[#allocation35_spill] sm:$0xff] }
 0x109   : > { %v4814_v58 = vadd.f32 %v994_v53, %v954_v33  ;;  %v1020_v59 = vrot.slane %v7775_v41, %v4771_v55  ;;  %v1011_v60 = vadd.f32 %v995_v54, %v955_v39  ;;  %v1012_v61 = vadd.f32 %v996_v56, %v956_v10  ;;  %v7780_v39 = vld [vmem:[#allocation36_spill] sm:$0xff]  ;;  %v7783_v10 = vld [vmem:[#allocation34_spill] sm:$0xff] }
 0x10a   : > { %v1013_v62 = vadd.f32 %v997_v24, %v957_v40  ;;  %v1014_v63 = vadd.f32 %v998_v9, %v958_v42  ;;  %v1015_v0 = vadd.f32 %v999_v11, %v959_v12  ;;  %v1016_v1 = vadd.f32 %v1000_v8, %v960_v28  ;;  %v7784_v42 = vld [vmem:[#allocation41_spill] sm:$0xff] }
 0x10b   : > { %v4820_v44 = vrot.slane %v7777_v3, %v7776_v43  ;;  %v4824_v4 = vrot.slane %v4800_v29, %v7776_v43  ;;  %v4828_v6 = vrot.slane %v7777_v3, %v7778_v5  ;;  %v4832_v33 = vrot.slane %v4800_v29, %v7778_v5 }
 0x10c   : > { %v4836_v12 = vrot.slane %v7777_v3, %v7780_v39  ;;  %v4840_v28 = vrot.slane %v4800_v29, %v7780_v39  ;;  %vm1021_vm1 = vcmp.eq.s32.totalorder %v4087_v2, %v1020_v59  ;;  %vm1022_vm2 = vcmp.eq.s32.totalorder %v4101_v13, %v1020_v59 }
 0x10d   : > { %7779 = vst [vmem:[#allocation47_spill] sm:$0xff] %v4832_v33  ;;  %v1040_v40 = vrot.slane %v7783_v10, %v4771_v55  ;;  %v4848_v45 = vrot.slane %v7777_v3, %v7784_v42  ;;  %vm1023_vm3 = vcmp.eq.s32.totalorder %v4104_v14, %v1020_v59  ;;  %vm1024_vm4 = vcmp.eq.s32.totalorder %v4107_v15, %v1020_v59 }
 0x10e   : > { %7781 = vst [vmem:[#allocation48_spill] sm:$0xff] %v4836_v12  ;;  %7782 = vst [vmem:[#allocation49_spill] sm:$0xff] %v4840_v28  ;;  %vm1025_vm5 = vcmp.eq.s32.totalorder %v4110_v16, %v1020_v59  ;;  %vm1026_vm6 = vcmp.eq.s32.totalorder %v4113_v17, %v1020_v59  ;;  %vm1027_vm7 = vcmp.eq.s32.totalorder %v4116_v18, %v1020_v59 }
 0x10f   : > { %7785 = vst [vmem:[#allocation29_spill] sm:$0xff] %v4848_v45  ;;  %vm1028_vm8 = vcmp.eq.s32.totalorder %v4119_v19, %v1020_v59  ;;  %vm1029_vm9 = vcmp.eq.s32.totalorder %v4125_v21, %v1020_v59  ;;  %vm1031_vm11 = vcmp.eq.s32.totalorder %v4137_v25, %v1020_v59  ;;  %vm1034_vm14 = vcmp.eq.s32.totalorder %v7770_v37, %v1020_v59 }
 0x110   : > { %vm1036_vm0 = vcmp.eq.s32.totalorder %v4154_v31, %v1020_v59  ;;  %v1041_v46 = vsel %vm1021_vm1, %v1040_v40, 0.0  ;;  %v1042_v47 = vsel %vm1022_vm2, %v1040_v40, 0.0  ;;  %vm1077_vm10 = vcmp.eq.s32.totalorder %v4087_v2, %v4820_v44 }
 0x111   : > { %vm1078_vm12 = vcmp.eq.s32.totalorder %v4101_v13, %v4820_v44  ;;  %vm1079_vm13 = vcmp.eq.s32.totalorder %v4104_v14, %v4820_v44  ;;  %vm1080_vm15 = vcmp.eq.s32.totalorder %v4107_v15, %v4820_v44  ;;  %v1043_v48 = vsel %vm1023_vm3, %v1040_v40, 0.0 }
 0x112   : > { %v1044_v49 = vsel %vm1024_vm4, %v1040_v40, 0.0  ;;  %v1045_v50 = vsel %vm1025_vm5, %v1040_v40, 0.0  ;;  %v1046_v51 = vsel %vm1026_vm6, %v1040_v40, 0.0  ;;  %vm1081_vm1 = vcmp.eq.s32.totalorder %v4110_v16, %v4820_v44 }
 0x113   : > { %vm1082_vm2 = vcmp.eq.s32.totalorder %v4113_v17, %v4820_v44  ;;  %v1047_v52 = vsel %vm1027_vm7, %v1040_v40, 0.0  ;;  %v1048_v53 = vsel %vm1028_vm8, %v1040_v40, 0.0  ;;  %v1049_v54 = vsel %vm1029_vm9, %v1040_v40, 0.0 }
 0x114   : > { %vm7786_vm3 = vcmp.eq.s32.totalorder %v4128_v22, %v1020_v59  ;;  %v1051_v24 = vsel %vm1031_vm11, %v1040_v40, 0.0  ;;  %vm7787_vm4 = vcmp.eq.s32.totalorder %v7755_v32, %v1020_v59  ;;  %vm7788_vm5 = vcmp.eq.s32.totalorder %v7769_v26, %v1020_v59 }
 0x115   : > { %v1050_v56 = vsel %vm7786_vm3, %v1040_v40, 0.0  ;;  %v1052_v9 = vsel %vm7787_vm4, %v1040_v40, 0.0  ;;  %v1053_v11 = vsel %vm7788_vm5, %v1040_v40, 0.0  ;;  %v1054_v8 = vsel %vm1034_vm14, %v1040_v40, 0.0 }
 0x116   : > { %vm7789_vm6 = vcmp.eq.s32.totalorder %v7771_v38, %v1020_v59  ;;  %v1056_v10 = vsel %vm1036_vm0, %v1040_v40, 0.0  ;;  %v1057_v39 = vadd.f32 %v1041_v46, %v4793_v20  ;;  %v1058_v5 = vadd.f32 %v1042_v47, %v4795_v23 }
 0x117   : > { %v1055_v41 = vsel %vm7789_vm6, %v1040_v40, 0.0  ;;  %v1059_v43 = vadd.f32 %v1043_v48, %v4797_v27  ;;  %v1060_v55 = vadd.f32 %v1044_v49, %v4802_v30  ;;  %v1061_v3 = vadd.f32 %v1045_v50, %v4804_v34 }
 0x118   : > { %v1062_v29 = vadd.f32 %v1046_v51, %v4806_v35  ;;  %v1063_v42 = vadd.f32 %v1047_v52, %v4808_v36  ;;  %v1064_v45 = vadd.f32 %v1048_v53, %v4810_v57  ;;  %v1065_v28 = vadd.f32 %v1049_v54, %v4812_v7 }
 0x119   : > { %v1066_v59 = vadd.f32 %v1050_v56, %v4814_v58  ;;  %v1067_v40 = vadd.f32 %v1051_v24, %v1011_v60  ;;  %v1068_v20 = vadd.f32 %v1052_v9, %v1012_v61  ;;  %v1069_v46 = vadd.f32 %v1053_v11, %v1013_v62 }
 0x11a   : > { %v1070_v23 = vadd.f32 %v1054_v8, %v1014_v63  ;;  %v1071_v47 = vadd.f32 %v1055_v41, %v1015_v0  ;;  %v1072_v27 = vadd.f32 %v1056_v10, %v1016_v1  ;;  %vm1083_vm7 = vcmp.eq.s32.totalorder %v4116_v18, %v4820_v44 }
 0x11b   : > { %vm1084_vm8 = vcmp.eq.s32.totalorder %v4119_v19, %v4820_v44  ;;  %vm1085_vm9 = vcmp.eq.s32.totalorder %v4125_v21, %v4820_v44  ;;  %vm1086_vm11 = vcmp.eq.s32.totalorder %v4128_v22, %v4820_v44  ;;  %vm1087_vm14 = vcmp.eq.s32.totalorder %v4137_v25, %v4820_v44 }
 0x11c   : > { %vm1088_vm0 = vcmp.eq.s32.totalorder %v7755_v32, %v4820_v44  ;;  %vm1089_vm3 = vcmp.eq.s32.totalorder %v7769_v26, %v4820_v44  ;;  %vm1090_vm4 = vcmp.eq.s32.totalorder %v7770_v37, %v4820_v44  ;;  %vm1091_vm5 = vcmp.eq.s32.totalorder %v7771_v38, %v4820_v44 }
 0x11d   : > { %vm1092_vm6 = vcmp.eq.s32.totalorder %v4154_v31, %v4820_v44  ;;  %v1097_v30 = vsel %vm1077_vm10, %v4824_v4, 0.0  ;;  %v1098_v34 = vsel %vm1078_vm12, %v4824_v4, 0.0  ;;  %v1099_v35 = vsel %vm1079_vm13, %v4824_v4, 0.0 }
 0x11e   : > { %v1100_v36 = vsel %vm1080_vm15, %v4824_v4, 0.0  ;;  %v1101_v57 = vsel %vm1081_vm1, %v4824_v4, 0.0  ;;  %v1102_v7 = vsel %vm1082_vm2, %v4824_v4, 0.0  ;;  %v1103_v58 = vsel %vm1083_vm7, %v4824_v4, 0.0 }
 0x11f   : > { %v1104_v60 = vsel %vm1084_vm8, %v4824_v4, 0.0  ;;  %v1105_v61 = vsel %vm1085_vm9, %v4824_v4, 0.0  ;;  %v1106_v62 = vsel %vm1086_vm11, %v4824_v4, 0.0  ;;  %v1107_v63 = vsel %vm1087_vm14, %v4824_v4, 0.0 }
 0x120   : > { %v1108_v0 = vsel %vm1088_vm0, %v4824_v4, 0.0  ;;  %v1109_v1 = vsel %vm1089_vm3, %v4824_v4, 0.0  ;;  %v1110_v48 = vsel %vm1090_vm4, %v4824_v4, 0.0  ;;  %v1111_v49 = vsel %vm1091_vm5, %v4824_v4, 0.0 }
 0x121   : > { %v1112_v50 = vsel %vm1092_vm6, %v4824_v4, 0.0  ;;  %v1113_v51 = vadd.f32 %v1097_v30, %v1057_v39  ;;  %v1114_v52 = vadd.f32 %v1098_v34, %v1058_v5  ;;  %v1115_v53 = vadd.f32 %v1099_v35, %v1059_v43  ;;  %v7792_v43 = vld [vmem:[#allocation40_spill] sm:$0xff] }
 0x122   : > { %v1116_v54 = vadd.f32 %v1100_v36, %v1060_v55  ;;  %v1117_v56 = vadd.f32 %v1101_v57, %v1061_v3  ;;  %v1118_v24 = vadd.f32 %v1102_v7, %v1062_v29  ;;  %v1119_v9 = vadd.f32 %v1103_v58, %v1063_v42  ;;  %v7790_v55 = vld [vmem:[#allocation38_spill] sm:$0xff]  ;;  %v7791_v29 = vld [vmem:[#allocation39_spill] sm:$0xff] }
 0x123   : > { %v1120_v11 = vadd.f32 %v1104_v60, %v1064_v45  ;;  %v1121_v8 = vadd.f32 %v1105_v61, %v1065_v28  ;;  %v1122_v41 = vadd.f32 %v1106_v62, %v1066_v59  ;;  %v1123_v10 = vadd.f32 %v1107_v63, %v1067_v40  ;;  %v7793_v3 = vld [vmem:[#allocation47_spill] sm:$0xff] }
 0x124   : > { %v1124_v12 = vadd.f32 %v1108_v0, %v1068_v20  ;;  %v1125_v33 = vadd.f32 %v1109_v1, %v1069_v46  ;;  %v1126_v38 = vadd.f32 %v1110_v48, %v1070_v23  ;;  %v1127_v37 = vadd.f32 %v1111_v49, %v1071_v47 }
 0x125   : > { %v1128_v26 = vadd.f32 %v1112_v50, %v1072_v27  ;;  %vm1133_vm10 = vcmp.eq.s32.totalorder %v4087_v2, %v4828_v6  ;;  %vm1134_vm12 = vcmp.eq.s32.totalorder %v4101_v13, %v4828_v6  ;;  %vm1135_vm13 = vcmp.eq.s32.totalorder %v4104_v14, %v4828_v6 }
 0x126   : > { %vm1136_vm15 = vcmp.eq.s32.totalorder %v4107_v15, %v4828_v6  ;;  %vm1137_vm1 = vcmp.eq.s32.totalorder %v4110_v16, %v4828_v6  ;;  %vm1138_vm2 = vcmp.eq.s32.totalorder %v4113_v17, %v4828_v6  ;;  %vm1139_vm7 = vcmp.eq.s32.totalorder %v4116_v18, %v4828_v6 }
 0x127   : > { %vm1140_vm8 = vcmp.eq.s32.totalorder %v4119_v19, %v4828_v6  ;;  %vm1141_vm9 = vcmp.eq.s32.totalorder %v4125_v21, %v4828_v6  ;;  %vm1142_vm11 = vcmp.eq.s32.totalorder %v4128_v22, %v4828_v6  ;;  %vm1143_vm14 = vcmp.eq.s32.totalorder %v4137_v25, %v4828_v6 }
 0x128   : > { %vm1144_vm0 = vcmp.eq.s32.totalorder %v7755_v32, %v4828_v6  ;;  %vm1145_vm3 = vcmp.eq.s32.totalorder %v7790_v55, %v4828_v6  ;;  %vm1146_vm4 = vcmp.eq.s32.totalorder %v7791_v29, %v4828_v6  ;;  %vm1147_vm5 = vcmp.eq.s32.totalorder %v7792_v43, %v4828_v6  ;;  %v7794_v55 = vld [vmem:[#allocation48_spill] sm:$0xff] }
 0x129   : > { %vm1148_vm6 = vcmp.eq.s32.totalorder %v4154_v31, %v4828_v6  ;;  %v1153_v44 = vsel %vm1133_vm10, %v7793_v3, 0.0  ;;  %v1154_v4 = vsel %vm1134_vm12, %v7793_v3, 0.0  ;;  %v1155_v5 = vsel %vm1135_vm13, %v7793_v3, 0.0  ;;  %v7798_v6 = vld [vmem:[#allocation49_spill] sm:$0xff] }
 0x12a   : > { %v1156_v39 = vsel %vm1136_vm15, %v7793_v3, 0.0  ;;  %v1157_v28 = vsel %vm1137_vm1, %v7793_v3, 0.0  ;;  %v1158_v42 = vsel %vm1138_vm2, %v7793_v3, 0.0  ;;  %v1159_v45 = vsel %vm1139_vm7, %v7793_v3, 0.0 }
 0x12b   : > { %v1160_v59 = vsel %vm1140_vm8, %v7793_v3, 0.0  ;;  %v1161_v40 = vsel %vm1141_vm9, %v7793_v3, 0.0  ;;  %v1162_v20 = vsel %vm1142_vm11, %v7793_v3, 0.0  ;;  %v1163_v46 = vsel %vm1143_vm14, %v7793_v3, 0.0 }
 0x12c   : > { %v1164_v23 = vsel %vm1144_vm0, %v7793_v3, 0.0  ;;  %v1165_v47 = vsel %vm1145_vm3, %v7793_v3, 0.0  ;;  %v1166_v27 = vsel %vm1146_vm4, %v7793_v3, 0.0  ;;  %v1167_v30 = vsel %vm1147_vm5, %v7793_v3, 0.0 }
 0x12d   : > { %v1168_v34 = vsel %vm1148_vm6, %v7793_v3, 0.0  ;;  %v1169_v35 = vadd.f32 %v1153_v44, %v1113_v51  ;;  %v1170_v36 = vadd.f32 %v1154_v4, %v1114_v52  ;;  %v1171_v57 = vadd.f32 %v1155_v5, %v1115_v53 }
 0x12e   : > { %v1172_v7 = vadd.f32 %v1156_v39, %v1116_v54  ;;  %v1173_v58 = vadd.f32 %v1157_v28, %v1117_v56  ;;  %v1174_v60 = vadd.f32 %v1158_v42, %v1118_v24  ;;  %v1175_v61 = vadd.f32 %v1159_v45, %v1119_v9 }
 0x12f   : > { %v1176_v62 = vadd.f32 %v1160_v59, %v1120_v11  ;;  %v1177_v63 = vadd.f32 %v1161_v40, %v1121_v8  ;;  %v1178_v0 = vadd.f32 %v1162_v20, %v1122_v41  ;;  %v1179_v1 = vadd.f32 %v1163_v46, %v1123_v10 }
 0x130   : > { %v1180_v48 = vadd.f32 %v1164_v23, %v1124_v12  ;;  %v1181_v49 = vadd.f32 %v1165_v47, %v1125_v33  ;;  %v1182_v50 = vadd.f32 %v1166_v27, %v1126_v38  ;;  %v1183_v43 = vadd.f32 %v1167_v30, %v1127_v37  ;;  %v7796_v37 = vld [vmem:[#allocation39_spill] sm:$0xff]  ;;  %v7797_v38 = vld [vmem:[#allocation40_spill] sm:$0xff] }
 0x131   : > { %v1184_v29 = vadd.f32 %v1168_v34, %v1128_v26  ;;  %vm1189_vm10 = vcmp.eq.s32.totalorder %v4087_v2, %v7794_v55  ;;  %vm1190_vm12 = vcmp.eq.s32.totalorder %v4101_v13, %v7794_v55  ;;  %vm1191_vm13 = vcmp.eq.s32.totalorder %v4104_v14, %v7794_v55  ;;  %v7795_v26 = vld [vmem:[#allocation38_spill] sm:$0xff] }
 0x132   : > { %vm1192_vm15 = vcmp.eq.s32.totalorder %v4107_v15, %v7794_v55  ;;  %vm1193_vm1 = vcmp.eq.s32.totalorder %v4110_v16, %v7794_v55  ;;  %vm1194_vm2 = vcmp.eq.s32.totalorder %v4113_v17, %v7794_v55  ;;  %vm1195_vm7 = vcmp.eq.s32.totalorder %v4116_v18, %v7794_v55 }
 0x133   : > { %vm1196_vm8 = vcmp.eq.s32.totalorder %v4119_v19, %v7794_v55  ;;  %vm1197_vm9 = vcmp.eq.s32.totalorder %v4125_v21, %v7794_v55  ;;  %vm1198_vm11 = vcmp.eq.s32.totalorder %v4128_v22, %v7794_v55  ;;  %vm1199_vm14 = vcmp.eq.s32.totalorder %v4137_v25, %v7794_v55 }
 0x134   : > { %vm1200_vm0 = vcmp.eq.s32.totalorder %v7755_v32, %v7794_v55  ;;  %vm1201_vm3 = vcmp.eq.s32.totalorder %v7795_v26, %v7794_v55  ;;  %vm1202_vm4 = vcmp.eq.s32.totalorder %v7796_v37, %v7794_v55  ;;  %vm1203_vm5 = vcmp.eq.s32.totalorder %v7797_v38, %v7794_v55  ;;  %v7799_v26 = vld [vmem:[#allocation29_spill] sm:$0xff] }
 0x135   : > { %vm1204_vm6 = vcmp.eq.s32.totalorder %v4154_v31, %v7794_v55  ;;  %v1209_v33 = vsel %vm1189_vm10, %v7798_v6, 0.0  ;;  %v1210_v12 = vsel %vm1190_vm12, %v7798_v6, 0.0  ;;  %v1211_v51 = vsel %vm1191_vm13, %v7798_v6, 0.0  ;;  %v7800_v55 = vld [vmem:[#allocation41_spill] sm:$0xff] }
 0x136   : > { %v1212_v52 = vsel %vm1192_vm15, %v7798_v6, 0.0  ;;  %v1213_v53 = vsel %vm1193_vm1, %v7798_v6, 0.0  ;;  %v1214_v54 = vsel %vm1194_vm2, %v7798_v6, 0.0  ;;  %v1215_v56 = vsel %vm1195_vm7, %v7798_v6, 0.0 }
 0x137   : > { %v1216_v24 = vsel %vm1196_vm8, %v7798_v6, 0.0  ;;  %v1217_v9 = vsel %vm1197_vm9, %v7798_v6, 0.0  ;;  %v1218_v11 = vsel %vm1198_vm11, %v7798_v6, 0.0  ;;  %v1219_v8 = vsel %vm1199_vm14, %v7798_v6, 0.0 }
 0x138   : > { %v1220_v41 = vsel %vm1200_vm0, %v7798_v6, 0.0  ;;  %v1221_v10 = vsel %vm1201_vm3, %v7798_v6, 0.0  ;;  %v1222_v3 = vsel %vm1202_vm4, %v7798_v6, 0.0  ;;  %v1223_v44 = vsel %vm1203_vm5, %v7798_v6, 0.0 }
 0x139   : > { %v1224_v4 = vsel %vm1204_vm6, %v7798_v6, 0.0  ;;  %v1225_v5 = vadd.f32 %v1209_v33, %v1169_v35  ;;  %v1226_v39 = vadd.f32 %v1210_v12, %v1170_v36  ;;  %v1227_v28 = vadd.f32 %v1211_v51, %v1171_v57  ;;  %v7802_v35 = vld [vmem:[#allocation38_spill] sm:$0xff]  ;;  %v7803_v36 = vld [vmem:[#allocation39_spill] sm:$0xff]  ;;  %v7804_v57 = vld [vmem:[#allocation40_spill] sm:$0xff] }
 0x13a   : > { %v1228_v42 = vadd.f32 %v1212_v52, %v1172_v7  ;;  %v1229_v45 = vadd.f32 %v1213_v53, %v1173_v58  ;;  %v1230_v59 = vadd.f32 %v1214_v54, %v1174_v60  ;;  %v1231_v40 = vadd.f32 %v1215_v56, %v1175_v61  ;;  %v7805_v7 = vld [vmem:[#allocation42_spill] sm:$0xff] }
 0x13b   : > { %v1232_v20 = vadd.f32 %v1216_v24, %v1176_v62  ;;  %v1233_v46 = vadd.f32 %v1217_v9, %v1177_v63  ;;  %v1234_v23 = vadd.f32 %v1218_v11, %v1178_v0  ;;  %v1235_v47 = vadd.f32 %v1219_v8, %v1179_v1  ;;  %v7806_v58 = vld [vmem:[#allocation30_spill] sm:$0xff]  ;;  %v7808_v62 = vld [vmem:[#allocation43_spill] sm:$0xff] }
 0x13c   : > { %v1236_v27 = vadd.f32 %v1220_v41, %v1180_v48  ;;  %v1237_v30 = vadd.f32 %v1221_v10, %v1181_v49  ;;  %v1238_v34 = vadd.f32 %v1222_v3, %v1182_v50  ;;  %v1239_v38 = vadd.f32 %v1223_v44, %v1183_v43  ;;  %v7811_v49 = vld [vmem:[#allocation44_spill] sm:$0xff] }
 0x13d   : > { %v1240_v37 = vadd.f32 %v1224_v4, %v1184_v29  ;;  %vm1245_vm10 = vcmp.eq.s32.totalorder %v4087_v2, %v7799_v26  ;;  %vm1246_vm12 = vcmp.eq.s32.totalorder %v4101_v13, %v7799_v26  ;;  %vm1247_vm13 = vcmp.eq.s32.totalorder %v4104_v14, %v7799_v26  ;;  %v7801_v29 = vld [vmem:[#allocation46_spill] sm:$0xff] }
 0x13e   : > { %vm1248_vm15 = vcmp.eq.s32.totalorder %v4107_v15, %v7799_v26  ;;  %vm1249_vm1 = vcmp.eq.s32.totalorder %v4110_v16, %v7799_v26  ;;  %vm1250_vm2 = vcmp.eq.s32.totalorder %v4113_v17, %v7799_v26  ;;  %vm1251_vm7 = vcmp.eq.s32.totalorder %v4116_v18, %v7799_v26 }
 0x13f   : > { %v1264_v43 = vrot.slane %v7801_v29, %v7800_v55  ;;  %vm1252_vm8 = vcmp.eq.s32.totalorder %v4119_v19, %v7799_v26  ;;  %vm1253_vm9 = vcmp.eq.s32.totalorder %v4125_v21, %v7799_v26  ;;  %vm1254_vm11 = vcmp.eq.s32.totalorder %v4128_v22, %v7799_v26 }
 0x140   : > { %vm1255_vm14 = vcmp.eq.s32.totalorder %v4137_v25, %v7799_v26  ;;  %vm1256_vm0 = vcmp.eq.s32.totalorder %v7755_v32, %v7799_v26  ;;  %vm1257_vm3 = vcmp.eq.s32.totalorder %v7802_v35, %v7799_v26  ;;  %vm1258_vm4 = vcmp.eq.s32.totalorder %v7803_v36, %v7799_v26 }
 0x141   : > { %vm1259_vm5 = vcmp.eq.s32.totalorder %v7804_v57, %v7799_v26  ;;  %vm1260_vm6 = vcmp.eq.s32.totalorder %v4154_v31, %v7799_v26  ;;  %v5230_v60 = vrot.slane %v7806_v58, %v7805_v7  ;;  %v5234_v61 = vrot.slane %v7801_v29, %v7805_v7  ;;  %v7813_v26 = vld [vmem:[#allocation38_spill] sm:$0xff] }
 0x142   : > { %v5238_v63 = vrot.slane %v7806_v58, %v7808_v62  ;;  %v1265_v0 = vsel %vm1245_vm10, %v1264_v43, 0.0  ;;  %v1266_v1 = vsel %vm1246_vm12, %v1264_v43, 0.0  ;;  %v5248_v48 = vrot.slane %v7801_v29, %v7808_v62 }
 0x143   : > { %7807 = vst [vmem:[#allocation34_spill] sm:$0xff] %v5234_v61  ;;  %v5252_v50 = vrot.slane %v7806_v58, %v7811_v49  ;;  %v1267_v6 = vsel %vm1247_vm13, %v1264_v43, 0.0  ;;  %v1268_v33 = vsel %vm1248_vm15, %v1264_v43, 0.0  ;;  %v1269_v12 = vsel %vm1249_vm1, %v1264_v43, 0.0 }
 0x144   : > { %7809 = vst [vmem:[#allocation47_spill] sm:$0xff] %v5238_v63  ;;  %7810 = vst [vmem:[#allocation48_spill] sm:$0xff] %v5248_v48  ;;  %v1270_v51 = vsel %vm1250_vm2, %v1264_v43, 0.0  ;;  %v1271_v52 = vsel %vm1251_vm7, %v1264_v43, 0.0  ;;  %v1272_v53 = vsel %vm1252_vm8, %v1264_v43, 0.0  ;;  %v1273_v54 = vsel %vm1253_vm9, %v1264_v43, 0.0 }
 0x145   : > { %7812 = vst [vmem:[#allocation49_spill] sm:$0xff] %v5252_v50  ;;  %v1274_v56 = vsel %vm1254_vm11, %v1264_v43, 0.0  ;;  %v1275_v24 = vsel %vm1255_vm14, %v1264_v43, 0.0  ;;  %v1276_v9 = vsel %vm1256_vm0, %v1264_v43, 0.0  ;;  %v1277_v11 = vsel %vm1257_vm3, %v1264_v43, 0.0 }
 0x146   : > { %v1278_v8 = vsel %vm1258_vm4, %v1264_v43, 0.0  ;;  %v1279_v41 = vsel %vm1259_vm5, %v1264_v43, 0.0  ;;  %v1280_v10 = vsel %vm1260_vm6, %v1264_v43, 0.0  ;;  %v1281_v3 = vadd.f32 %v1265_v0, %v1225_v5 }
 0x147   : > { %v1282_v44 = vadd.f32 %v1266_v1, %v1226_v39  ;;  %v1283_v4 = vadd.f32 %v1267_v6, %v1227_v28  ;;  %v1284_v62 = vadd.f32 %v1268_v33, %v1228_v42  ;;  %v1285_v7 = vadd.f32 %v1269_v12, %v1229_v45 }
 0x148   : > { %v1286_v55 = vadd.f32 %v1270_v51, %v1230_v59  ;;  %v1287_v58 = vadd.f32 %v1271_v52, %v1231_v40  ;;  %v1288_v29 = vadd.f32 %v1272_v53, %v1232_v20  ;;  %v1289_v49 = vadd.f32 %v1273_v54, %v1233_v46 }
 0x149   : > { %v1290_v50 = vadd.f32 %v1274_v56, %v1234_v23  ;;  %v1291_v48 = vadd.f32 %v1275_v24, %v1235_v47  ;;  %v1292_v63 = vadd.f32 %v1276_v9, %v1236_v27  ;;  %v1293_v61 = vadd.f32 %v1277_v11, %v1237_v30 }
 0x14a   : > { %v1294_v36 = vadd.f32 %v1278_v8, %v1238_v34  ;;  %v1295_v57 = vadd.f32 %v1279_v41, %v1239_v38  ;;  %v1296_v35 = vadd.f32 %v1280_v10, %v1240_v37  ;;  %vm1301_vm10 = vcmp.eq.s32.totalorder %v4087_v2, %v5230_v60  ;;  %v7814_v37 = vld [vmem:[#allocation39_spill] sm:$0xff]  ;;  %v7815_v38 = vld [vmem:[#allocation40_spill] sm:$0xff]  ;;  %v7816_v5 = vld [vmem:[#allocation34_spill] sm:$0xff] }
 0x14b   : > { %vm1302_vm12 = vcmp.eq.s32.totalorder %v4101_v13, %v5230_v60  ;;  %vm1303_vm13 = vcmp.eq.s32.totalorder %v4104_v14, %v5230_v60  ;;  %vm1304_vm15 = vcmp.eq.s32.totalorder %v4107_v15, %v5230_v60  ;;  %vm1305_vm1 = vcmp.eq.s32.totalorder %v4110_v16, %v5230_v60 }
 0x14c   : > { %vm1306_vm2 = vcmp.eq.s32.totalorder %v4113_v17, %v5230_v60  ;;  %vm1307_vm7 = vcmp.eq.s32.totalorder %v4116_v18, %v5230_v60  ;;  %vm1308_vm8 = vcmp.eq.s32.totalorder %v4119_v19, %v5230_v60  ;;  %vm1309_vm9 = vcmp.eq.s32.totalorder %v4125_v21, %v5230_v60 }
 0x14d   : > { %vm1310_vm11 = vcmp.eq.s32.totalorder %v4128_v22, %v5230_v60  ;;  %vm1311_vm14 = vcmp.eq.s32.totalorder %v4137_v25, %v5230_v60  ;;  %vm1312_vm0 = vcmp.eq.s32.totalorder %v7755_v32, %v5230_v60  ;;  %vm1313_vm3 = vcmp.eq.s32.totalorder %v7813_v26, %v5230_v60  ;;  %v7817_v26 = vld [vmem:[#allocation47_spill] sm:$0xff] }
 0x14e   : > { %vm1314_vm4 = vcmp.eq.s32.totalorder %v7814_v37, %v5230_v60  ;;  %vm1315_vm5 = vcmp.eq.s32.totalorder %v7815_v38, %v5230_v60  ;;  %vm1316_vm6 = vcmp.eq.s32.totalorder %v4154_v31, %v5230_v60  ;;  %v1321_v39 = vsel %vm1301_vm10, %v7816_v5, 0.0 }
 0x14f   : > { %v1322_v28 = vsel %vm1302_vm12, %v7816_v5, 0.0  ;;  %v1323_v42 = vsel %vm1303_vm13, %v7816_v5, 0.0  ;;  %v1324_v45 = vsel %vm1304_vm15, %v7816_v5, 0.0  ;;  %v1325_v59 = vsel %vm1305_vm1, %v7816_v5, 0.0 }
 0x150   : > { %v1326_v40 = vsel %vm1306_vm2, %v7816_v5, 0.0  ;;  %v1327_v20 = vsel %vm1307_vm7, %v7816_v5, 0.0  ;;  %v1328_v46 = vsel %vm1308_vm8, %v7816_v5, 0.0  ;;  %v1329_v23 = vsel %vm1309_vm9, %v7816_v5, 0.0 }
 0x151   : > { %v1330_v47 = vsel %vm1310_vm11, %v7816_v5, 0.0  ;;  %v1331_v27 = vsel %vm1311_vm14, %v7816_v5, 0.0  ;;  %v1332_v30 = vsel %vm1312_vm0, %v7816_v5, 0.0  ;;  %v1333_v34 = vsel %vm1313_vm3, %v7816_v5, 0.0 }
 0x152   : > { %v1334_v43 = vsel %vm1314_vm4, %v7816_v5, 0.0  ;;  %v1335_v0 = vsel %vm1315_vm5, %v7816_v5, 0.0  ;;  %v1336_v1 = vsel %vm1316_vm6, %v7816_v5, 0.0  ;;  %v1337_v6 = vadd.f32 %v1321_v39, %v1281_v3 }
 0x153   : > { %v1338_v33 = vadd.f32 %v1322_v28, %v1282_v44  ;;  %v1339_v12 = vadd.f32 %v1323_v42, %v1283_v4  ;;  %v1340_v51 = vadd.f32 %v1324_v45, %v1284_v62  ;;  %v1341_v52 = vadd.f32 %v1325_v59, %v1285_v7 }
 0x154   : > { %v1342_v53 = vadd.f32 %v1326_v40, %v1286_v55  ;;  %v1343_v54 = vadd.f32 %v1327_v20, %v1287_v58  ;;  %v1344_v56 = vadd.f32 %v1328_v46, %v1288_v29  ;;  %v1345_v24 = vadd.f32 %v1329_v23, %v1289_v49  ;;  %v7818_v55 = vld [vmem:[#allocation38_spill] sm:$0xff]  ;;  %v7819_v29 = vld [vmem:[#allocation39_spill] sm:$0xff] }
 0x155   : > { %v1346_v9 = vadd.f32 %v1330_v47, %v1290_v50  ;;  %v1347_v11 = vadd.f32 %v1331_v27, %v1291_v48  ;;  %v1348_v8 = vadd.f32 %v1332_v30, %v1292_v63  ;;  %v1349_v41 = vadd.f32 %v1333_v34, %v1293_v61 }
 0x156   : > { %v1350_v10 = vadd.f32 %v1334_v43, %v1294_v36  ;;  %v1351_v38 = vadd.f32 %v1335_v0, %v1295_v57  ;;  %v1352_v37 = vadd.f32 %v1336_v1, %v1296_v35  ;;  %vm1357_vm10 = vcmp.eq.s32.totalorder %v4087_v2, %v7817_v26  ;;  %v7820_v35 = vld [vmem:[#allocation40_spill] sm:$0xff] }
 0x157   : > { %vm1358_vm12 = vcmp.eq.s32.totalorder %v4101_v13, %v7817_v26  ;;  %vm1359_vm13 = vcmp.eq.s32.totalorder %v4104_v14, %v7817_v26  ;;  %vm1360_vm15 = vcmp.eq.s32.totalorder %v4107_v15, %v7817_v26  ;;  %vm1361_vm1 = vcmp.eq.s32.totalorder %v4110_v16, %v7817_v26  ;;  %v7821_v36 = vld [vmem:[#allocation48_spill] sm:$0xff] }
 0x158   : > { %vm1362_vm2 = vcmp.eq.s32.totalorder %v4113_v17, %v7817_v26  ;;  %vm1363_vm7 = vcmp.eq.s32.totalorder %v4116_v18, %v7817_v26  ;;  %vm1364_vm8 = vcmp.eq.s32.totalorder %v4119_v19, %v7817_v26  ;;  %vm1365_vm9 = vcmp.eq.s32.totalorder %v4125_v21, %v7817_v26 }
 0x159   : > { %vm1366_vm11 = vcmp.eq.s32.totalorder %v4128_v22, %v7817_v26  ;;  %vm1367_vm14 = vcmp.eq.s32.totalorder %v4137_v25, %v7817_v26  ;;  %vm1368_vm0 = vcmp.eq.s32.totalorder %v7755_v32, %v7817_v26  ;;  %vm1369_vm3 = vcmp.eq.s32.totalorder %v7818_v55, %v7817_v26  ;;  %v7822_v55 = vld [vmem:[#allocation49_spill] sm:$0xff] }
 0x15a   : > { %vm1370_vm4 = vcmp.eq.s32.totalorder %v7819_v29, %v7817_v26  ;;  %vm1371_vm5 = vcmp.eq.s32.totalorder %v7820_v35, %v7817_v26  ;;  %vm1372_vm6 = vcmp.eq.s32.totalorder %v4154_v31, %v7817_v26  ;;  %v1377_v57 = vsel %vm1357_vm10, %v7821_v36, 0.0  ;;  %v5501_v26 = vld [vmem:[%s4046_s9 + $0x10] sm:$0xff] }
 0x15b   : > { %v1378_v7 = vsel %vm1358_vm12, %v7821_v36, 0.0  ;;  %v1379_v58 = vsel %vm1359_vm13, %v7821_v36, 0.0  ;;  %v1380_v60 = vsel %vm1360_vm15, %v7821_v36, 0.0  ;;  %v1381_v61 = vsel %vm1361_vm1, %v7821_v36, 0.0  ;;  %7823 = vst [vmem:[#allocation29_spill] sm:$0xff] %v5501_v26 }
 0x15c   : > { %v1382_v62 = vsel %vm1362_vm2, %v7821_v36, 0.0  ;;  %v1383_v63 = vsel %vm1363_vm7, %v7821_v36, 0.0  ;;  %v1384_v48 = vsel %vm1364_vm8, %v7821_v36, 0.0  ;;  %v1385_v49 = vsel %vm1365_vm9, %v7821_v36, 0.0 }
 0x15d   : > { %v1386_v50 = vsel %vm1366_vm11, %v7821_v36, 0.0  ;;  %v1387_v3 = vsel %vm1367_vm14, %v7821_v36, 0.0  ;;  %v1388_v44 = vsel %vm1368_vm0, %v7821_v36, 0.0  ;;  %v1389_v4 = vsel %vm1369_vm3, %v7821_v36, 0.0 }
 0x15e   : > { %v1390_v5 = vsel %vm1370_vm4, %v7821_v36, 0.0  ;;  %v1391_v39 = vsel %vm1371_vm5, %v7821_v36, 0.0  ;;  %v1392_v28 = vsel %vm1372_vm6, %v7821_v36, 0.0  ;;  %v1393_v42 = vadd.f32 %v1377_v57, %v1337_v6 }
 0x15f   : > { %v1394_v45 = vadd.f32 %v1378_v7, %v1338_v33  ;;  %v1395_v59 = vadd.f32 %v1379_v58, %v1339_v12  ;;  %v1396_v40 = vadd.f32 %v1380_v60, %v1340_v51  ;;  %v1397_v20 = vadd.f32 %v1381_v61, %v1341_v52  ;;  %v7826_v33 = vld [vmem:[#allocation38_spill] sm:$0xff]  ;;  %v7827_v12 = vld [vmem:[#allocation39_spill] sm:$0xff]  ;;  %v7828_v51 = vld [vmem:[#allocation40_spill] sm:$0xff] }
 0x160   : > { %v1398_v46 = vadd.f32 %v1382_v62, %v1342_v53  ;;  %v1399_v23 = vadd.f32 %v1383_v63, %v1343_v54  ;;  %v1400_v47 = vadd.f32 %v1384_v48, %v1344_v56  ;;  %v1401_v27 = vadd.f32 %v1385_v49, %v1345_v24  ;;  %v7829_v52 = vld [vmem:[#allocation45_spill] sm:$0xff]  ;;  %v7830_v53 = vld [vmem:[#allocation30_spill] sm:$0xff]  ;;  %v7832_v24 = vld [vmem:[#allocation32_spill] sm:$0xff] }
 0x161   : > { %v1402_v30 = vadd.f32 %v1386_v50, %v1346_v9  ;;  %v1403_v34 = vadd.f32 %v1387_v3, %v1347_v11  ;;  %v1404_v43 = vadd.f32 %v1388_v44, %v1348_v8  ;;  %v1405_v0 = vadd.f32 %v1389_v4, %v1349_v41  ;;  %v7833_v9 = vld [vmem:[#allocation31_spill] sm:$0xff]  ;;  %v7839_v58 = vld [vmem:[#allocation36_spill] sm:$0xff] }
 0x162   : > { %v1406_v1 = vadd.f32 %v1390_v5, %v1350_v10  ;;  %v1407_v35 = vadd.f32 %v1391_v39, %v1351_v38  ;;  %v1408_v29 = vadd.f32 %v1392_v28, %v1352_v37  ;;  %vm1413_vm10 = vcmp.eq.s32.totalorder %v4087_v2, %v7822_v55  ;;  %v7824_v37 = vld [vmem:[#allocation44_spill] sm:$0xff]  ;;  %v7825_v38 = vld [vmem:[#allocation46_spill] sm:$0xff]  ;;  %v7836_v41 = vld [vmem:[#allocation35_spill] sm:$0xff] }
 0x163   : > { %vm1414_vm12 = vcmp.eq.s32.totalorder %v4101_v13, %v7822_v55  ;;  %vm1415_vm13 = vcmp.eq.s32.totalorder %v4104_v14, %v7822_v55  ;;  %vm1416_vm15 = vcmp.eq.s32.totalorder %v4107_v15, %v7822_v55  ;;  %vm1417_vm1 = vcmp.eq.s32.totalorder %v4110_v16, %v7822_v55 }
 0x164   : > { %vm1418_vm2 = vcmp.eq.s32.totalorder %v4113_v17, %v7822_v55  ;;  %vm1419_vm7 = vcmp.eq.s32.totalorder %v4116_v18, %v7822_v55  ;;  %vm1420_vm8 = vcmp.eq.s32.totalorder %v4119_v19, %v7822_v55  ;;  %vm1421_vm9 = vcmp.eq.s32.totalorder %v4125_v21, %v7822_v55 }
 0x165   : > { %v1432_v6 = vrot.slane %v7825_v38, %v7824_v37  ;;  %vm1422_vm11 = vcmp.eq.s32.totalorder %v4128_v22, %v7822_v55  ;;  %vm1423_vm14 = vcmp.eq.s32.totalorder %v4137_v25, %v7822_v55  ;;  %vm1424_vm0 = vcmp.eq.s32.totalorder %v7755_v32, %v7822_v55 }
 0x166   : > { %vm1425_vm3 = vcmp.eq.s32.totalorder %v7826_v33, %v7822_v55  ;;  %vm1426_vm4 = vcmp.eq.s32.totalorder %v7827_v12, %v7822_v55  ;;  %vm1427_vm5 = vcmp.eq.s32.totalorder %v7828_v51, %v7822_v55  ;;  %vm1428_vm6 = vcmp.eq.s32.totalorder %v4154_v31, %v7822_v55  ;;  %v7841_v55 = vld [vmem:[#allocation38_spill] sm:$0xff] }
 0x167   : > { %v5527_v54 = vrot.slane %v7830_v53, %v7829_v52  ;;  %v5531_v56 = vrot.slane %v7825_v38, %v7829_v52  ;;  %v5535_v11 = vrot.slane %v7833_v9, %v7832_v24  ;;  %v5539_v8 = vrot.slane %v5501_v26, %v7832_v24 }
 0x168   : > { %v5543_v10 = vrot.slane %v7833_v9, %v7836_v41  ;;  %v1433_v36 = vsel %vm1413_vm10, %v1432_v6, 0.0  ;;  %v1434_v57 = vsel %vm1414_vm12, %v1432_v6, 0.0  ;;  %v5553_v7 = vrot.slane %v5501_v26, %v7836_v41 }
 0x169   : > { %7831 = vst [vmem:[#allocation34_spill] sm:$0xff] %v5531_v56  ;;  %7834 = vst [vmem:[#allocation47_spill] sm:$0xff] %v5535_v11  ;;  %v5557_v60 = vrot.slane %v7833_v9, %v7839_v58  ;;  %v1435_v61 = vsel %vm1415_vm13, %v1432_v6, 0.0  ;;  %v1436_v62 = vsel %vm1416_vm15, %v1432_v6, 0.0  ;;  %v1437_v63 = vsel %vm1417_vm1, %v1432_v6, 0.0 }
 0x16a   : > { %7835 = vst [vmem:[#allocation48_spill] sm:$0xff] %v5539_v8  ;;  %7837 = vst [vmem:[#allocation49_spill] sm:$0xff] %v5543_v10  ;;  %v1438_v48 = vsel %vm1418_vm2, %v1432_v6, 0.0  ;;  %v1439_v49 = vsel %vm1419_vm7, %v1432_v6, 0.0  ;;  %v1440_v50 = vsel %vm1420_vm8, %v1432_v6, 0.0  ;;  %v1441_v3 = vsel %vm1421_vm9, %v1432_v6, 0.0 }
 0x16b   : > { %7838 = vst [vmem:[#allocation46_spill] sm:$0xff] %v5553_v7  ;;  %7840 = vst [vmem:[#allocation30_spill] sm:$0xff] %v5557_v60  ;;  %v1442_v44 = vsel %vm1422_vm11, %v1432_v6, 0.0  ;;  %v1443_v4 = vsel %vm1423_vm14, %v1432_v6, 0.0  ;;  %v1444_v5 = vsel %vm1424_vm0, %v1432_v6, 0.0  ;;  %v1445_v39 = vsel %vm1425_vm3, %v1432_v6, 0.0 }
 0x16c   : > { %v1446_v28 = vsel %vm1426_vm4, %v1432_v6, 0.0  ;;  %v1447_v38 = vsel %vm1427_vm5, %v1432_v6, 0.0  ;;  %v1448_v53 = vsel %vm1428_vm6, %v1432_v6, 0.0  ;;  %v1449_v41 = vadd.f32 %v1433_v36, %v1393_v42 }
 0x16d   : > { %v1450_v24 = vadd.f32 %v1434_v57, %v1394_v45  ;;  %v1451_v52 = vadd.f32 %v1435_v61, %v1395_v59  ;;  %v1452_v37 = vadd.f32 %v1436_v62, %v1396_v40  ;;  %v1453_v9 = vadd.f32 %v1437_v63, %v1397_v20 }
 0x16e   : > { %v1454_v26 = vadd.f32 %v1438_v48, %v1398_v46  ;;  %v1455_v58 = vadd.f32 %v1439_v49, %v1399_v23  ;;  %v1456_v60 = vadd.f32 %v1440_v50, %v1400_v47  ;;  %v1457_v7 = vadd.f32 %v1441_v3, %v1401_v27 }
 0x16f   : > { %v1458_v10 = vadd.f32 %v1442_v44, %v1402_v30  ;;  %v1459_v8 = vadd.f32 %v1443_v4, %v1403_v34  ;;  %v1460_v11 = vadd.f32 %v1444_v5, %v1404_v43  ;;  %v1461_v56 = vadd.f32 %v1445_v39, %v1405_v0 }
 0x170   : > { %v1462_v12 = vadd.f32 %v1446_v28, %v1406_v1  ;;  %v1463_v51 = vadd.f32 %v1447_v38, %v1407_v35  ;;  %v1464_v33 = vadd.f32 %v1448_v53, %v1408_v29  ;;  %vm1469_vm10 = vcmp.eq.s32.totalorder %v4087_v2, %v5527_v54  ;;  %v7842_v29 = vld [vmem:[#allocation39_spill] sm:$0xff]  ;;  %v7843_v35 = vld [vmem:[#allocation40_spill] sm:$0xff]  ;;  %v7844_v42 = vld [vmem:[#allocation34_spill] sm:$0xff] }
 0x171   : > { %vm1470_vm12 = vcmp.eq.s32.totalorder %v4101_v13, %v5527_v54  ;;  %vm1471_vm13 = vcmp.eq.s32.totalorder %v4104_v14, %v5527_v54  ;;  %vm1472_vm15 = vcmp.eq.s32.totalorder %v4107_v15, %v5527_v54  ;;  %vm1473_vm1 = vcmp.eq.s32.totalorder %v4110_v16, %v5527_v54 }
 0x172   : > { %vm1474_vm2 = vcmp.eq.s32.totalorder %v4113_v17, %v5527_v54  ;;  %vm1475_vm7 = vcmp.eq.s32.totalorder %v4116_v18, %v5527_v54  ;;  %vm1476_vm8 = vcmp.eq.s32.totalorder %v4119_v19, %v5527_v54  ;;  %vm1477_vm9 = vcmp.eq.s32.totalorder %v4125_v21, %v5527_v54 }
 0x173   : > { %vm1478_vm11 = vcmp.eq.s32.totalorder %v4128_v22, %v5527_v54  ;;  %vm1479_vm14 = vcmp.eq.s32.totalorder %v4137_v25, %v5527_v54  ;;  %vm1480_vm0 = vcmp.eq.s32.totalorder %v7755_v32, %v5527_v54  ;;  %vm1481_vm3 = vcmp.eq.s32.totalorder %v7841_v55, %v5527_v54  ;;  %v7845_v55 = vld [vmem:[#allocation47_spill] sm:$0xff] }
 0x174   : > { %vm1482_vm4 = vcmp.eq.s32.totalorder %v7842_v29, %v5527_v54  ;;  %vm1483_vm5 = vcmp.eq.s32.totalorder %v7843_v35, %v5527_v54  ;;  %vm1484_vm6 = vcmp.eq.s32.totalorder %v4154_v31, %v5527_v54  ;;  %v1489_v45 = vsel %vm1469_vm10, %v7844_v42, 0.0 }
 0x175   : > { %v1490_v59 = vsel %vm1470_vm12, %v7844_v42, 0.0  ;;  %v1491_v40 = vsel %vm1471_vm13, %v7844_v42, 0.0  ;;  %v1492_v20 = vsel %vm1472_vm15, %v7844_v42, 0.0  ;;  %v1493_v46 = vsel %vm1473_vm1, %v7844_v42, 0.0 }
 0x176   : > { %v1494_v23 = vsel %vm1474_vm2, %v7844_v42, 0.0  ;;  %v1495_v47 = vsel %vm1475_vm7, %v7844_v42, 0.0  ;;  %v1496_v27 = vsel %vm1476_vm8, %v7844_v42, 0.0  ;;  %v1497_v30 = vsel %vm1477_vm9, %v7844_v42, 0.0 }
 0x177   : > { %v1498_v34 = vsel %vm1478_vm11, %v7844_v42, 0.0  ;;  %v1499_v43 = vsel %vm1479_vm14, %v7844_v42, 0.0  ;;  %v1500_v0 = vsel %vm1480_vm0, %v7844_v42, 0.0  ;;  %v1501_v1 = vsel %vm1481_vm3, %v7844_v42, 0.0 }
 0x178   : > { %v1502_v6 = vsel %vm1482_vm4, %v7844_v42, 0.0  ;;  %v1503_v36 = vsel %vm1483_vm5, %v7844_v42, 0.0  ;;  %v1504_v57 = vsel %vm1484_vm6, %v7844_v42, 0.0  ;;  %v1505_v61 = vadd.f32 %v1489_v45, %v1449_v41 }
 0x179   : > { %v1506_v62 = vadd.f32 %v1490_v59, %v1450_v24  ;;  %v1507_v63 = vadd.f32 %v1491_v40, %v1451_v52  ;;  %v1508_v48 = vadd.f32 %v1492_v20, %v1452_v37  ;;  %v1509_v49 = vadd.f32 %v1493_v46, %v1453_v9  ;;  %v7847_v37 = vld [vmem:[#allocation39_spill] sm:$0xff] }
 0x17a   : > { %v1510_v50 = vadd.f32 %v1494_v23, %v1454_v26  ;;  %v1511_v3 = vadd.f32 %v1495_v47, %v1455_v58  ;;  %v1512_v44 = vadd.f32 %v1496_v27, %v1456_v60  ;;  %v1513_v4 = vadd.f32 %v1497_v30, %v1457_v7  ;;  %v7846_v26 = vld [vmem:[#allocation38_spill] sm:$0xff] }
 0x17b   : > { %v1514_v5 = vadd.f32 %v1498_v34, %v1458_v10  ;;  %v1515_v39 = vadd.f32 %v1499_v43, %v1459_v8  ;;  %v1516_v28 = vadd.f32 %v1500_v0, %v1460_v11  ;;  %v1517_v38 = vadd.f32 %v1501_v1, %v1461_v56 }
 0x17c   : > { %v1518_v53 = vadd.f32 %v1502_v6, %v1462_v12  ;;  %v1519_v35 = vadd.f32 %v1503_v36, %v1463_v51  ;;  %v1520_v29 = vadd.f32 %v1504_v57, %v1464_v33  ;;  %vm1525_vm10 = vcmp.eq.s32.totalorder %v4087_v2, %v7845_v55  ;;  %v7848_v33 = vld [vmem:[#allocation40_spill] sm:$0xff] }
 0x17d   : > { %vm1526_vm12 = vcmp.eq.s32.totalorder %v4101_v13, %v7845_v55  ;;  %vm1527_vm13 = vcmp.eq.s32.totalorder %v4104_v14, %v7845_v55  ;;  %vm1528_vm15 = vcmp.eq.s32.totalorder %v4107_v15, %v7845_v55  ;;  %vm1529_vm1 = vcmp.eq.s32.totalorder %v4110_v16, %v7845_v55  ;;  %v7849_v12 = vld [vmem:[#allocation48_spill] sm:$0xff] }
 0x17e   : > { %vm1530_vm2 = vcmp.eq.s32.totalorder %v4113_v17, %v7845_v55  ;;  %vm1531_vm7 = vcmp.eq.s32.totalorder %v4116_v18, %v7845_v55  ;;  %vm1532_vm8 = vcmp.eq.s32.totalorder %v4119_v19, %v7845_v55  ;;  %vm1533_vm9 = vcmp.eq.s32.totalorder %v4125_v21, %v7845_v55 }
 0x17f   : > { %vm1534_vm11 = vcmp.eq.s32.totalorder %v4128_v22, %v7845_v55  ;;  %vm1535_vm14 = vcmp.eq.s32.totalorder %v4137_v25, %v7845_v55  ;;  %vm1536_vm0 = vcmp.eq.s32.totalorder %v7755_v32, %v7845_v55  ;;  %vm1537_vm3 = vcmp.eq.s32.totalorder %v7846_v26, %v7845_v55  ;;  %v7850_v26 = vld [vmem:[#allocation49_spill] sm:$0xff] }
 0x180   : > { %vm1538_vm4 = vcmp.eq.s32.totalorder %v7847_v37, %v7845_v55  ;;  %vm1539_vm5 = vcmp.eq.s32.totalorder %v7848_v33, %v7845_v55  ;;  %vm1540_vm6 = vcmp.eq.s32.totalorder %v4154_v31, %v7845_v55  ;;  %v1545_v51 = vsel %vm1525_vm10, %v7849_v12, 0.0  ;;  %v7851_v55 = vld [vmem:[#allocation38_spill] sm:$0xff] }
 0x181   : > { %v1546_v52 = vsel %vm1526_vm12, %v7849_v12, 0.0  ;;  %v1547_v54 = vsel %vm1527_vm13, %v7849_v12, 0.0  ;;  %v1548_v56 = vsel %vm1528_vm15, %v7849_v12, 0.0  ;;  %v1549_v24 = vsel %vm1529_vm1, %v7849_v12, 0.0 }
 0x182   : > { %v1550_v9 = vsel %vm1530_vm2, %v7849_v12, 0.0  ;;  %v1551_v11 = vsel %vm1531_vm7, %v7849_v12, 0.0  ;;  %v1552_v8 = vsel %vm1532_vm8, %v7849_v12, 0.0  ;;  %v1553_v41 = vsel %vm1533_vm9, %v7849_v12, 0.0 }
 0x183   : > { %v1554_v10 = vsel %vm1534_vm11, %v7849_v12, 0.0  ;;  %v1555_v7 = vsel %vm1535_vm14, %v7849_v12, 0.0  ;;  %v1556_v58 = vsel %vm1536_vm0, %v7849_v12, 0.0  ;;  %v1557_v60 = vsel %vm1537_vm3, %v7849_v12, 0.0 }
 0x184   : > { %v1558_v42 = vsel %vm1538_vm4, %v7849_v12, 0.0  ;;  %v1559_v45 = vsel %vm1539_vm5, %v7849_v12, 0.0  ;;  %v1560_v59 = vsel %vm1540_vm6, %v7849_v12, 0.0  ;;  %v1561_v40 = vadd.f32 %v1545_v51, %v1505_v61  ;;  %v7854_v61 = vld [vmem:[#allocation46_spill] sm:$0xff] }
 0x185   : > { %v1562_v20 = vadd.f32 %v1546_v52, %v1506_v62  ;;  %v1563_v46 = vadd.f32 %v1547_v54, %v1507_v63  ;;  %v1564_v23 = vadd.f32 %v1548_v56, %v1508_v48  ;;  %v1565_v47 = vadd.f32 %v1549_v24, %v1509_v49 }
 0x186   : > { %v1566_v27 = vadd.f32 %v1550_v9, %v1510_v50  ;;  %v1567_v30 = vadd.f32 %v1551_v11, %v1511_v3  ;;  %v1568_v34 = vadd.f32 %v1552_v8, %v1512_v44  ;;  %v1569_v43 = vadd.f32 %v1553_v41, %v1513_v4 }
 0x187   : > { %v1570_v0 = vadd.f32 %v1554_v10, %v1514_v5  ;;  %v1571_v1 = vadd.f32 %v1555_v7, %v1515_v39  ;;  %v1572_v6 = vadd.f32 %v1556_v58, %v1516_v28  ;;  %v1573_v36 = vadd.f32 %v1557_v60, %v1517_v38 }
 0x188   : > { %v1574_v57 = vadd.f32 %v1558_v42, %v1518_v53  ;;  %v1575_v33 = vadd.f32 %v1559_v45, %v1519_v35  ;;  %v1576_v37 = vadd.f32 %v1560_v59, %v1520_v29  ;;  %vm1581_vm10 = vcmp.eq.s32.totalorder %v4087_v2, %v7850_v26  ;;  %v7852_v29 = vld [vmem:[#allocation39_spill] sm:$0xff]  ;;  %v7853_v35 = vld [vmem:[#allocation40_spill] sm:$0xff] }
 0x189   : > { %vm1582_vm12 = vcmp.eq.s32.totalorder %v4101_v13, %v7850_v26  ;;  %vm1583_vm13 = vcmp.eq.s32.totalorder %v4104_v14, %v7850_v26  ;;  %vm1584_vm15 = vcmp.eq.s32.totalorder %v4107_v15, %v7850_v26  ;;  %vm1585_vm1 = vcmp.eq.s32.totalorder %v4110_v16, %v7850_v26 }
 0x18a   : > { %vm1586_vm2 = vcmp.eq.s32.totalorder %v4113_v17, %v7850_v26  ;;  %vm1587_vm7 = vcmp.eq.s32.totalorder %v4116_v18, %v7850_v26  ;;  %vm1588_vm8 = vcmp.eq.s32.totalorder %v4119_v19, %v7850_v26  ;;  %vm1589_vm9 = vcmp.eq.s32.totalorder %v4125_v21, %v7850_v26 }
 0x18b   : > { %vm1590_vm11 = vcmp.eq.s32.totalorder %v4128_v22, %v7850_v26  ;;  %vm1591_vm14 = vcmp.eq.s32.totalorder %v4137_v25, %v7850_v26  ;;  %vm1592_vm0 = vcmp.eq.s32.totalorder %v7755_v32, %v7850_v26  ;;  %vm1593_vm3 = vcmp.eq.s32.totalorder %v7851_v55, %v7850_v26  ;;  %v7855_v55 = vld [vmem:[#allocation30_spill] sm:$0xff] }
 0x18c   : > { %vm1594_vm4 = vcmp.eq.s32.totalorder %v7852_v29, %v7850_v26  ;;  %vm1595_vm5 = vcmp.eq.s32.totalorder %v7853_v35, %v7850_v26  ;;  %vm1596_vm6 = vcmp.eq.s32.totalorder %v4154_v31, %v7850_v26  ;;  %v1601_v62 = vsel %vm1581_vm10, %v7854_v61, 0.0  ;;  %v7856_v26 = vld [vmem:[#allocation36_spill] sm:$0xff] }
 0x18d   : > { %v1602_v63 = vsel %vm1582_vm12, %v7854_v61, 0.0  ;;  %v1603_v48 = vsel %vm1583_vm13, %v7854_v61, 0.0  ;;  %v1604_v49 = vsel %vm1584_vm15, %v7854_v61, 0.0  ;;  %v1605_v50 = vsel %vm1585_vm1, %v7854_v61, 0.0 }
 0x18e   : > { %v1606_v3 = vsel %vm1586_vm2, %v7854_v61, 0.0  ;;  %v1607_v44 = vsel %vm1587_vm7, %v7854_v61, 0.0  ;;  %v1608_v4 = vsel %vm1588_vm8, %v7854_v61, 0.0  ;;  %v1609_v5 = vsel %vm1589_vm9, %v7854_v61, 0.0 }
 0x18f   : > { %v1610_v39 = vsel %vm1590_vm11, %v7854_v61, 0.0  ;;  %v1611_v28 = vsel %vm1591_vm14, %v7854_v61, 0.0  ;;  %v1612_v38 = vsel %vm1592_vm0, %v7854_v61, 0.0  ;;  %v1613_v53 = vsel %vm1593_vm3, %v7854_v61, 0.0 }
 0x190   : > { %v1614_v12 = vsel %vm1594_vm4, %v7854_v61, 0.0  ;;  %v1615_v51 = vsel %vm1595_vm5, %v7854_v61, 0.0  ;;  %v1616_v52 = vsel %vm1596_vm6, %v7854_v61, 0.0  ;;  %v1617_v54 = vadd.f32 %v1601_v62, %v1561_v40  ;;  %v7858_v40 = vld [vmem:[#allocation38_spill] sm:$0xff]  ;;  %v7870_v62 = vld [vmem:[#allocation44_spill] sm:$0xff] }
 0x191   : > { %v1618_v56 = vadd.f32 %v1602_v63, %v1562_v20  ;;  %v1619_v24 = vadd.f32 %v1603_v48, %v1563_v46  ;;  %v1620_v9 = vadd.f32 %v1604_v49, %v1564_v23  ;;  %v1621_v11 = vadd.f32 %v1605_v50, %v1565_v47  ;;  %v7859_v20 = vld [vmem:[#allocation39_spill] sm:$0xff]  ;;  %v7860_v46 = vld [vmem:[#allocation40_spill] sm:$0xff]  ;;  %v7861_v23 = vld [vmem:[#allocation41_spill] sm:$0xff] }
 0x192   : > { %v1622_v8 = vadd.f32 %v1606_v3, %v1566_v27  ;;  %v1623_v41 = vadd.f32 %v1607_v44, %v1567_v30  ;;  %v1624_v10 = vadd.f32 %v1608_v4, %v1568_v34  ;;  %v1625_v7 = vadd.f32 %v1609_v5, %v1569_v43  ;;  %v7862_v47 = vld [vmem:[#allocation31_spill] sm:$0xff]  ;;  %v7864_v34 = vld [vmem:[#allocation42_spill] sm:$0xff] }
 0x193   : > { %v1626_v58 = vadd.f32 %v1610_v39, %v1570_v0  ;;  %v1627_v60 = vadd.f32 %v1611_v28, %v1571_v1  ;;  %v1628_v42 = vadd.f32 %v1612_v38, %v1572_v6  ;;  %v1629_v45 = vadd.f32 %v1613_v53, %v1573_v36  ;;  %v7867_v1 = vld [vmem:[#allocation43_spill] sm:$0xff] }
 0x194   : > { %v1630_v59 = vadd.f32 %v1614_v12, %v1574_v57  ;;  %v1631_v35 = vadd.f32 %v1615_v51, %v1575_v33  ;;  %v1632_v29 = vadd.f32 %v1616_v52, %v1576_v37  ;;  %vm1637_vm10 = vcmp.eq.s32.totalorder %v4087_v2, %v7855_v55  ;;  %v7857_v37 = vld [vmem:[#allocation29_spill] sm:$0xff] }
 0x195   : > { %vm1638_vm12 = vcmp.eq.s32.totalorder %v4101_v13, %v7855_v55  ;;  %vm1639_vm13 = vcmp.eq.s32.totalorder %v4104_v14, %v7855_v55  ;;  %vm1640_vm15 = vcmp.eq.s32.totalorder %v4107_v15, %v7855_v55  ;;  %vm1641_vm1 = vcmp.eq.s32.totalorder %v4110_v16, %v7855_v55 }
 0x196   : > { %vm1642_vm2 = vcmp.eq.s32.totalorder %v4113_v17, %v7855_v55  ;;  %vm1643_vm7 = vcmp.eq.s32.totalorder %v4116_v18, %v7855_v55  ;;  %vm1644_vm8 = vcmp.eq.s32.totalorder %v4119_v19, %v7855_v55  ;;  %vm1645_vm9 = vcmp.eq.s32.totalorder %v4125_v21, %v7855_v55 }
 0x197   : > { %v1656_v33 = vrot.slane %v7857_v37, %v7856_v26  ;;  %vm1646_vm11 = vcmp.eq.s32.totalorder %v4128_v22, %v7855_v55  ;;  %vm1647_vm14 = vcmp.eq.s32.totalorder %v4137_v25, %v7855_v55  ;;  %vm1648_vm0 = vcmp.eq.s32.totalorder %v7755_v32, %v7855_v55 }
 0x198   : > { %vm1649_vm3 = vcmp.eq.s32.totalorder %v7858_v40, %v7855_v55  ;;  %vm1650_vm4 = vcmp.eq.s32.totalorder %v7859_v20, %v7855_v55  ;;  %vm1651_vm5 = vcmp.eq.s32.totalorder %v7860_v46, %v7855_v55  ;;  %vm1652_vm6 = vcmp.eq.s32.totalorder %v4154_v31, %v7855_v55  ;;  %v7872_v55 = vld [vmem:[#allocation38_spill] sm:$0xff] }
 0x199   : > { %v5925_v27 = vrot.slane %v7862_v47, %v7861_v23  ;;  %v5929_v30 = vrot.slane %v7857_v37, %v7861_v23  ;;  %v5933_v43 = vrot.slane %v7862_v47, %v7864_v34  ;;  %v5937_v0 = vrot.slane %v7857_v37, %v7864_v34 }
 0x19a   : > { %v5941_v6 = vrot.slane %v7862_v47, %v7867_v1  ;;  %v1657_v36 = vsel %vm1637_vm10, %v1656_v33, 0.0  ;;  %v1658_v57 = vsel %vm1638_vm12, %v1656_v33, 0.0  ;;  %v5951_v61 = vrot.slane %v7857_v37, %v7867_v1 }
 0x19b   : > { %7863 = vst [vmem:[#allocation34_spill] sm:$0xff] %v5929_v30  ;;  %7865 = vst [vmem:[#allocation47_spill] sm:$0xff] %v5933_v43  ;;  %v5955_v63 = vrot.slane %v7862_v47, %v7870_v62  ;;  %v1659_v48 = vsel %vm1639_vm13, %v1656_v33, 0.0  ;;  %v1660_v49 = vsel %vm1640_vm15, %v1656_v33, 0.0  ;;  %v1661_v50 = vsel %vm1641_vm1, %v1656_v33, 0.0 }
 0x19c   : > { %7866 = vst [vmem:[#allocation48_spill] sm:$0xff] %v5937_v0  ;;  %7868 = vst [vmem:[#allocation49_spill] sm:$0xff] %v5941_v6  ;;  %v1662_v3 = vsel %vm1642_vm2, %v1656_v33, 0.0  ;;  %v1663_v44 = vsel %vm1643_vm7, %v1656_v33, 0.0  ;;  %v1664_v4 = vsel %vm1644_vm8, %v1656_v33, 0.0  ;;  %v1665_v5 = vsel %vm1645_vm9, %v1656_v33, 0.0 }
 0x19d   : > { %7869 = vst [vmem:[#allocation46_spill] sm:$0xff] %v5951_v61  ;;  %7871 = vst [vmem:[#allocation30_spill] sm:$0xff] %v5955_v63  ;;  %v1666_v39 = vsel %vm1646_vm11, %v1656_v33, 0.0  ;;  %v1667_v28 = vsel %vm1647_vm14, %v1656_v33, 0.0  ;;  %v1668_v38 = vsel %vm1648_vm0, %v1656_v33, 0.0  ;;  %v1669_v53 = vsel %vm1649_vm3, %v1656_v33, 0.0 }
 0x19e   : > { %v1670_v12 = vsel %vm1650_vm4, %v1656_v33, 0.0  ;;  %v1671_v51 = vsel %vm1651_vm5, %v1656_v33, 0.0  ;;  %v1672_v52 = vsel %vm1652_vm6, %v1656_v33, 0.0  ;;  %v1673_v1 = vadd.f32 %v1657_v36, %v1617_v54 }
 0x19f   : > { %v1674_v34 = vadd.f32 %v1658_v57, %v1618_v56  ;;  %v1675_v23 = vadd.f32 %v1659_v48, %v1619_v24  ;;  %v1676_v26 = vadd.f32 %v1660_v49, %v1620_v9  ;;  %v1677_v47 = vadd.f32 %v1661_v50, %v1621_v11 }
 0x1a0   : > { %v1678_v37 = vadd.f32 %v1662_v3, %v1622_v8  ;;  %v1679_v62 = vadd.f32 %v1663_v44, %v1623_v41  ;;  %v1680_v63 = vadd.f32 %v1664_v4, %v1624_v10  ;;  %v1681_v61 = vadd.f32 %v1665_v5, %v1625_v7 }
 0x1a1   : > { %v1682_v6 = vadd.f32 %v1666_v39, %v1626_v58  ;;  %v1683_v0 = vadd.f32 %v1667_v28, %v1627_v60  ;;  %v1684_v43 = vadd.f32 %v1668_v38, %v1628_v42  ;;  %v1685_v30 = vadd.f32 %v1669_v53, %v1629_v45 }
 0x1a2   : > { %v1686_v20 = vadd.f32 %v1670_v12, %v1630_v59  ;;  %v1687_v46 = vadd.f32 %v1671_v51, %v1631_v35  ;;  %v1688_v40 = vadd.f32 %v1672_v52, %v1632_v29  ;;  %vm1693_vm10 = vcmp.eq.s32.totalorder %v4087_v2, %v5925_v27  ;;  %v7873_v29 = vld [vmem:[#allocation39_spill] sm:$0xff]  ;;  %v7874_v35 = vld [vmem:[#allocation40_spill] sm:$0xff]  ;;  %v7875_v54 = vld [vmem:[#allocation34_spill] sm:$0xff] }
 0x1a3   : > { %vm1694_vm12 = vcmp.eq.s32.totalorder %v4101_v13, %v5925_v27  ;;  %vm1695_vm13 = vcmp.eq.s32.totalorder %v4104_v14, %v5925_v27  ;;  %vm1696_vm15 = vcmp.eq.s32.totalorder %v4107_v15, %v5925_v27  ;;  %vm1697_vm1 = vcmp.eq.s32.totalorder %v4110_v16, %v5925_v27 }
 0x1a4   : > { %vm1698_vm2 = vcmp.eq.s32.totalorder %v4113_v17, %v5925_v27  ;;  %vm1699_vm7 = vcmp.eq.s32.totalorder %v4116_v18, %v5925_v27  ;;  %vm1700_vm8 = vcmp.eq.s32.totalorder %v4119_v19, %v5925_v27  ;;  %vm1701_vm9 = vcmp.eq.s32.totalorder %v4125_v21, %v5925_v27 }
 0x1a5   : > { %vm1702_vm11 = vcmp.eq.s32.totalorder %v4128_v22, %v5925_v27  ;;  %vm1703_vm14 = vcmp.eq.s32.totalorder %v4137_v25, %v5925_v27  ;;  %vm1704_vm0 = vcmp.eq.s32.totalorder %v7755_v32, %v5925_v27  ;;  %vm1705_vm3 = vcmp.eq.s32.totalorder %v7872_v55, %v5925_v27  ;;  %v7876_v55 = vld [vmem:[#allocation47_spill] sm:$0xff] }
 0x1a6   : > { %vm1706_vm4 = vcmp.eq.s32.totalorder %v7873_v29, %v5925_v27  ;;  %vm1707_vm5 = vcmp.eq.s32.totalorder %v7874_v35, %v5925_v27  ;;  %vm1708_vm6 = vcmp.eq.s32.totalorder %v4154_v31, %v5925_v27  ;;  %v1713_v56 = vsel %vm1693_vm10, %v7875_v54, 0.0 }
 0x1a7   : > { %v1714_v24 = vsel %vm1694_vm12, %v7875_v54, 0.0  ;;  %v1715_v9 = vsel %vm1695_vm13, %v7875_v54, 0.0  ;;  %v1716_v11 = vsel %vm1696_vm15, %v7875_v54, 0.0  ;;  %v1717_v8 = vsel %vm1697_vm1, %v7875_v54, 0.0 }
 0x1a8   : > { %v1718_v41 = vsel %vm1698_vm2, %v7875_v54, 0.0  ;;  %v1719_v10 = vsel %vm1699_vm7, %v7875_v54, 0.0  ;;  %v1720_v7 = vsel %vm1700_vm8, %v7875_v54, 0.0  ;;  %v1721_v58 = vsel %vm1701_vm9, %v7875_v54, 0.0 }
 0x1a9   : > { %v1722_v60 = vsel %vm1702_vm11, %v7875_v54, 0.0  ;;  %v1723_v42 = vsel %vm1703_vm14, %v7875_v54, 0.0  ;;  %v1724_v45 = vsel %vm1704_vm0, %v7875_v54, 0.0  ;;  %v1725_v59 = vsel %vm1705_vm3, %v7875_v54, 0.0 }
 0x1aa   : > { %v1726_v33 = vsel %vm1706_vm4, %v7875_v54, 0.0  ;;  %v1727_v36 = vsel %vm1707_vm5, %v7875_v54, 0.0  ;;  %v1728_v57 = vsel %vm1708_vm6, %v7875_v54, 0.0  ;;  %v1729_v48 = vadd.f32 %v1713_v56, %v1673_v1  ;;  %v3470_v56 = vld [vmem:[%s7881_s25] sm:$0xff]  }
 0x1ab   : > { %v1730_v49 = vadd.f32 %v1714_v24, %v1674_v34  ;;  %v1731_v50 = vadd.f32 %v1715_v9, %v1675_v23  ;;  %v1732_v3 = vadd.f32 %v1716_v11, %v1676_v26  ;;  %v1733_v44 = vadd.f32 %v1717_v8, %v1677_v47  ;;  %v7877_v26 = vld [vmem:[#allocation38_spill] sm:$0xff]  ;;  %3251 = vmatprep.mubr.bf16.mxu0 %v3470_v56 }
 0x1ac   : > { %v1734_v4 = vadd.f32 %v1718_v41, %v1678_v37  ;;  %v1735_v5 = vadd.f32 %v1719_v10, %v1679_v62  ;;  %v1736_v39 = vadd.f32 %v1720_v7, %v1680_v63  ;;  %v1737_v28 = vadd.f32 %v1721_v58, %v1681_v61  ;;  %v7878_v37 = vld [vmem:[#allocation39_spill] sm:$0xff] }
 0x1ad   : > { %v1738_v38 = vadd.f32 %v1722_v60, %v1682_v6  ;;  %v1739_v53 = vadd.f32 %v1723_v42, %v1683_v0  ;;  %v1740_v12 = vadd.f32 %v1724_v45, %v1684_v43  ;;  %v1741_v51 = vadd.f32 %v1725_v59, %v1685_v30 }
 0x1ae   : > { %v1742_v52 = vadd.f32 %v1726_v33, %v1686_v20  ;;  %v1743_v35 = vadd.f32 %v1727_v36, %v1687_v46  ;;  %v1744_v29 = vadd.f32 %v1728_v57, %v1688_v40  ;;  %vm1749_vm10 = vcmp.eq.s32.totalorder %v4087_v2, %v7876_v55  ;;  %v7879_v40 = vld [vmem:[#allocation40_spill] sm:$0xff] }
 0x1af   : > { %vm1750_vm12 = vcmp.eq.s32.totalorder %v4101_v13, %v7876_v55  ;;  %vm1751_vm13 = vcmp.eq.s32.totalorder %v4104_v14, %v7876_v55  ;;  %vm1752_vm15 = vcmp.eq.s32.totalorder %v4107_v15, %v7876_v55  ;;  %vm1753_vm1 = vcmp.eq.s32.totalorder %v4110_v16, %v7876_v55  ;;  %v7880_v20 = vld [vmem:[#allocation48_spill] sm:$0xff] }
 0x1b0   : > { %vm1754_vm2 = vcmp.eq.s32.totalorder %v4113_v17, %v7876_v55  ;;  %vm1755_vm7 = vcmp.eq.s32.totalorder %v4116_v18, %v7876_v55  ;;  %vm1756_vm8 = vcmp.eq.s32.totalorder %v4119_v19, %v7876_v55  ;;  %vm1757_vm9 = vcmp.eq.s32.totalorder %v4125_v21, %v7876_v55 }
 0x1b1   : > { %vm1758_vm11 = vcmp.eq.s32.totalorder %v4128_v22, %v7876_v55  ;;  %vm1759_vm14 = vcmp.eq.s32.totalorder %v4137_v25, %v7876_v55  ;;  %vm1760_vm0 = vcmp.eq.s32.totalorder %v7755_v32, %v7876_v55  ;;  %vm1761_vm3 = vcmp.eq.s32.totalorder %v7877_v26, %v7876_v55  ;;  %v7882_v32 = vld [vmem:[#allocation49_spill] sm:$0xff] }
 0x1b2   : > { %vm1762_vm4 = vcmp.eq.s32.totalorder %v7878_v37, %v7876_v55  ;;  %vm1763_vm5 = vcmp.eq.s32.totalorder %v7879_v40, %v7876_v55  ;;  %vm1764_vm6 = vcmp.eq.s32.totalorder %v4154_v31, %v7876_v55  ;;  %v1769_v46 = vsel %vm1749_vm10, %v7880_v20, 0.0  ;;  %v7883_v55 = vld [vmem:[#allocation37_spill] sm:$0xff] }
 0x1b3   : > { %v1770_v23 = vsel %vm1750_vm12, %v7880_v20, 0.0  ;;  %v1771_v47 = vsel %vm1751_vm13, %v7880_v20, 0.0  ;;  %v1772_v27 = vsel %vm1752_vm15, %v7880_v20, 0.0  ;;  %v1773_v30 = vsel %vm1753_vm1, %v7880_v20, 0.0 }
 0x1b4   : > { %v1774_v34 = vsel %vm1754_vm2, %v7880_v20, 0.0  ;;  %v1775_v43 = vsel %vm1755_vm7, %v7880_v20, 0.0  ;;  %v1776_v0 = vsel %vm1756_vm8, %v7880_v20, 0.0  ;;  %v1777_v1 = vsel %vm1757_vm9, %v7880_v20, 0.0 }
 0x1b5   : > { %v1778_v6 = vsel %vm1758_vm11, %v7880_v20, 0.0  ;;  %v1779_v61 = vsel %vm1759_vm14, %v7880_v20, 0.0  ;;  %v1780_v62 = vsel %vm1760_vm0, %v7880_v20, 0.0  ;;  %v1781_v63 = vsel %vm1761_vm3, %v7880_v20, 0.0 }
 0x1b6   : > { %v1782_v54 = vsel %vm1762_vm4, %v7880_v20, 0.0  ;;  %v1783_v24 = vsel %vm1763_vm5, %v7880_v20, 0.0  ;;  %v1784_v9 = vsel %vm1764_vm6, %v7880_v20, 0.0  ;;  %v1785_v11 = vadd.f32 %v1769_v46, %v1729_v48  ;;  %v7886_v48 = vld [vmem:[#allocation40_spill] sm:$0xff] }
 0x1b7   : > { %v1786_v8 = vadd.f32 %v1770_v23, %v1730_v49  ;;  %v1787_v41 = vadd.f32 %v1771_v47, %v1731_v50  ;;  %v1788_v10 = vadd.f32 %v1772_v27, %v1732_v3  ;;  %v1789_v7 = vadd.f32 %v1773_v30, %v1733_v44  ;;  %v7887_v49 = vld [vmem:[#allocation46_spill] sm:$0xff] }
 0x1b8   : > { %v1790_v58 = vadd.f32 %v1774_v34, %v1734_v4  ;;  %v1791_v60 = vadd.f32 %v1775_v43, %v1735_v5  ;;  %v1792_v42 = vadd.f32 %v1776_v0, %v1736_v39  ;;  %v1793_v45 = vadd.f32 %v1777_v1, %v1737_v28 }
 0x1b9   : > { %v1794_v59 = vadd.f32 %v1778_v6, %v1738_v38  ;;  %v1795_v33 = vadd.f32 %v1779_v61, %v1739_v53  ;;  %v1796_v36 = vadd.f32 %v1780_v62, %v1740_v12  ;;  %v1797_v57 = vadd.f32 %v1781_v63, %v1741_v51 }
 0x1ba   : > { %v1798_v40 = vadd.f32 %v1782_v54, %v1742_v52  ;;  %v1799_v37 = vadd.f32 %v1783_v24, %v1743_v35  ;;  %v1800_v26 = vadd.f32 %v1784_v9, %v1744_v29  ;;  %vm1805_vm10 = vcmp.eq.s32.totalorder %v4087_v2, %v7882_v32  ;;  %v7884_v29 = vld [vmem:[#allocation38_spill] sm:$0xff]  ;;  %v7885_v35 = vld [vmem:[#allocation39_spill] sm:$0xff] }
 0x1bb   : > { %vm1806_vm12 = vcmp.eq.s32.totalorder %v4101_v13, %v7882_v32  ;;  %vm1807_vm13 = vcmp.eq.s32.totalorder %v4104_v14, %v7882_v32  ;;  %vm1808_vm15 = vcmp.eq.s32.totalorder %v4107_v15, %v7882_v32  ;;  %vm1809_vm1 = vcmp.eq.s32.totalorder %v4110_v16, %v7882_v32 }
 0x1bc   : > { %vm1810_vm2 = vcmp.eq.s32.totalorder %v4113_v17, %v7882_v32  ;;  %vm1811_vm7 = vcmp.eq.s32.totalorder %v4116_v18, %v7882_v32  ;;  %vm1812_vm8 = vcmp.eq.s32.totalorder %v4119_v19, %v7882_v32  ;;  %vm1813_vm9 = vcmp.eq.s32.totalorder %v4125_v21, %v7882_v32 }
 0x1bd   : > { %vm1814_vm11 = vcmp.eq.s32.totalorder %v4128_v22, %v7882_v32  ;;  %vm1815_vm14 = vcmp.eq.s32.totalorder %v4137_v25, %v7882_v32  ;;  %vm1816_vm0 = vcmp.eq.s32.totalorder %v7883_v55, %v7882_v32  ;;  %vm1817_vm3 = vcmp.eq.s32.totalorder %v7884_v29, %v7882_v32  ;;  %v7888_v29 = vld [vmem:[#allocation30_spill] sm:$0xff] }
 0x1be   : > { %vm1818_vm4 = vcmp.eq.s32.totalorder %v7885_v35, %v7882_v32  ;;  %vm1819_vm5 = vcmp.eq.s32.totalorder %v7886_v48, %v7882_v32  ;;  %vm1820_vm6 = vcmp.eq.s32.totalorder %v4154_v31, %v7882_v32  ;;  %v1825_v50 = vsel %vm1805_vm10, %v7887_v49, 0.0  ;;  %v6302_v32 = vld [vmem:[%s4046_s9 + $0x18] sm:$0xff] }
 0x1bf   : > { %v1826_v3 = vsel %vm1806_vm12, %v7887_v49, 0.0  ;;  %v1827_v44 = vsel %vm1807_vm13, %v7887_v49, 0.0  ;;  %v1828_v4 = vsel %vm1808_vm15, %v7887_v49, 0.0  ;;  %v1829_v5 = vsel %vm1809_vm1, %v7887_v49, 0.0  ;;  %7889 = vst [vmem:[#allocation34_spill] sm:$0xff] %v6302_v32 }
 0x1c0   : > { %v1830_v39 = vsel %vm1810_vm2, %v7887_v49, 0.0  ;;  %v1831_v28 = vsel %vm1811_vm7, %v7887_v49, 0.0  ;;  %v1832_v38 = vsel %vm1812_vm8, %v7887_v49, 0.0  ;;  %v1833_v53 = vsel %vm1813_vm9, %v7887_v49, 0.0 }
 0x1c1   : > { %v1834_v12 = vsel %vm1814_vm11, %v7887_v49, 0.0  ;;  %v1835_v51 = vsel %vm1815_vm14, %v7887_v49, 0.0  ;;  %v1836_v52 = vsel %vm1816_vm0, %v7887_v49, 0.0  ;;  %v1837_v20 = vsel %vm1817_vm3, %v7887_v49, 0.0 }
 0x1c2   : > { %v1838_v46 = vsel %vm1818_vm4, %v7887_v49, 0.0  ;;  %v1839_v23 = vsel %vm1819_vm5, %v7887_v49, 0.0  ;;  %v1840_v47 = vsel %vm1820_vm6, %v7887_v49, 0.0  ;;  %v1841_v27 = vadd.f32 %v1825_v50, %v1785_v11  ;;  %v7892_v11 = vld [vmem:[#allocation38_spill] sm:$0xff] }
 0x1c3   : > { %v1842_v30 = vadd.f32 %v1826_v3, %v1786_v8  ;;  %v1843_v34 = vadd.f32 %v1827_v44, %v1787_v41  ;;  %v1844_v43 = vadd.f32 %v1828_v4, %v1788_v10  ;;  %v1845_v0 = vadd.f32 %v1829_v5, %v1789_v7  ;;  %v7893_v8 = vld [vmem:[#allocation39_spill] sm:$0xff]  ;;  %v7894_v41 = vld [vmem:[#allocation40_spill] sm:$0xff]  ;;  %v7895_v10 = vld [vmem:[#allocation45_spill] sm:$0xff] }
 0x1c4   : > { %v1846_v1 = vadd.f32 %v1830_v39, %v1790_v58  ;;  %v1847_v6 = vadd.f32 %v1831_v28, %v1791_v60  ;;  %v1848_v61 = vadd.f32 %v1832_v38, %v1792_v42  ;;  %v1849_v62 = vadd.f32 %v1833_v53, %v1793_v45  ;;  %v7896_v7 = vld [vmem:[#allocation31_spill] sm:$0xff]  ;;  %v7898_v42 = vld [vmem:[#allocation32_spill] sm:$0xff]  ;;  %v7899_v45 = vld [vmem:[#allocation33_spill] sm:$0xff] }
 0x1c5   : > { %v1850_v63 = vadd.f32 %v1834_v12, %v1794_v59  ;;  %v1851_v54 = vadd.f32 %v1835_v51, %v1795_v33  ;;  %v1852_v56 = vadd.f32 %v1836_v52, %v1796_v36  ;;  %v1853_v24 = vadd.f32 %v1837_v20, %v1797_v57  ;;  %v7902_v36 = vld [vmem:[#allocation35_spill] sm:$0xff]  ;;  %v7905_v44 = vld [vmem:[#allocation36_spill] sm:$0xff] }
 0x1c6   : > { %v1854_v9 = vadd.f32 %v1838_v46, %v1798_v40  ;;  %v1855_v48 = vadd.f32 %v1839_v23, %v1799_v37  ;;  %v1856_v35 = vadd.f32 %v1840_v47, %v1800_v26  ;;  %vm1861_vm10 = vcmp.eq.s32.totalorder %v4087_v2, %v7888_v29  ;;  %v7890_v26 = vld [vmem:[#allocation44_spill] sm:$0xff]  ;;  %v7891_v37 = vld [vmem:[#allocation29_spill] sm:$0xff] }
 0x1c7   : > { %vm1862_vm12 = vcmp.eq.s32.totalorder %v4101_v13, %v7888_v29  ;;  %vm1863_vm13 = vcmp.eq.s32.totalorder %v4104_v14, %v7888_v29  ;;  %vm1864_vm15 = vcmp.eq.s32.totalorder %v4107_v15, %v7888_v29  ;;  %vm1865_vm1 = vcmp.eq.s32.totalorder %v4110_v16, %v7888_v29 }
 0x1c8   : > { %vm1866_vm2 = vcmp.eq.s32.totalorder %v4113_v17, %v7888_v29  ;;  %vm1867_vm7 = vcmp.eq.s32.totalorder %v4116_v18, %v7888_v29  ;;  %vm1868_vm8 = vcmp.eq.s32.totalorder %v4119_v19, %v7888_v29  ;;  %vm1869_vm9 = vcmp.eq.s32.totalorder %v4125_v21, %v7888_v29 }
 0x1c9   : > { %v1880_v40 = vrot.slane %v7891_v37, %v7890_v26  ;;  %vm1870_vm11 = vcmp.eq.s32.totalorder %v4128_v22, %v7888_v29  ;;  %vm1871_vm14 = vcmp.eq.s32.totalorder %v4137_v25, %v7888_v29  ;;  %vm1872_vm0 = vcmp.eq.s32.totalorder %v7883_v55, %v7888_v29 }
 0x1ca   : > { %vm1873_vm3 = vcmp.eq.s32.totalorder %v7892_v11, %v7888_v29  ;;  %vm1874_vm4 = vcmp.eq.s32.totalorder %v7893_v8, %v7888_v29  ;;  %vm1875_vm5 = vcmp.eq.s32.totalorder %v7894_v41, %v7888_v29  ;;  %vm1876_vm6 = vcmp.eq.s32.totalorder %v4154_v31, %v7888_v29  ;;  %v7907_v29 = vld [vmem:[#allocation38_spill] sm:$0xff] }
 0x1cb   : > { %v6328_v58 = vrot.slane %v7896_v7, %v7895_v10  ;;  %v6332_v60 = vrot.slane %v7891_v37, %v7895_v10  ;;  %v6336_v59 = vrot.slane %v7899_v45, %v7898_v42  ;;  %v6340_v33 = vrot.slane %v6302_v32, %v7898_v42 }
 0x1cc   : > { %v6344_v57 = vrot.slane %v7899_v45, %v7902_v36  ;;  %v1881_v49 = vsel %vm1861_vm10, %v1880_v40, 0.0  ;;  %v1882_v50 = vsel %vm1862_vm12, %v1880_v40, 0.0  ;;  %v6354_v3 = vrot.slane %v6302_v32, %v7902_v36 }
 0x1cd   : > { %7897 = vst [vmem:[#allocation47_spill] sm:$0xff] %v6332_v60  ;;  %7900 = vst [vmem:[#allocation48_spill] sm:$0xff] %v6336_v59  ;;  %v6358_v4 = vrot.slane %v7899_v45, %v7905_v44  ;;  %v1883_v5 = vsel %vm1863_vm13, %v1880_v40, 0.0  ;;  %v1884_v39 = vsel %vm1864_vm15, %v1880_v40, 0.0  ;;  %v1885_v28 = vsel %vm1865_vm1, %v1880_v40, 0.0 }
 0x1ce   : > { %7901 = vst [vmem:[#allocation49_spill] sm:$0xff] %v6340_v33  ;;  %7903 = vst [vmem:[#allocation37_spill] sm:$0xff] %v6344_v57  ;;  %v1886_v38 = vsel %vm1866_vm2, %v1880_v40, 0.0  ;;  %v1887_v53 = vsel %vm1867_vm7, %v1880_v40, 0.0  ;;  %v1888_v12 = vsel %vm1868_vm8, %v1880_v40, 0.0  ;;  %v1889_v51 = vsel %vm1869_vm9, %v1880_v40, 0.0 }
 0x1cf   : > { %7904 = vst [vmem:[#allocation46_spill] sm:$0xff] %v6354_v3  ;;  %7906 = vst [vmem:[#allocation30_spill] sm:$0xff] %v6358_v4  ;;  %v1890_v52 = vsel %vm1870_vm11, %v1880_v40, 0.0  ;;  %v1891_v20 = vsel %vm1871_vm14, %v1880_v40, 0.0  ;;  %v1892_v46 = vsel %vm1872_vm0, %v1880_v40, 0.0  ;;  %v1893_v23 = vsel %vm1873_vm3, %v1880_v40, 0.0 }
 0x1d0   : > { %v1894_v47 = vsel %vm1874_vm4, %v1880_v40, 0.0  ;;  %v1895_v37 = vsel %vm1875_vm5, %v1880_v40, 0.0  ;;  %v1896_v7 = vsel %vm1876_vm6, %v1880_v40, 0.0  ;;  %v1897_v42 = vadd.f32 %v1881_v49, %v1841_v27 }
 0x1d1   : > { %v1898_v36 = vadd.f32 %v1882_v50, %v1842_v30  ;;  %v1899_v10 = vadd.f32 %v1883_v5, %v1843_v34  ;;  %v1900_v26 = vadd.f32 %v1884_v39, %v1844_v43  ;;  %v1901_v45 = vadd.f32 %v1885_v28, %v1845_v0 }
 0x1d2   : > { %v1902_v32 = vadd.f32 %v1886_v38, %v1846_v1  ;;  %v1903_v44 = vadd.f32 %v1887_v53, %v1847_v6  ;;  %v1904_v4 = vadd.f32 %v1888_v12, %v1848_v61  ;;  %v1905_v3 = vadd.f32 %v1889_v51, %v1849_v62 }
 0x1d3   : > { %v1906_v57 = vadd.f32 %v1890_v52, %v1850_v63  ;;  %v1907_v33 = vadd.f32 %v1891_v20, %v1851_v54  ;;  %v1908_v59 = vadd.f32 %v1892_v46, %v1852_v56  ;;  %v1909_v60 = vadd.f32 %v1893_v23, %v1853_v24 }
 0x1d4   : > { %v1910_v8 = vadd.f32 %v1894_v47, %v1854_v9  ;;  %v1911_v41 = vadd.f32 %v1895_v37, %v1855_v48  ;;  %v1912_v11 = vadd.f32 %v1896_v7, %v1856_v35  ;;  %vm1917_vm10 = vcmp.eq.s32.totalorder %v4087_v2, %v6328_v58  ;;  %v7908_v35 = vld [vmem:[#allocation39_spill] sm:$0xff]  ;;  %v7909_v48 = vld [vmem:[#allocation40_spill] sm:$0xff] }
 0x1d5   : > { %vm1918_vm12 = vcmp.eq.s32.totalorder %v4101_v13, %v6328_v58  ;;  %vm1919_vm13 = vcmp.eq.s32.totalorder %v4104_v14, %v6328_v58  ;;  %vm1920_vm15 = vcmp.eq.s32.totalorder %v4107_v15, %v6328_v58  ;;  %vm1921_vm1 = vcmp.eq.s32.totalorder %v4110_v16, %v6328_v58  ;;  %v7910_v27 = vld [vmem:[#allocation47_spill] sm:$0xff] }
 0x1d6   : > { %vm1922_vm2 = vcmp.eq.s32.totalorder %v4113_v17, %v6328_v58  ;;  %vm1923_vm7 = vcmp.eq.s32.totalorder %v4116_v18, %v6328_v58  ;;  %vm1924_vm8 = vcmp.eq.s32.totalorder %v4119_v19, %v6328_v58  ;;  %vm1925_vm9 = vcmp.eq.s32.totalorder %v4125_v21, %v6328_v58 }
 0x1d7   : > { %vm1926_vm11 = vcmp.eq.s32.totalorder %v4128_v22, %v6328_v58  ;;  %vm1927_vm14 = vcmp.eq.s32.totalorder %v4137_v25, %v6328_v58  ;;  %vm1928_vm0 = vcmp.eq.s32.totalorder %v7883_v55, %v6328_v58  ;;  %vm1929_vm3 = vcmp.eq.s32.totalorder %v7907_v29, %v6328_v58  ;;  %v7911_v29 = vld [vmem:[#allocation48_spill] sm:$0xff] }
 0x1d8   : > { %vm1930_vm4 = vcmp.eq.s32.totalorder %v7908_v35, %v6328_v58  ;;  %vm1931_vm5 = vcmp.eq.s32.totalorder %v7909_v48, %v6328_v58  ;;  %vm1932_vm6 = vcmp.eq.s32.totalorder %v4154_v31, %v6328_v58  ;;  %v1937_v30 = vsel %vm1917_vm10, %v7910_v27, 0.0 }
 0x1d9   : > { %v1938_v34 = vsel %vm1918_vm12, %v7910_v27, 0.0  ;;  %v1939_v43 = vsel %vm1919_vm13, %v7910_v27, 0.0  ;;  %v1940_v0 = vsel %vm1920_vm15, %v7910_v27, 0.0  ;;  %v1941_v1 = vsel %vm1921_vm1, %v7910_v27, 0.0 }
 0x1da   : > { %v1942_v6 = vsel %vm1922_vm2, %v7910_v27, 0.0  ;;  %v1943_v61 = vsel %vm1923_vm7, %v7910_v27, 0.0  ;;  %v1944_v62 = vsel %vm1924_vm8, %v7910_v27, 0.0  ;;  %v1945_v63 = vsel %vm1925_vm9, %v7910_v27, 0.0 }
 0x1db   : > { %v1946_v54 = vsel %vm1926_vm11, %v7910_v27, 0.0  ;;  %v1947_v56 = vsel %vm1927_vm14, %v7910_v27, 0.0  ;;  %v1948_v24 = vsel %vm1928_vm0, %v7910_v27, 0.0  ;;  %v1949_v9 = vsel %vm1929_vm3, %v7910_v27, 0.0 }
 0x1dc   : > { %v1950_v40 = vsel %vm1930_vm4, %v7910_v27, 0.0  ;;  %v1951_v49 = vsel %vm1931_vm5, %v7910_v27, 0.0  ;;  %v1952_v50 = vsel %vm1932_vm6, %v7910_v27, 0.0  ;;  %v1953_v5 = vadd.f32 %v1937_v30, %v1897_v42 }
 0x1dd   : > { %v1954_v39 = vadd.f32 %v1938_v34, %v1898_v36  ;;  %v1955_v28 = vadd.f32 %v1939_v43, %v1899_v10  ;;  %v1956_v38 = vadd.f32 %v1940_v0, %v1900_v26  ;;  %v1957_v53 = vadd.f32 %v1941_v1, %v1901_v45  ;;  %v7913_v26 = vld [vmem:[#allocation39_spill] sm:$0xff] }
 0x1de   : > { %v1958_v12 = vadd.f32 %v1942_v6, %v1902_v32  ;;  %v1959_v51 = vadd.f32 %v1943_v61, %v1903_v44  ;;  %v1960_v52 = vadd.f32 %v1944_v62, %v1904_v4  ;;  %v1961_v20 = vadd.f32 %v1945_v63, %v1905_v3  ;;  %v7912_v32 = vld [vmem:[#allocation38_spill] sm:$0xff] }
 0x1df   : > { %v1962_v46 = vadd.f32 %v1946_v54, %v1906_v57  ;;  %v1963_v23 = vadd.f32 %v1947_v56, %v1907_v33  ;;  %v1964_v47 = vadd.f32 %v1948_v24, %v1908_v59  ;;  %v1965_v37 = vadd.f32 %v1949_v9, %v1909_v60 }
 0x1e0   : > { %v1966_v7 = vadd.f32 %v1950_v40, %v1910_v8  ;;  %v1967_v48 = vadd.f32 %v1951_v49, %v1911_v41  ;;  %v1968_v35 = vadd.f32 %v1952_v50, %v1912_v11  ;;  %vm1973_vm10 = vcmp.eq.s32.totalorder %v4087_v2, %v7911_v29  ;;  %v7914_v11 = vld [vmem:[#allocation40_spill] sm:$0xff]  ;;  %v7915_v8 = vld [vmem:[#allocation49_spill] sm:$0xff] }
 0x1e1   : > { %vm1974_vm12 = vcmp.eq.s32.totalorder %v4101_v13, %v7911_v29  ;;  %vm1975_vm13 = vcmp.eq.s32.totalorder %v4104_v14, %v7911_v29  ;;  %vm1976_vm15 = vcmp.eq.s32.totalorder %v4107_v15, %v7911_v29  ;;  %vm1977_vm1 = vcmp.eq.s32.totalorder %v4110_v16, %v7911_v29 }
 0x1e2   : > { %vm1978_vm2 = vcmp.eq.s32.totalorder %v4113_v17, %v7911_v29  ;;  %vm1979_vm7 = vcmp.eq.s32.totalorder %v4116_v18, %v7911_v29  ;;  %vm1980_vm8 = vcmp.eq.s32.totalorder %v4119_v19, %v7911_v29  ;;  %vm1981_vm9 = vcmp.eq.s32.totalorder %v4125_v21, %v7911_v29 }
 0x1e3   : > { %vm1982_vm11 = vcmp.eq.s32.totalorder %v4128_v22, %v7911_v29  ;;  %vm1983_vm14 = vcmp.eq.s32.totalorder %v4137_v25, %v7911_v29  ;;  %vm1984_vm0 = vcmp.eq.s32.totalorder %v7883_v55, %v7911_v29  ;;  %vm1985_vm3 = vcmp.eq.s32.totalorder %v7912_v32, %v7911_v29  ;;  %v7916_v32 = vld [vmem:[#allocation37_spill] sm:$0xff] }
 0x1e4   : > { %vm1986_vm4 = vcmp.eq.s32.totalorder %v7913_v26, %v7911_v29  ;;  %vm1987_vm5 = vcmp.eq.s32.totalorder %v7914_v11, %v7911_v29  ;;  %vm1988_vm6 = vcmp.eq.s32.totalorder %v4154_v31, %v7911_v29  ;;  %v1993_v41 = vsel %vm1973_vm10, %v7915_v8, 0.0  ;;  %v7917_v29 = vld [vmem:[#allocation38_spill] sm:$0xff] }
 0x1e5   : > { %v1994_v10 = vsel %vm1974_vm12, %v7915_v8, 0.0  ;;  %v1995_v58 = vsel %vm1975_vm13, %v7915_v8, 0.0  ;;  %v1996_v60 = vsel %vm1976_vm15, %v7915_v8, 0.0  ;;  %v1997_v45 = vsel %vm1977_vm1, %v7915_v8, 0.0 }
 0x1e6   : > { %v1998_v59 = vsel %vm1978_vm2, %v7915_v8, 0.0  ;;  %v1999_v33 = vsel %vm1979_vm7, %v7915_v8, 0.0  ;;  %v2000_v57 = vsel %vm1980_vm8, %v7915_v8, 0.0  ;;  %v2001_v3 = vsel %vm1981_vm9, %v7915_v8, 0.0 }
 0x1e7   : > { %v2002_v44 = vsel %vm1982_vm11, %v7915_v8, 0.0  ;;  %v2003_v4 = vsel %vm1983_vm14, %v7915_v8, 0.0  ;;  %v2004_v42 = vsel %vm1984_vm0, %v7915_v8, 0.0  ;;  %v2005_v36 = vsel %vm1985_vm3, %v7915_v8, 0.0 }
 0x1e8   : > { %v2006_v27 = vsel %vm1986_vm4, %v7915_v8, 0.0  ;;  %v2007_v30 = vsel %vm1987_vm5, %v7915_v8, 0.0  ;;  %v2008_v34 = vsel %vm1988_vm6, %v7915_v8, 0.0  ;;  %v2009_v43 = vadd.f32 %v1993_v41, %v1953_v5  ;;  %v7920_v5 = vld [vmem:[#allocation46_spill] sm:$0xff] }
 0x1e9   : > { %v2010_v0 = vadd.f32 %v1994_v10, %v1954_v39  ;;  %v2011_v1 = vadd.f32 %v1995_v58, %v1955_v28  ;;  %v2012_v6 = vadd.f32 %v1996_v60, %v1956_v38  ;;  %v2013_v61 = vadd.f32 %v1997_v45, %v1957_v53 }
 0x1ea   : > { %v2014_v62 = vadd.f32 %v1998_v59, %v1958_v12  ;;  %v2015_v63 = vadd.f32 %v1999_v33, %v1959_v51  ;;  %v2016_v54 = vadd.f32 %v2000_v57, %v1960_v52  ;;  %v2017_v56 = vadd.f32 %v2001_v3, %v1961_v20 }
 0x1eb   : > { %v2018_v24 = vadd.f32 %v2002_v44, %v1962_v46  ;;  %v2019_v9 = vadd.f32 %v2003_v4, %v1963_v23  ;;  %v2020_v40 = vadd.f32 %v2004_v42, %v1964_v47  ;;  %v2021_v49 = vadd.f32 %v2005_v36, %v1965_v37 }
 0x1ec   : > { %v2022_v50 = vadd.f32 %v2006_v27, %v1966_v7  ;;  %v2023_v11 = vadd.f32 %v2007_v30, %v1967_v48  ;;  %v2024_v26 = vadd.f32 %v2008_v34, %v1968_v35  ;;  %vm2029_vm10 = vcmp.eq.s32.totalorder %v4087_v2, %v7916_v32  ;;  %v7918_v35 = vld [vmem:[#allocation39_spill] sm:$0xff]  ;;  %v7919_v48 = vld [vmem:[#allocation40_spill] sm:$0xff] }
 0x1ed   : > { %vm2030_vm12 = vcmp.eq.s32.totalorder %v4101_v13, %v7916_v32  ;;  %vm2031_vm13 = vcmp.eq.s32.totalorder %v4104_v14, %v7916_v32  ;;  %vm2032_vm15 = vcmp.eq.s32.totalorder %v4107_v15, %v7916_v32  ;;  %vm2033_vm1 = vcmp.eq.s32.totalorder %v4110_v16, %v7916_v32 }
 0x1ee   : > { %vm2034_vm2 = vcmp.eq.s32.totalorder %v4113_v17, %v7916_v32  ;;  %vm2035_vm7 = vcmp.eq.s32.totalorder %v4116_v18, %v7916_v32  ;;  %vm2036_vm8 = vcmp.eq.s32.totalorder %v4119_v19, %v7916_v32  ;;  %vm2037_vm9 = vcmp.eq.s32.totalorder %v4125_v21, %v7916_v32 }
 0x1ef   : > { %vm2038_vm11 = vcmp.eq.s32.totalorder %v4128_v22, %v7916_v32  ;;  %vm2039_vm14 = vcmp.eq.s32.totalorder %v4137_v25, %v7916_v32  ;;  %vm2040_vm0 = vcmp.eq.s32.totalorder %v7883_v55, %v7916_v32  ;;  %vm2041_vm3 = vcmp.eq.s32.totalorder %v7917_v29, %v7916_v32  ;;  %v7921_v29 = vld [vmem:[#allocation30_spill] sm:$0xff] }
 0x1f0   : > { %vm2042_vm4 = vcmp.eq.s32.totalorder %v7918_v35, %v7916_v32  ;;  %vm2043_vm5 = vcmp.eq.s32.totalorder %v7919_v48, %v7916_v32  ;;  %vm2044_vm6 = vcmp.eq.s32.totalorder %v4154_v31, %v7916_v32  ;;  %v2049_v39 = vsel %vm2029_vm10, %v7920_v5, 0.0  ;;  %v7922_v32 = vld [vmem:[#allocation36_spill] sm:$0xff] }
 0x1f1   : > { %v2050_v28 = vsel %vm2030_vm12, %v7920_v5, 0.0  ;;  %v2051_v38 = vsel %vm2031_vm13, %v7920_v5, 0.0  ;;  %v2052_v53 = vsel %vm2032_vm15, %v7920_v5, 0.0  ;;  %v2053_v12 = vsel %vm2033_vm1, %v7920_v5, 0.0 }
 0x1f2   : > { %v2054_v51 = vsel %vm2034_vm2, %v7920_v5, 0.0  ;;  %v2055_v52 = vsel %vm2035_vm7, %v7920_v5, 0.0  ;;  %v2056_v20 = vsel %vm2036_vm8, %v7920_v5, 0.0  ;;  %v2057_v46 = vsel %vm2037_vm9, %v7920_v5, 0.0 }
 0x1f3   : > { %v2058_v23 = vsel %vm2038_vm11, %v7920_v5, 0.0  ;;  %v2059_v47 = vsel %vm2039_vm14, %v7920_v5, 0.0  ;;  %v2060_v37 = vsel %vm2040_vm0, %v7920_v5, 0.0  ;;  %v2061_v7 = vsel %vm2041_vm3, %v7920_v5, 0.0 }
 0x1f4   : > { %v2062_v8 = vsel %vm2042_vm4, %v7920_v5, 0.0  ;;  %v2063_v41 = vsel %vm2043_vm5, %v7920_v5, 0.0  ;;  %v2064_v10 = vsel %vm2044_vm6, %v7920_v5, 0.0  ;;  %v2065_v58 = vadd.f32 %v2049_v39, %v2009_v43  ;;  %v7924_v43 = vld [vmem:[#allocation38_spill] sm:$0xff]  ;;  %v7936_v39 = vld [vmem:[#allocation44_spill] sm:$0xff] }
 0x1f5   : > { %v2066_v60 = vadd.f32 %v2050_v28, %v2010_v0  ;;  %v2067_v45 = vadd.f32 %v2051_v38, %v2011_v1  ;;  %v2068_v59 = vadd.f32 %v2052_v53, %v2012_v6  ;;  %v2069_v33 = vadd.f32 %v2053_v12, %v2013_v61  ;;  %v7925_v0 = vld [vmem:[#allocation39_spill] sm:$0xff]  ;;  %v7926_v1 = vld [vmem:[#allocation40_spill] sm:$0xff]  ;;  %v7927_v6 = vld [vmem:[#allocation41_spill] sm:$0xff] }
 0x1f6   : > { %v2070_v57 = vadd.f32 %v2054_v51, %v2014_v62  ;;  %v2071_v3 = vadd.f32 %v2055_v52, %v2015_v63  ;;  %v2072_v44 = vadd.f32 %v2056_v20, %v2016_v54  ;;  %v2073_v4 = vadd.f32 %v2057_v46, %v2017_v56  ;;  %v7928_v61 = vld [vmem:[#allocation33_spill] sm:$0xff]  ;;  %v7930_v54 = vld [vmem:[#allocation42_spill] sm:$0xff] }
 0x1f7   : > { %v2074_v42 = vadd.f32 %v2058_v23, %v2018_v24  ;;  %v2075_v36 = vadd.f32 %v2059_v47, %v2019_v9  ;;  %v2076_v27 = vadd.f32 %v2060_v37, %v2020_v40  ;;  %v2077_v30 = vadd.f32 %v2061_v7, %v2021_v49  ;;  %v7933_v9 = vld [vmem:[#allocation43_spill] sm:$0xff] }
 0x1f8   : > { %v2078_v34 = vadd.f32 %v2062_v8, %v2022_v50  ;;  %v2079_v48 = vadd.f32 %v2063_v41, %v2023_v11  ;;  %v2080_v35 = vadd.f32 %v2064_v10, %v2024_v26  ;;  %vm2085_vm10 = vcmp.eq.s32.totalorder %v4087_v2, %v7921_v29  ;;  %v7923_v26 = vld [vmem:[#allocation34_spill] sm:$0xff] }
 0x1f9   : > { %vm2086_vm12 = vcmp.eq.s32.totalorder %v4101_v13, %v7921_v29  ;;  %vm2087_vm13 = vcmp.eq.s32.totalorder %v4104_v14, %v7921_v29  ;;  %vm2088_vm15 = vcmp.eq.s32.totalorder %v4107_v15, %v7921_v29  ;;  %vm2089_vm1 = vcmp.eq.s32.totalorder %v4110_v16, %v7921_v29 }
 0x1fa   : > { %vm2090_vm2 = vcmp.eq.s32.totalorder %v4113_v17, %v7921_v29  ;;  %vm2091_vm7 = vcmp.eq.s32.totalorder %v4116_v18, %v7921_v29  ;;  %vm2092_vm8 = vcmp.eq.s32.totalorder %v4119_v19, %v7921_v29  ;;  %vm2093_vm9 = vcmp.eq.s32.totalorder %v4125_v21, %v7921_v29 }
 0x1fb   : > { %v2104_v11 = vrot.slane %v7923_v26, %v7922_v32  ;;  %vm2094_vm11 = vcmp.eq.s32.totalorder %v4128_v22, %v7921_v29  ;;  %vm2095_vm14 = vcmp.eq.s32.totalorder %v4137_v25, %v7921_v29  ;;  %vm2096_vm0 = vcmp.eq.s32.totalorder %v7883_v55, %v7921_v29 }
 0x1fc   : > { %vm2097_vm3 = vcmp.eq.s32.totalorder %v7924_v43, %v7921_v29  ;;  %vm2098_vm4 = vcmp.eq.s32.totalorder %v7925_v0, %v7921_v29  ;;  %vm2099_vm5 = vcmp.eq.s32.totalorder %v7926_v1, %v7921_v29  ;;  %vm2100_vm6 = vcmp.eq.s32.totalorder %v4154_v31, %v7921_v29  ;;  %v7938_v29 = vld [vmem:[#allocation38_spill] sm:$0xff] }
 0x1fd   : > { %v6726_v62 = vrot.slane %v7928_v61, %v7927_v6  ;;  %v6730_v63 = vrot.slane %v7923_v26, %v7927_v6  ;;  %v6734_v56 = vrot.slane %v7928_v61, %v7930_v54  ;;  %v6738_v24 = vrot.slane %v7923_v26, %v7930_v54 }
 0x1fe   : > { %v6742_v40 = vrot.slane %v7928_v61, %v7933_v9  ;;  %v2105_v49 = vsel %vm2085_vm10, %v2104_v11, 0.0  ;;  %v2106_v50 = vsel %vm2086_vm12, %v2104_v11, 0.0  ;;  %v6752_v5 = vrot.slane %v7923_v26, %v7933_v9 }
 0x1ff   : > { %7929 = vst [vmem:[#allocation29_spill] sm:$0xff] %v6730_v63  ;;  %7931 = vst [vmem:[#allocation31_spill] sm:$0xff] %v6734_v56  ;;  %v6756_v28 = vrot.slane %v7928_v61, %v7936_v39  ;;  %v2107_v38 = vsel %vm2087_vm13, %v2104_v11, 0.0  ;;  %v2108_v53 = vsel %vm2088_vm15, %v2104_v11, 0.0  ;;  %v2109_v12 = vsel %vm2089_vm1, %v2104_v11, 0.0 }
 0x200   : > { %7932 = vst [vmem:[#allocation32_spill] sm:$0xff] %v6738_v24  ;;  %7934 = vst [vmem:[#allocation35_spill] sm:$0xff] %v6742_v40  ;;  %v2110_v51 = vsel %vm2090_vm2, %v2104_v11, 0.0  ;;  %v2111_v52 = vsel %vm2091_vm7, %v2104_v11, 0.0  ;;  %v2112_v20 = vsel %vm2092_vm8, %v2104_v11, 0.0  ;;  %v2113_v46 = vsel %vm2093_vm9, %v2104_v11, 0.0 }
 0x201   : > { %7935 = vst [vmem:[#allocation47_spill] sm:$0xff] %v6752_v5  ;;  %7937 = vst [vmem:[#allocation48_spill] sm:$0xff] %v6756_v28  ;;  %v2114_v23 = vsel %vm2094_vm11, %v2104_v11, 0.0  ;;  %v2115_v47 = vsel %vm2095_vm14, %v2104_v11, 0.0  ;;  %v2116_v37 = vsel %vm2096_vm0, %v2104_v11, 0.0  ;;  %v2117_v7 = vsel %vm2097_vm3, %v2104_v11, 0.0 }
 0x202   : > { %v2118_v8 = vsel %vm2098_vm4, %v2104_v11, 0.0  ;;  %v2119_v41 = vsel %vm2099_vm5, %v2104_v11, 0.0  ;;  %v2120_v10 = vsel %vm2100_vm6, %v2104_v11, 0.0  ;;  %v2121_v32 = vadd.f32 %v2105_v49, %v2065_v58 }
 0x203   : > { %v2122_v6 = vadd.f32 %v2106_v50, %v2066_v60  ;;  %v2123_v54 = vadd.f32 %v2107_v38, %v2067_v45  ;;  %v2124_v9 = vadd.f32 %v2108_v53, %v2068_v59  ;;  %v2125_v61 = vadd.f32 %v2109_v12, %v2069_v33 }
 0x204   : > { %v2126_v26 = vadd.f32 %v2110_v51, %v2070_v57  ;;  %v2127_v39 = vadd.f32 %v2111_v52, %v2071_v3  ;;  %v2128_v28 = vadd.f32 %v2112_v20, %v2072_v44  ;;  %v2129_v5 = vadd.f32 %v2113_v46, %v2073_v4 }
 0x205   : > { %v2130_v40 = vadd.f32 %v2114_v23, %v2074_v42  ;;  %v2131_v24 = vadd.f32 %v2115_v47, %v2075_v36  ;;  %v2132_v56 = vadd.f32 %v2116_v37, %v2076_v27  ;;  %v2133_v63 = vadd.f32 %v2117_v7, %v2077_v30 }
 0x206   : > { %v2134_v0 = vadd.f32 %v2118_v8, %v2078_v34  ;;  %v2135_v1 = vadd.f32 %v2119_v41, %v2079_v48  ;;  %v2136_v43 = vadd.f32 %v2120_v10, %v2080_v35  ;;  %vm2141_vm10 = vcmp.eq.s32.totalorder %v4087_v2, %v6726_v62  ;;  %v7939_v35 = vld [vmem:[#allocation39_spill] sm:$0xff]  ;;  %v7940_v48 = vld [vmem:[#allocation40_spill] sm:$0xff]  ;;  %v7941_v58 = vld [vmem:[#allocation29_spill] sm:$0xff] }
 0x207   : > { %vm2142_vm12 = vcmp.eq.s32.totalorder %v4101_v13, %v6726_v62  ;;  %vm2143_vm13 = vcmp.eq.s32.totalorder %v4104_v14, %v6726_v62  ;;  %vm2144_vm15 = vcmp.eq.s32.totalorder %v4107_v15, %v6726_v62  ;;  %vm2145_vm1 = vcmp.eq.s32.totalorder %v4110_v16, %v6726_v62 }
 0x208   : > { %vm2146_vm2 = vcmp.eq.s32.totalorder %v4113_v17, %v6726_v62  ;;  %vm2147_vm7 = vcmp.eq.s32.totalorder %v4116_v18, %v6726_v62  ;;  %vm2148_vm8 = vcmp.eq.s32.totalorder %v4119_v19, %v6726_v62  ;;  %vm2149_vm9 = vcmp.eq.s32.totalorder %v4125_v21, %v6726_v62 }
 0x209   : > { %vm2150_vm11 = vcmp.eq.s32.totalorder %v4128_v22, %v6726_v62  ;;  %vm2151_vm14 = vcmp.eq.s32.totalorder %v4137_v25, %v6726_v62  ;;  %vm2152_vm0 = vcmp.eq.s32.totalorder %v7883_v55, %v6726_v62  ;;  %vm2153_vm3 = vcmp.eq.s32.totalorder %v7938_v29, %v6726_v62  ;;  %v7942_v29 = vld [vmem:[#allocation31_spill] sm:$0xff] }
 0x20a   : > { %vm2154_vm4 = vcmp.eq.s32.totalorder %v7939_v35, %v6726_v62  ;;  %vm2155_vm5 = vcmp.eq.s32.totalorder %v7940_v48, %v6726_v62  ;;  %vm2156_vm6 = vcmp.eq.s32.totalorder %v4154_v31, %v6726_v62  ;;  %v2161_v60 = vsel %vm2141_vm10, %v7941_v58, 0.0 }
 0x20b   : > { %v2162_v45 = vsel %vm2142_vm12, %v7941_v58, 0.0  ;;  %v2163_v59 = vsel %vm2143_vm13, %v7941_v58, 0.0  ;;  %v2164_v33 = vsel %vm2144_vm15, %v7941_v58, 0.0  ;;  %v2165_v57 = vsel %vm2145_vm1, %v7941_v58, 0.0 }
 0x20c   : > { %v2166_v3 = vsel %vm2146_vm2, %v7941_v58, 0.0  ;;  %v2167_v44 = vsel %vm2147_vm7, %v7941_v58, 0.0  ;;  %v2168_v4 = vsel %vm2148_vm8, %v7941_v58, 0.0  ;;  %v2169_v42 = vsel %vm2149_vm9, %v7941_v58, 0.0 }
 0x20d   : > { %v2170_v36 = vsel %vm2150_vm11, %v7941_v58, 0.0  ;;  %v2171_v27 = vsel %vm2151_vm14, %v7941_v58, 0.0  ;;  %v2172_v30 = vsel %vm2152_vm0, %v7941_v58, 0.0  ;;  %v2173_v34 = vsel %vm2153_vm3, %v7941_v58, 0.0 }
 0x20e   : > { %v2174_v11 = vsel %vm2154_vm4, %v7941_v58, 0.0  ;;  %v2175_v49 = vsel %vm2155_vm5, %v7941_v58, 0.0  ;;  %v2176_v50 = vsel %vm2156_vm6, %v7941_v58, 0.0  ;;  %v2177_v38 = vadd.f32 %v2161_v60, %v2121_v32 }
 0x20f   : > { %v2178_v53 = vadd.f32 %v2162_v45, %v2122_v6  ;;  %v2179_v12 = vadd.f32 %v2163_v59, %v2123_v54  ;;  %v2180_v51 = vadd.f32 %v2164_v33, %v2124_v9  ;;  %v2181_v52 = vadd.f32 %v2165_v57, %v2125_v61 }
 0x210   : > { %v2182_v20 = vadd.f32 %v2166_v3, %v2126_v26  ;;  %v2183_v46 = vadd.f32 %v2167_v44, %v2127_v39  ;;  %v2184_v23 = vadd.f32 %v2168_v4, %v2128_v28  ;;  %v2185_v47 = vadd.f32 %v2169_v42, %v2129_v5  ;;  %v7943_v26 = vld [vmem:[#allocation38_spill] sm:$0xff] }
 0x211   : > { %v2186_v37 = vadd.f32 %v2170_v36, %v2130_v40  ;;  %v2187_v7 = vadd.f32 %v2171_v27, %v2131_v24  ;;  %v2188_v8 = vadd.f32 %v2172_v30, %v2132_v56  ;;  %v2189_v41 = vadd.f32 %v2173_v34, %v2133_v63 }
 0x212   : > { %v2190_v10 = vadd.f32 %v2174_v11, %v2134_v0  ;;  %v2191_v48 = vadd.f32 %v2175_v49, %v2135_v1  ;;  %v2192_v35 = vadd.f32 %v2176_v50, %v2136_v43  ;;  %vm2197_vm10 = vcmp.eq.s32.totalorder %v4087_v2, %v7942_v29  ;;  %v7944_v43 = vld [vmem:[#allocation39_spill] sm:$0xff]  ;;  %v7945_v0 = vld [vmem:[#allocation40_spill] sm:$0xff] }
 0x213   : > { %vm2198_vm12 = vcmp.eq.s32.totalorder %v4101_v13, %v7942_v29  ;;  %vm2199_vm13 = vcmp.eq.s32.totalorder %v4104_v14, %v7942_v29  ;;  %vm2200_vm15 = vcmp.eq.s32.totalorder %v4107_v15, %v7942_v29  ;;  %vm2201_vm1 = vcmp.eq.s32.totalorder %v4110_v16, %v7942_v29  ;;  %v7946_v1 = vld [vmem:[#allocation32_spill] sm:$0xff] }
 0x214   : > { %vm2202_vm2 = vcmp.eq.s32.totalorder %v4113_v17, %v7942_v29  ;;  %vm2203_vm7 = vcmp.eq.s32.totalorder %v4116_v18, %v7942_v29  ;;  %vm2204_vm8 = vcmp.eq.s32.totalorder %v4119_v19, %v7942_v29  ;;  %vm2205_vm9 = vcmp.eq.s32.totalorder %v4125_v21, %v7942_v29 }
 0x215   : > { %vm2206_vm11 = vcmp.eq.s32.totalorder %v4128_v22, %v7942_v29  ;;  %vm2207_vm14 = vcmp.eq.s32.totalorder %v4137_v25, %v7942_v29  ;;  %vm2208_vm0 = vcmp.eq.s32.totalorder %v7883_v55, %v7942_v29  ;;  %vm2209_vm3 = vcmp.eq.s32.totalorder %v7943_v26, %v7942_v29 }
 0x216   : > { %vm2210_vm4 = vcmp.eq.s32.totalorder %v7944_v43, %v7942_v29  ;;  %vm2211_vm5 = vcmp.eq.s32.totalorder %v7945_v0, %v7942_v29  ;;  %vm2212_vm6 = vcmp.eq.s32.totalorder %v4154_v31, %v7942_v29  ;;  %v2217_v61 = vsel %vm2197_vm10, %v7946_v1, 0.0 }
 0x217   : > { %v2218_v62 = vsel %vm2198_vm12, %v7946_v1, 0.0  ;;  %v2219_v63 = vsel %vm2199_vm13, %v7946_v1, 0.0  ;;  %v2220_v56 = vsel %vm2200_vm15, %v7946_v1, 0.0  ;;  %v2221_v24 = vsel %vm2201_vm1, %v7946_v1, 0.0 }
 0x218   : > { %v2222_v40 = vsel %vm2202_vm2, %v7946_v1, 0.0  ;;  %v2223_v5 = vsel %vm2203_vm7, %v7946_v1, 0.0  ;;  %v2224_v39 = vsel %vm2204_vm8, %v7946_v1, 0.0  ;;  %v2225_v28 = vsel %vm2205_vm9, %v7946_v1, 0.0 }
 0x219   : > { %v2226_v32 = vsel %vm2206_vm11, %v7946_v1, 0.0  ;;  %v2227_v6 = vsel %vm2207_vm14, %v7946_v1, 0.0  ;;  %v2228_v54 = vsel %vm2208_vm0, %v7946_v1, 0.0  ;;  %v2229_v9 = vsel %vm2209_vm3, %v7946_v1, 0.0 }
 0x21a   : > { %v2230_v58 = vsel %vm2210_vm4, %v7946_v1, 0.0  ;;  %v2231_v60 = vsel %vm2211_vm5, %v7946_v1, 0.0  ;;  %v2232_v45 = vsel %vm2212_vm6, %v7946_v1, 0.0  ;;  %v2233_v59 = vadd.f32 %v2217_v61, %v2177_v38 }
 0x21b   : > { %v2234_v33 = vadd.f32 %v2218_v62, %v2178_v53  ;;  %v2235_v57 = vadd.f32 %v2219_v63, %v2179_v12  ;;  %v2236_v3 = vadd.f32 %v2220_v56, %v2180_v51  ;;  %v2237_v44 = vadd.f32 %v2221_v24, %v2181_v52  ;;  %v7947_v53 = vld [vmem:[#allocation35_spill] sm:$0xff]  ;;  %v7949_v62 = vld [vmem:[#allocation48_spill] sm:$0xff]  ;;  %v7951_v56 = vld [vmem:[#allocation34_spill] sm:$0xff] }
 0x21c   : > { %v2238_v4 = vadd.f32 %v2222_v40, %v2182_v20  ;;  %v2239_v42 = vadd.f32 %v2223_v5, %v2183_v46  ;;  %v6992_v36 = vadd.f32 %v2224_v39, %v2184_v23  ;;  %v6994_v27 = vadd.f32 %v2225_v28, %v2185_v47  ;;  %v7950_v63 = vld [vmem:[#allocation44_spill] sm:$0xff]  ;;  %v7952_v40 = vld [vmem:[#allocation45_spill] sm:$0xff] }
 0x21d   : > { %v6996_v30 = vadd.f32 %v2226_v32, %v2186_v37  ;;  %v6998_v34 = vadd.f32 %v2227_v6, %v2187_v7  ;;  %v7000_v11 = vadd.f32 %v2228_v54, %v2188_v8  ;;  %v7002_v49 = vadd.f32 %v2229_v9, %v2189_v41  ;;  %v7953_v5 = vld [vmem:[#allocation33_spill] sm:$0xff] }
 0x21e   : > { %v7004_v29 = vadd.f32 %v2230_v58, %v2190_v10  ;;  %v7006_v50 = vadd.f32 %v2231_v60, %v2191_v48  ;;  %v7008_v38 = vadd.f32 %v2232_v45, %v2192_v35  ;;  %vm2253_vm10 = vcmp.eq.s32.totalorder %v4087_v2, %v7947_v53  ;;  %v7948_v35 = vld [vmem:[#allocation47_spill] sm:$0xff] }
 0x21f   : > { %vm2254_vm12 = vcmp.eq.s32.totalorder %v4101_v13, %v7947_v53  ;;  %vm2255_vm13 = vcmp.eq.s32.totalorder %v4104_v14, %v7947_v53  ;;  %vm2256_vm15 = vcmp.eq.s32.totalorder %v4107_v15, %v7947_v53  ;;  %vm2257_vm1 = vcmp.eq.s32.totalorder %v4110_v16, %v7947_v53 }
 0x220   : > { %vm2258_vm2 = vcmp.eq.s32.totalorder %v4113_v17, %v7947_v53  ;;  %vm2259_vm7 = vcmp.eq.s32.totalorder %v4116_v18, %v7947_v53  ;;  %vm2260_vm8 = vcmp.eq.s32.totalorder %v4119_v19, %v7947_v53  ;;  %vm2261_vm9 = vcmp.eq.s32.totalorder %v4125_v21, %v7947_v53 }
 0x221   : > { %vm2262_vm11 = vcmp.eq.s32.totalorder %v4128_v22, %v7947_v53  ;;  %vm2263_vm14 = vcmp.eq.s32.totalorder %v4137_v25, %v7947_v53  ;;  %vm2264_vm0 = vcmp.eq.s32.totalorder %v7883_v55, %v7947_v53  ;;  %vm2265_vm3 = vcmp.eq.s32.totalorder %v7943_v26, %v7947_v53 }
 0x222   : > { %v2273_v48 = vsel %vm2253_vm10, %v7948_v35, 0.0  ;;  %v2274_v12 = vsel %vm2254_vm12, %v7948_v35, 0.0  ;;  %v2275_v51 = vsel %vm2255_vm13, %v7948_v35, 0.0  ;;  %v2276_v52 = vsel %vm2256_vm15, %v7948_v35, 0.0 }
 0x223   : > { %v2277_v20 = vsel %vm2257_vm1, %v7948_v35, 0.0  ;;  %v2278_v46 = vsel %vm2258_vm2, %v7948_v35, 0.0  ;;  %v2279_v23 = vsel %vm2259_vm7, %v7948_v35, 0.0  ;;  %v2280_v47 = vsel %vm2260_vm8, %v7948_v35, 0.0 }
 0x224   : > { %v2281_v37 = vsel %vm2261_vm9, %v7948_v35, 0.0  ;;  %v2282_v7 = vsel %vm2262_vm11, %v7948_v35, 0.0  ;;  %v7047_v8 = vsel %vm2263_vm14, %v7948_v35, 0.0  ;;  %v7050_v41 = vsel %vm2264_vm0, %v7948_v35, 0.0 }
 0x225   : > { %v7053_v10 = vsel %vm2265_vm3, %v7948_v35, 0.0  ;;  %v2289_v1 = vadd.f32 %v2273_v48, %v2233_v59  ;;  %v2290_v61 = vadd.f32 %v2274_v12, %v2234_v33  ;;  %vm2309_vm4 = vcmp.eq.s32.totalorder %v4087_v2, %v7949_v62 }
 0x226   : > { %v7059_v24 = vrot.slane %v7951_v56, %v7950_v63  ;;  %vm2266_vm5 = vcmp.eq.s32.totalorder %v7944_v43, %v7947_v53  ;;  %vm2310_vm6 = vcmp.eq.s32.totalorder %v4101_v13, %v7949_v62  ;;  %vm2311_vm10 = vcmp.eq.s32.totalorder %v4104_v14, %v7949_v62 }
 0x227   : > { %vm2312_vm12 = vcmp.eq.s32.totalorder %v4107_v15, %v7949_v62  ;;  %v7071_v39 = vrot.slane %v7953_v5, %v7952_v40  ;;  %v2291_v28 = vadd.f32 %v2275_v51, %v2235_v57  ;;  %v2292_v32 = vadd.f32 %v2276_v52, %v2236_v3 }
 0x228   : > { %v2293_v6 = vadd.f32 %v2277_v20, %v2237_v44  ;;  %v2294_v54 = vadd.f32 %v2278_v46, %v2238_v4  ;;  %v2295_v9 = vadd.f32 %v2279_v23, %v2239_v42  ;;  %vm2313_vm13 = vcmp.eq.s32.totalorder %v4110_v16, %v7949_v62 }
 0x229   : > { %vm2314_vm15 = vcmp.eq.s32.totalorder %v4113_v17, %v7949_v62  ;;  %v7079_v58 = vrot.slane %v7951_v56, %v7952_v40  ;;  %v2329_v60 = vsel %vm2309_vm4, %v7059_v24, 0.0  ;;  %v2330_v45 = vsel %vm2310_vm6, %v7059_v24, 0.0 }
 0x22a   : > { %v2331_v59 = vsel %vm2311_vm10, %v7059_v24, 0.0  ;;  %v2332_v33 = vsel %vm2312_vm12, %v7059_v24, 0.0  ;;  %vm2267_vm1 = vcmp.eq.s32.totalorder %v7945_v0, %v7947_v53  ;;  %vm2365_vm2 = vcmp.eq.s32.totalorder %v4087_v2, %v7071_v39 }
 0x22b   : > { %vm2366_vm7 = vcmp.eq.s32.totalorder %v4101_v13, %v7071_v39  ;;  %vm2367_vm8 = vcmp.eq.s32.totalorder %v4104_v14, %v7071_v39  ;;  %vm2368_vm9 = vcmp.eq.s32.totalorder %v4107_v15, %v7071_v39  ;;  %vm2315_vm11 = vcmp.eq.s32.totalorder %v4116_v18, %v7949_v62 }
 0x22c   : > { %vm2316_vm14 = vcmp.eq.s32.totalorder %v4119_v19, %v7949_v62  ;;  %v2333_v57 = vsel %vm2313_vm13, %v7059_v24, 0.0  ;;  %v2334_v3 = vsel %vm2314_vm15, %v7059_v24, 0.0  ;;  %v2345_v2 = vadd.f32 %v2329_v60, %v2289_v1 }
 0x22d   : > { %v2346_v44 = vadd.f32 %v2330_v45, %v2290_v61  ;;  %v2347_v4 = vadd.f32 %v2331_v59, %v2291_v28  ;;  %v2348_v13 = vadd.f32 %v2332_v33, %v2292_v32  ;;  %v2385_v42 = vsel %vm2365_vm2, %v7079_v58, 0.0 }
 0x22e   : > { %v2386_v14 = vsel %vm2366_vm7, %v7079_v58, 0.0  ;;  %v2387_v15 = vsel %vm2367_vm8, %v7079_v58, 0.0  ;;  %v2388_v48 = vsel %vm2368_vm9, %v7079_v58, 0.0  ;;  %vm2268_vm0 = vcmp.eq.s32.totalorder %v4154_v31, %v7947_v53 }
 0x22f   : > { %v2296_v12 = vadd.f32 %v2280_v47, %v6992_v36  ;;  %vm2317_vm3 = vcmp.eq.s32.totalorder %v4125_v21, %v7949_v62  ;;  %vm2369_vm4 = vcmp.eq.s32.totalorder %v4110_v16, %v7071_v39  ;;  %vm2370_vm6 = vcmp.eq.s32.totalorder %v4113_v17, %v7071_v39 }
 0x230   : > { %v2335_v51 = vsel %vm2315_vm11, %v7059_v24, 0.0  ;;  %v2336_v52 = vsel %vm2316_vm14, %v7059_v24, 0.0  ;;  %v2349_v36 = vadd.f32 %v2333_v57, %v2293_v6  ;;  %v2350_v20 = vadd.f32 %v2334_v3, %v2294_v54 }
 0x231   : > { %v2401_v46 = vadd.f32 %v2385_v42, %v2345_v2  ;;  %v2402_v23 = vadd.f32 %v2386_v14, %v2346_v44  ;;  %v2403_v47 = vadd.f32 %v2387_v15, %v2347_v4  ;;  %v2404_v1 = vadd.f32 %v2388_v48, %v2348_v13 }
 0x232   : > { %v2286_v16 = vsel %vm2266_vm5, %v7948_v35, 0.0  ;;  %v2297_v17 = vadd.f32 %v2281_v37, %v6994_v27  ;;  %v2389_v61 = vsel %vm2369_vm4, %v7079_v58, 0.0  ;;  %v2390_v63 = vsel %vm2370_vm6, %v7079_v58, 0.0 }
 0x233   : > { %v2298_v56 = vadd.f32 %v2282_v7, %v6996_v30  ;;  %vm2318_vm10 = vcmp.eq.s32.totalorder %v4128_v22, %v7949_v62  ;;  %vm2371_vm12 = vcmp.eq.s32.totalorder %v4116_v18, %v7071_v39  ;;  %vm2372_vm13 = vcmp.eq.s32.totalorder %v4119_v19, %v7071_v39 }
 0x234   : > { %vm2319_vm5 = vcmp.eq.s32.totalorder %v4137_v25, %v7949_v62  ;;  %v2337_v27 = vsel %vm2317_vm3, %v7059_v24, 0.0  ;;  %v2351_v37 = vadd.f32 %v2335_v51, %v2295_v9  ;;  %v2352_v40 = vadd.f32 %v2336_v52, %v2296_v12 }
 0x235   : > { %v2405_v30 = vadd.f32 %v2389_v61, %v2349_v36  ;;  %v2406_v7 = vadd.f32 %v2390_v63, %v2350_v20  ;;  %v2425_v5 = vpack.c.bf16 %v2402_v23, %v2401_v46  ;;  %v2426_v28 = vpack.c.bf16 %v2404_v1, %v2403_v47  ;;  %v2417_v1 = vld [vmem:[#allocation2] sm:$0xff]  ;;  %v2418_v61 = vld [vmem:[#allocation2 + $0x8] sm:$0xff] }
 0x236   : > { %v2287_v18 = vsel %vm2267_vm1, %v7948_v35, 0.0  ;;  %v2338_v19 = vsel %vm2318_vm10, %v7059_v24, 0.0  ;;  %v2391_v32 = vsel %vm2371_vm12, %v7079_v58, 0.0  ;;  %v2392_v6 = vsel %vm2372_vm13, %v7079_v58, 0.0 }
 0x237   : > { %v2299_v54 = vadd.f32 %v7047_v8, %v6998_v34  ;;  %vm2320_vm15 = vcmp.eq.s32.totalorder %v7883_v55, %v7949_v62  ;;  %vm2373_vm2 = vcmp.eq.s32.totalorder %v4125_v21, %v7071_v39  ;;  %vm2374_vm7 = vcmp.eq.s32.totalorder %v4128_v22, %v7071_v39  ;;  %3235 = vmatprep.subr.bf16.mxu0 %v2425_v5 }
 0x238   : > { %v2300_v9 = vadd.f32 %v7050_v41, %v7000_v11  ;;  %vm2321_vm1 = vcmp.eq.s32.totalorder %v7943_v26, %v7949_v62  ;;  %v2339_v34 = vsel %vm2319_vm5, %v7059_v24, 0.0  ;;  %v2353_v8 = vadd.f32 %v2337_v27, %v2297_v17  ;;  %3236 = vmatpush3.bf16.msra.mxu0 %v2425_v5  ;;  %v2517_v5 = vld [vmem:[%s4071_s17] sm:$0x3] (!%p7215_p12) }
 0x239   : > { %v2354_v60 = vadd.f32 %v2338_v19, %v2298_v56  ;;  %v2407_v45 = vadd.f32 %v2391_v32, %v2351_v37  ;;  %v2408_v21 = vadd.f32 %v2392_v6, %v2352_v40  ;;  %v2427_v59 = vpack.c.bf16 %v2406_v7, %v2405_v30  ;;  %3237 = vmatprep.subr.bf16.mxu0 %v2426_v28  ;;  %v2511_v19 = vld [vmem:[%s7958_s7 + $0x10] sm:$0xff] (!%p7215_p12)  ;;  %v2518_v6 = vld [vmem:[%s7959_s27] sm:$0xff] (!%p7215_p12) }
 0x23a   : > { %v2288_v22 = vsel %vm2268_vm0, %v7948_v35, 0.0  ;;  %v2340_v11 = vsel %vm2320_vm15, %v7059_v24, 0.0  ;;  %v2393_v41 = vsel %vm2373_vm2, %v7079_v58, 0.0  ;;  %v2394_v33 = vsel %vm2374_vm7, %v7079_v58, 0.0 }
 0x23b   : > { %v2301_v57 = vadd.f32 %v7053_v10, %v7002_v49  ;;  %vm2322_vm8 = vcmp.eq.s32.totalorder %v7944_v43, %v7949_v62  ;;  %vm2375_vm9 = vcmp.eq.s32.totalorder %v4137_v25, %v7071_v39  ;;  %vm2376_vm11 = vcmp.eq.s32.totalorder %v7883_v55, %v7071_v39 }
 0x23c   : > { %v2302_v53 = vadd.f32 %v2286_v16, %v7004_v29  ;;  %vm2323_vm14 = vcmp.eq.s32.totalorder %v7945_v0, %v7949_v62  ;;  %v2341_v35 = vsel %vm2321_vm1, %v7059_v24, 0.0  ;;  %v2355_v49 = vadd.f32 %v2339_v34, %v2299_v54  ;;  %3238 = vmatpush3.bf16.msra.mxu0 %v2426_v28  ;;  %v2420_v16 = vld [vmem:[#allocation2 + $0x18] sm:$0xff]  ;;  %v2509_v28 = vld [vmem:[%s7957_s23] sm:$0xff] (!%p7215_p12)  ;;  %v2520_v54 = vld [vmem:[%s7960_s0 + $0x10] sm:$0xff] (!%p7215_p12) }
 0x23d   : > { %v2356_v10 = vadd.f32 %v2340_v11, %v2300_v9  ;;  %v2409_v3 = vadd.f32 %v2393_v41, %v2353_v8  ;;  %v2410_v2 = vadd.f32 %v2394_v33, %v2354_v60  ;;  %v2428_v44 = vpack.c.bf16 %v2408_v21, %v2407_v45  ;;  %3239 = vmatprep.subr.bf16.mxu0 %v2427_v59  ;;  %v2512_v9 = vld [vmem:[%s7958_s7 + $0x18] sm:$0xff] (!%p7215_p12)  ;;  %v2513_v34 = vld [vmem:[%s7958_s7 + $0x20] sm:$0xff] (!%p7215_p12)  ;;  %v2519_v8 = vld [vmem:[%s7960_s0 + $0x8] sm:$0xff] (!%p7215_p12) }
 0x23e   : > { %v2342_v25 = vsel %vm2322_vm8, %v7059_v24, 0.0  ;;  %v2395_v55 = vsel %vm2375_vm9, %v7079_v58, 0.0  ;;  %v2396_v29 = vsel %vm2376_vm11, %v7079_v58, 0.0  ;;  %vm2324_vm0 = vcmp.eq.s32.totalorder %v4154_v31, %v7949_v62  ;;  %v2521_v60 = vld [vmem:[%s7960_s0 + $0x18] sm:$0xff] (!%p7215_p12)  ;;  %v2514_v45 = vld [vmem:[%s7958_s7 + $0x28] sm:$0xff] (!%p7215_p12)  ;;  %v2515_v21 = vld [vmem:[%s7958_s7 + $0x30] sm:$0xff] (!%p7215_p12) }
 0x23f   : > { %vm2377_vm3 = vcmp.eq.s32.totalorder %v7943_v26, %v7071_v39  ;;  %vm2378_vm4 = vcmp.eq.s32.totalorder %v7944_v43, %v7071_v39  ;;  %v2303_v4 = vadd.f32 %v2287_v18, %v7006_v50  ;;  %v2304_v13 = vadd.f32 %v2288_v22, %v7008_v38  ;;  %v2510_v18 = vld [vmem:[%s7958_s7 + $0x8] sm:$0xff] (!%p7215_p12)  ;;  %v2516_v11 = vld [vmem:[%s7958_s7 + $0x38] sm:$0xff] (!%p7215_p12)  ;;  %v2524_v41 = vld [vmem:[%s7960_s0 + $0x30] sm:$0xff] (!%p7215_p12) }
 0x240   : > { %v2343_v42 = vsel %vm2323_vm14, %v7059_v24, 0.0  ;;  %v2357_v14 = vadd.f32 %v2341_v35, %v2301_v57  ;;  %3240 = vmatpush3.bf16.msra.mxu0 %v2427_v59  ;;  %v2358_v15 = vadd.f32 %v2342_v25, %v2302_v53  ;;  %v2411_v48 = vadd.f32 %v2395_v55, %v2355_v49  ;;  %v2522_v59 = vld [vmem:[%s7960_s0 + $0x20] sm:$0xff] (!%p7215_p12)  ;;  %v2523_v22 = vld [vmem:[%s7960_s0 + $0x28] sm:$0xff] (!%p7215_p12)  ;;  %v2525_v33 = vld [vmem:[%s7960_s0 + $0x38] sm:$0xff] (!%p7215_p12) }
 0x241   : > { %v2412_v12 = vadd.f32 %v2396_v29, %v2356_v10  ;;  %v2429_v51 = vpack.c.bf16 %v2410_v2, %v2409_v3  ;;  %3241 = vmatprep.subr.bf16.mxu0 %v2428_v44  ;;  %v2344_v26 = vsel %vm2324_vm0, %v7059_v24, 0.0  ;;  %v2397_v43 = vsel %vm2377_vm3, %v7079_v58, 0.0  ;;  %v2712_v57 = vld [vmem:[%s7961_s2] sm:$0xff] (!%p7215_p12)  ;;  %v2713_v53 = vld [vmem:[%s7961_s2 + $0x8] sm:$0xff] (!%p7215_p12)  ;;  %v2714_v35 = vld [vmem:[%s7961_s2 + $0x10] sm:$0xff] (!%p7215_p12) }
 0x242   : > { %v2398_v50 = vsel %vm2378_vm4, %v7079_v58, 0.0  ;;  %vm2379_vm6 = vcmp.eq.s32.totalorder %v7945_v0, %v7071_v39  ;;  %vm2380_vm10 = vcmp.eq.s32.totalorder %v4154_v31, %v7071_v39  ;;  %v2359_v38 = vadd.f32 %v2343_v42, %v2303_v4  ;;  %v3471_v39 = vld [vmem:[%s7955_s12 + $0x8] sm:$0xff]   ;;  %v2715_v49 = vld [vmem:[%s7961_s2 + $0x18] sm:$0xff] (!%p7215_p12)  ;;  %v2892_v10 = vld [vmem:[%s7962_s20] sm:$0xff] (!%p7215_p12)  ;;  %s7966_s20 = sld [smem:[#allocation57_spill]] (!%p7215_p12) }
 0x243   : > { %v2360_v62 = vadd.f32 %v2344_v26, %v2304_v13  ;;  %v2413_v52 = vadd.f32 %v2397_v43, %v2357_v14  ;;  %v2414_v36 = vadd.f32 %v2398_v50, %v2358_v15  ;;  %v2430_v20 = vpack.c.bf16 %v2412_v12, %v2411_v48  ;;  %v2893_v3 = vld [vmem:[%s7963_s16 + $0x8] sm:$0xff] (!%p7215_p12)  ;;  %v2894_v2 = vld [vmem:[%s7963_s16 + $0x10] sm:$0xff] (!%p7215_p12)  ;;  %v2920_v25 = vld [vmem:[%s7964_s21] sm:$0xff] (!%p7215_p12) }
 0x244   : > { %3242 = vmatpush3.bf16.msra.mxu0 %v2428_v44  ;;  %v2399_v24 = vsel %vm2379_vm6, %v7079_v58, 0.0  ;;  %v2400_v46 = vsel %vm2380_vm10, %v7079_v58, 0.0  ;;  %v2419_v58 = vld [vmem:[#allocation2 + $0x10] sm:$0xff]  ;;  %vm2498_vm12 = vcmask 523264   ;;  %vm2591_vm13 = vcmask (!%p7215_p12), 1041408   ;;  %v2895_v44 = vld [vmem:[%s7963_s16 + $0x18] sm:$0xff] (!%p7215_p12) }
 0x245   : > { %3243 = vmatprep.subr.bf16.mxu0 %v2429_v51  ;;  %v2415_v23 = vadd.f32 %v2399_v24, %v2359_v38  ;;  %v2416_v0 = vadd.f32 %v2400_v46, %v2360_v62  ;;  %v2431_v47 = vpack.c.bf16 %v2414_v36, %v2413_v52  ;;  %vm2566_vm5 = vcmask (!%p7215_p12), 15360   ;;  %v2921_v55 = vld [vmem:[%s7965_s8 + $0x8] sm:$0xff] (!%p7215_p12)  ;;  %v2922_v29 = vld [vmem:[%s7965_s8 + $0x10] sm:$0xff] (!%p7215_p12)  ;;  %v2923_v4 = vld [vmem:[%s7965_s8 + $0x18] sm:$0xff] (!%p7215_p12) }
 0x246   : > { %v3711_v32 = vmov (!%p7215_p12), 0  }
 0x247   : > { %v2432_v31 = vpack.c.bf16 %v2416_v0, %v2415_v23  ;;  %3472 = vset.pattern.permute.xlu0 (!%p7215_p12), %v3711_v32  ;;  %3473 = vset.pattern.permute.xlu1 (!%p7215_p12), %v3711_v32 }
 0x248   : > { %3244 = vmatpush3.bf16.msra.mxu0 %v2429_v51  ;;  %2528 = vperm.xlu0 (!%p7215_p12), %3472, %v2518_v6   ;;  %s7967_s6 = smov (!%p7215_p12), %s7966_s20  ;;  %v2708_v13 = vld [vmem:[%s7966_s20] sm:$0xff] (!%p7215_p12) }
 0x249   : > { %3245 = vmatprep.subr.bf16.mxu0 %v2430_v20  ;;  %2538 = vperm.xlu1 (!%p7215_p12), %3473, %v2520_v54   ;;  %v2710_v42 = vld [vmem:[%s7967_s6 + $0x10] sm:$0xff] (!%p7215_p12)  ;;  %v2709_v32 = vld [vmem:[%s7967_s6 + $0x8] sm:$0xff] (!%p7215_p12)  ;;  %v2711_v6 = vld [vmem:[%s7967_s6 + $0x18] sm:$0xff] (!%p7215_p12) }
 0x24a   : > { %3288 = vmatprep.mubr.msk.f32.mxu1 (!%p7215_p12), %vm2498_vm12, %v2710_v42 }
 0x24c   : > { %3246 = vmatpush3.bf16.msra.mxu0 %v2430_v20  ;;  %2533 = vperm.xlu0 (!%p7215_p12), %3472, %v2519_v8  }
 0x24d   : > { %3247 = vmatprep.subr.bf16.mxu0 %v2431_v47  ;;  %2543 = vperm.xlu1 (!%p7215_p12), %3473, %v2521_v60  }
 0x250   : > { %3248 = vmatpush3.bf16.msra.mxu0 %v2431_v47  ;;  %2548 = vperm.xlu0 (!%p7215_p12), %3472, %v2522_v59  }
 0x251   : > { %3249 = vmatprep.subr.bf16.mxu0 %v2432_v31  ;;  %2553 = vperm.xlu1 (!%p7215_p12), %3473, %v2523_v22  }
 0x254   : > { %3250 = vmatpush3.bf16.msra.mxu0 %v2432_v31  ;;  %2558 = vperm.xlu0 (!%p7215_p12), %3472, %v2524_v41  }
 0x255   : > { %3255 = vmatprep.subr.msk.mxu0 (!%p7215_p12), %vm2591_vm13, %v2517_v5  ;;  %2563 = vperm.xlu1 (!%p7215_p12), %3473, %v2525_v33   ;;  %v2833_v33 = vld [vmem:[%s4076_s14] sm:$0xff] (!%p7215_p12) }
 0x257   : > { %3252 = vmatmul.mubr.bf16.vlgmr.msra.gmra.mrb[0].mxu0 %v3471_v39 }
 0x258   : > { %3257 = vmatprep.mubr.msk.f32.mxu0 (!%p7215_p12), %vm2566_vm5, %v2509_v28  ;;  %3256 = vmatpush3.msk.msra.mxu0 (!%p7215_p12), %vm2591_vm13, %v2517_v5 }
 0x259   : > { %2718 = vperm.xlu0 (!%p7215_p12), %3472, %v2712_v57   ;;  %2723 = vperm.xlu1 (!%p7215_p12), %3473, %v2713_v53   ;;  %v2835_v53 = vld [vmem:[%s4076_s14 + $0x10] sm:$0xff] (!%p7215_p12) }
 0x25d   : > { %2728 = vperm.xlu0 (!%p7215_p12), %3472, %v2714_v35   ;;  %2733 = vperm.xlu1 (!%p7215_p12), %3473, %v2715_v49  }
 0x261   : > { %2898 = vperm.xlu0 (!%p7215_p12), %3472, %v2892_v10   ;;  %2903 = vperm.xlu1 (!%p7215_p12), %3473, %v2893_v3  }
 0x265   : > { %2908 = vperm.xlu0 (!%p7215_p12), %3472, %v2894_v2   ;;  %2913 = vperm.xlu1 (!%p7215_p12), %3473, %v2895_v44  }
 0x269   : > { %2926 = vperm.xlu0 (!%p7215_p12), %3472, %v2920_v25   ;;  %2931 = vperm.xlu1 (!%p7215_p12), %3473, %v2921_v55  }
 0x26d   : > { %2936 = vperm.xlu0 (!%p7215_p12), %3472, %v2922_v29   ;;  %2941 = vperm.xlu1 (!%p7215_p12), %3473, %v2923_v4  }
 0x2c7   : > { %v2529_v14 = vpop.permute.xlu0 (!%p7215_p12), %2528 }
 0x2c8   : > { %v2539_v15 = vpop.permute.xlu1 (!%p7215_p12), %2538 }
 0x2cb   : > { %v2534_v48 = vpop.permute.xlu0 (!%p7215_p12), %2533 }
 0x2cc   : > { %v2544_v12 = vpop.permute.xlu1 (!%p7215_p12), %2543 }
 0x2cf   : > { %v2549_v0 = vpop.permute.xlu0 (!%p7215_p12), %2548 }
 0x2d0   : > { %v2554_v24 = vpop.permute.xlu1 (!%p7215_p12), %2553 }
 0x32a   : > { %v3253_v17 = vpop.f32.mrb[0].mxu0  ;;  %2508 = sbr.rel (%p7215_p12) target bundleno = 1332 (0x534), region = 80 }
 0x32b   : > { %v2479_v63 = vpop.f32.mrb[1].mxu0  ;;  %v2496_v56 = vadd.f32 %v3253_v17, %v2419_v58  ;;  %3258 = vmatmul.mubr.msk.f32.vlgmr.msra.gmra.mrb[0].mxu0 (!%p7215_p12), %vm2566_vm5, %v2510_v18 }
 0x32c   : > { %v3254_v27 = vpop.f32.mrb[2].mxu0  ;;  %v2494_v37 = vadd.f32 %v2479_v63, %v2417_v1  ;;  %3260 = vmatprep.mubr.msk.f32.mxu0 (!%p7215_p12), %vm2566_vm5, %v2511_v19  ;;  %v2564_v63 = vpop.permute.xlu1 (!%p7215_p12), %2563 }
 0x32d   : > { %v2482_v40 = vpop.f32.mrb[3].mxu0  ;;  %v2497_v30 = vadd.f32 %v3254_v27, %v2420_v16  ;;  %2501 = vst.msk [vmem:[#allocation2 + $0x10] sm:$0xff] %vm2498_vm12, %v2496_v56 }
 0x32e   : > { %v2495_v7 = vadd.f32 %v2482_v40, %v2418_v61  ;;  %2499 = vst.msk [vmem:[#allocation2] sm:$0xff] %vm2498_vm12, %v2494_v37  ;;  %v2559_v37 = vpop.permute.xlu0 (!%p7215_p12), %2558 }
 0x32f   : > { %2502 = vst.msk [vmem:[#allocation2 + $0x18] sm:$0xff] %vm2498_vm12, %v2497_v30  ;;  %3261 = vmatmul.mubr.msk.f32.gmra.mrb[2].mxu0 (!%p7215_p12), %vm2566_vm5, %v2512_v9 }
 0x330   : > { %2500 = vst.msk [vmem:[#allocation2 + $0x8] sm:$0xff] %vm2498_vm12, %v2495_v7  ;;  %3263 = vmatprep.mubr.msk.f32.mxu0 (!%p7215_p12), %vm2566_vm5, %v2513_v34  ;;  %v2724_v9 = vpop.permute.xlu1 (!%p7215_p12), %2723 }
 0x332   : > { %v2719_v54 = vpop.permute.xlu0 %2718 }
 0x333   : > { %3264 = vmatmul.mubr.msk.f32.gmra.mrb[4].mxu0 %vm2566_vm5, %v2514_v45  ;;  %v2834_v45 = vld [vmem:[%s4076_s14 + $0x8] sm:$0xff] }
 0x334   : > { %3266 = vmatprep.mubr.msk.f32.mxu0 %vm2566_vm5, %v2515_v21  ;;  %v2734_v8 = vpop.permute.xlu1 %2733  ;;  %v2843_v44 = vld [vmem:[#allocation2 + $0x10] sm:$0xff] }
 0x335   : > { %v2841_v2 = vld [vmem:[#allocation2] sm:$0xff] }
 0x336   : > { %v2729_v34 = vpop.permute.xlu0 %2728 }
 0x337   : > { %3267 = vmatmul.mubr.msk.f32.gmra.mrb[6].mxu0 %vm2566_vm5, %v2516_v11  ;;  %v2836_v11 = vld [vmem:[%s4076_s14 + $0x18] sm:$0xff]  ;;  %v2842_v35 = vld [vmem:[#allocation2 + $0x8] sm:$0xff] }
 0x338   : > { %3285 = vmatprep.mubr.msk.f32.mxu0 %vm2498_vm12, %v2708_v13  ;;  %v2844_v13 = vld [vmem:[#allocation2 + $0x18] sm:$0xff] }
 0x3fe   : > { %v3259_v51 = vpop.f32.mrb[0].mxu0 }
 0x3ff   : > { %v2667_v26 = vadd.f32 %v3259_v51, %v2534_v48  ;;  %v2661_v43 = vpop.f32.mrb[1].mxu0 }
 0x400   : > { %v2662_v50 = vadd.f32 %v2661_v43, %v2529_v14 }
 0x401   : > { %v2701_v38 = vmax.f32 %v2667_v26, 0.0 }
 0x402   : > { %v2700_v62 = vmax.f32 %v2662_v50, 0.0  ;;  %v3262_v52 = vpop.f32.mrb[2].mxu0 }
 0x403   : > { %v2677_v36 = vadd.f32 %v3262_v52, %v2544_v12  ;;  %v2671_v20 = vpop.f32.mrb[3].mxu0 }
 0x404   : > { %v3291_v46 = vpack.c.bf16 %v2701_v38, %v2700_v62  ;;  %v2672_v23 = vadd.f32 %v2671_v20, %v2539_v15 }
 0x405   : > { %v2703_v47 = vmax.f32 %v2677_v36, 0.0 }
 0x406   : > { %v2702_v31 = vmax.f32 %v2672_v23, 0.0  ;;  %v3265_v39 = vpop.f32.mrb[4].mxu0  ;;  %3292 = vmatprep.subr.bf16.mxu0 %v3291_v46  ;;  %3307 = vmatprep.subr.bf16.mxu1 %v3291_v46 }
 0x407   : > { %v2687_v58 = vadd.f32 %v3265_v39, %v2554_v24  ;;  %v2681_v1 = vpop.f32.mrb[5].mxu0  ;;  %3294 = vmatpush3.bf16.msra.mxu0 %v3291_v46  ;;  %3311 = vmatpush3.bf16.msra.mxu1 %v3291_v46 }
 0x408   : > { %v3295_v16 = vpack.c.bf16 %v2703_v47, %v2702_v31  ;;  %v2682_v17 = vadd.f32 %v2681_v1, %v2549_v0 }
 0x409   : > { %v2705_v61 = vmax.f32 %v2687_v58, 0.0 }
 0x40a   : > { %v2704_v56 = vmax.f32 %v2682_v17, 0.0  ;;  %v3268_v27 = vpop.f32.mrb[6].mxu0  ;;  %3296 = vmatprep.subr.bf16.mxu0 %v3295_v16  ;;  %3308 = vmatprep.subr.bf16.mxu1 %v3295_v16 }
 0x40b   : > { %v2697_v40 = vadd.f32 %v3268_v27, %v2564_v63  ;;  %v2691_v30 = vpop.f32.mrb[7].mxu0  ;;  %3298 = vmatpush3.bf16.msra.mxu0 %v3295_v16  ;;  %3312 = vmatpush3.bf16.msra.mxu1 %v3295_v16 }
 0x40c   : > { %v3299_v7 = vpack.c.bf16 %v2705_v61, %v2704_v56  ;;  %v2692_v5 = vadd.f32 %v2691_v30, %v2559_v37 }
 0x40d   : > { %v2707_v28 = vmax.f32 %v2697_v40, 0.0 }
 0x40e   : > { %v2706_v18 = vmax.f32 %v2692_v5, 0.0  ;;  %3300 = vmatprep.subr.bf16.mxu0 %v3299_v7  ;;  %3309 = vmatprep.subr.bf16.mxu1 %v3299_v7 }
 0x40f   : > { %3302 = vmatpush3.bf16.msra.mxu0 %v3299_v7  ;;  %3313 = vmatpush3.bf16.msra.mxu1 %v3299_v7 }
 0x410   : > { %v3303_v19 = vpack.c.bf16 %v2707_v28, %v2706_v18 }
 0x412   : > { %3304 = vmatprep.subr.bf16.mxu0 %v3303_v19  ;;  %3310 = vmatprep.subr.bf16.mxu1 %v3303_v19 }
 0x413   : > { %3306 = vmatpush3.bf16.msra.mxu0 %v3303_v19  ;;  %3314 = vmatpush3.bf16.msra.mxu1 %v3303_v19 }
 0x416   : > { %3286 = vmatmul.mubr.msk.f32.vlgmr.msra.gmra.mrb[8].mxu0 %vm2498_vm12, %v2709_v32  ;;  %3289 = vmatmul.mubr.msk.f32.vlgmr.msra.gmra.mrb[0].mxu1 %vm2498_vm12, %v2711_v6  ;;  %v2899_v6 = vpop.permute.xlu0 %2898 }
 0x4e9   : > { %v3287_v60 = vpop.f32.mrb[8].mxu0  ;;  %v3290_v21 = vpop.f32.mrb[0].mxu1 }
 0x4ea   : > { %v2820_v59 = vadd.f32 %v3287_v60, %v2724_v9  ;;  %v2830_v22 = vadd.f32 %v3290_v21, %v2734_v8  ;;  %v2814_v41 = vpop.f32.mrb[9].mxu0  ;;  %v2824_v57 = vpop.f32.mrb[1].mxu1 }
 0x4eb   : > { %v2815_v49 = vadd.f32 %v2814_v41, %v2719_v54  ;;  %v2825_v10 = vadd.f32 %v2824_v57, %v2729_v34  ;;  %v2904_v54 = vpop.permute.xlu1 %2903  ;;  %v2909_v8 = vpop.permute.xlu0 %2908 }
 0x4ec   : > { %v2838_v3 = vadd.f32 %v2834_v45, %v2820_v59  ;;  %v2840_v25 = vadd.f32 %v2836_v11, %v2830_v22 }
 0x4ed   : > { %v2837_v55 = vadd.f32 %v2833_v33, %v2815_v49  ;;  %v2839_v29 = vadd.f32 %v2835_v53, %v2825_v10 }
 0x4ee   : > { %v2846_v4 = vadd.f32 %v2842_v35, %v2838_v3  ;;  %v2848_v48 = vadd.f32 %v2844_v13, %v2840_v25 }
 0x4ef   : > { %v2845_v42 = vadd.f32 %v2841_v2, %v2837_v55  ;;  %v2847_v14 = vadd.f32 %v2843_v44, %v2839_v29  ;;  %v2914_v60 = vpop.permute.xlu1 %2913  ;;  %v2927_v45 = vpop.permute.xlu0 %2926 }
 0x4f0   : > { %v2850_v15 = vsel %vm2498_vm12, %v2846_v4, 0.0  ;;  %v2854_v50 = vsel %vm2498_vm12, %v2848_v48, 0.0 }
 0x4f1   : > { %v2849_v12 = vsel %vm2498_vm12, %v2845_v42, 0.0  ;;  %v2852_v26 = vsel %vm2498_vm12, %v2847_v14, 0.0 }
 0x4f2   : > { %v2851_v51 = vadd.f32 %v2850_v15, %v2849_v12 }
 0x4f3   : > { %v2932_v21 = vpop.permute.xlu1 %2931  ;;  %v2937_v10 = vpop.permute.xlu0 %2936 }
 0x4f4   : > { %v2853_v43 = vadd.f32 %v2852_v26, %v2851_v51 }
 0x4f6   : > { %v2855_v38 = vadd.f32 %v2854_v50, %v2853_v43 }
 0x4f7   : > { %v2942_v3 = vpop.permute.xlu1 %2941 }
 0x4f8   : > { %v2856_v62 = vrot.slane %v2855_v38, 4 }
 0x4fa   : > { %v2857_v52 = vadd.f32 %v2856_v62, %v2855_v38 }
 0x4fc   : > { %v2858_v36 = vrot.slane %v2857_v52, 2 }
 0x4fe   : > { %v2859_v20 = vadd.f32 %v2858_v36, %v2857_v52 }
 0x500   : > { %v2860_v24 = vrot.slane %v2859_v20, 1 }
 0x502   : > { %v2861_v46 = vadd.f32 %v2860_v24, %v2859_v20 }
 0x504   : > { %v2863_v23 = vmul.f32 0.03125, %v2861_v46 }
 0x506   : > { %v2864_v0 = vsub.f32 %v2845_v42, %v2863_v23  ;;  %v2865_v47 = vsub.f32 %v2846_v4, %v2863_v23  ;;  %v2866_v31 = vsub.f32 %v2847_v14, %v2863_v23  ;;  %v2867_v39 = vsub.f32 %v2848_v48, %v2863_v23 }
 0x508   : > { %v2868_v58 = vmul.f32 %v2864_v0, %v2864_v0  ;;  %v2869_v1 = vmul.f32 %v2865_v47, %v2865_v47  ;;  %v2870_v16 = vmul.f32 %v2866_v31, %v2866_v31  ;;  %v2871_v17 = vmul.f32 %v2867_v39, %v2867_v39 }
 0x50a   : > { %v2872_v61 = vsel %vm2498_vm12, %v2868_v58, 0.0  ;;  %v2873_v63 = vsel %vm2498_vm12, %v2869_v1, 0.0  ;;  %v2875_v27 = vsel %vm2498_vm12, %v2870_v16, 0.0  ;;  %v2877_v40 = vsel %vm2498_vm12, %v2871_v17, 0.0 }
 0x50b   : > { %v2874_v56 = vadd.f32 %v2873_v63, %v2872_v61 }
 0x50d   : > { %v2876_v37 = vadd.f32 %v2875_v27, %v2874_v56 }
 0x50f   : > { %v2878_v30 = vadd.f32 %v2877_v40, %v2876_v37 }
 0x511   : > { %v2879_v7 = vrot.slane %v2878_v30, 4 }
 0x513   : > { %v2880_v5 = vadd.f32 %v2879_v7, %v2878_v30 }
 0x515   : > { %v2881_v28 = vrot.slane %v2880_v5, 2 }
 0x517   : > { %v2882_v18 = vadd.f32 %v2881_v28, %v2880_v5 }
 0x519   : > { %v2883_v19 = vrot.slane %v2882_v18, 1 }
 0x51b   : > { %v2884_v32 = vadd.f32 %v2883_v19, %v2882_v18 }
 0x51d   : > { %v2885_v9 = vmul.f32 0.03125, %v2884_v32 }
 0x51f   : > { %v2886_v34 = vadd.f32 1e-05, %v2885_v9 }
 0x521   : > { %3474 = vrsqrt.f32 %v2886_v34 }
 0x52b   : > { %v3475_v59 = vpop.eup %3474 }
 0x52c   : > { %v2888_v22 = vmul.f32 %v3475_v59, %v2864_v0  ;;  %v2889_v11 = vmul.f32 %v3475_v59, %v2865_v47  ;;  %v2890_v41 = vmul.f32 %v3475_v59, %v2866_v31  ;;  %v2891_v33 = vmul.f32 %v3475_v59, %v2867_v39 }
 0x52e   : > { %v2916_v57 = vmul.f32 %v2899_v6, %v2888_v22  ;;  %v2917_v53 = vmul.f32 %v2904_v54, %v2889_v11  ;;  %v2918_v35 = vmul.f32 %v2909_v8, %v2890_v41  ;;  %v2919_v49 = vmul.f32 %v2914_v60, %v2891_v33 }
 0x530   : > { %v2944_v2 = vadd.f32 %v2927_v45, %v2916_v57  ;;  %v2945_v44 = vadd.f32 %v2932_v21, %v2917_v53  ;;  %v2946_v25 = vadd.f32 %v2937_v10, %v2918_v35  ;;  %v2947_v55 = vadd.f32 %v2942_v3, %v2919_v49 }
 0x532   : > { %2948 = vst.msk [vmem:[%s4084_s15] sm:$0xff] %vm2498_vm12, %v2944_v2  ;;  %2949 = vst.msk [vmem:[%s4084_s15 + $0x8] sm:$0xff] %vm2498_vm12, %v2945_v44 }
 0x533   : > { %2950 = vst.msk [vmem:[%s4084_s15 + $0x10] sm:$0xff] %vm2498_vm12, %v2946_v25  ;;  %2951 = vst.msk [vmem:[%s4084_s15 + $0x18] sm:$0xff] %vm2498_vm12, %v2947_v55 }
 0x534 PF: > { %s7968_s14 = sld [smem:[#allocation18_spill]]  ;;  %s7969_s1 = sld [smem:[#allocation13_spill]] }
 0x535   : > { %s7970_s21 = sld [smem:[#allocation22_spill]]  ;;  %s7971_s12 = sld [smem:[#allocation61_spill]] }
 0x536   : > { %s2968_s18 = sshll.u32 %s4084_s15, 4  ;;  %s3712_s10 = smov [#allocation8]   ;;  %s7361_s18 = int_to_ptr.vmem [resolvable:$true] %s2968_s18 }
 0x537   : > { %s3536_s3 = scalar_lea.vmem %s7361_s18, 512  ;;  %s3540_s4 = sshll.u32 %s3712_s10, 4  ;;  %s3541_s4 = int_to_ptr.vmem [resolvable:$false] %s3540_s4 }
 0x538   : > { %p3537_p5 = scmp.ne.s32.totalorder %s7361_s18, %s3536_s3  ;;  %s3542_s27 = scalar_lea.vmem %s3541_s4, 1024 }
 0x539   : > { %p3543_p4 = scmp.lt.s32.totalorder %s7361_s18, %s3541_s4  ;;  %p3544_p9 = scmp.lt.s32.totalorder %s3542_s27, %s3536_s3 }
 0x53a   : > { %s3203_s26 = sshll.u32 %s7968_s14, 9  ;;  %s7973_s23 = sand.u32 1, %s7969_s1  }
 0x53b   : > { %s7972_s9 = smov %s7971_s12  ;;  %s7358_s11 = scalar_lea.hbm %s7971_s12, %s3203_s26 }
 0x53c   : > { %s7365_s20 = scalar_lea.sflag [#allocation5], %s7973_s23  ;;  %p7974_p10 = scmp.ne.s32.totalorder %s7970_s21, 0 }
 0x53d   : > { %p3545_p7 = por %p3544_p9, %p3543_p4 }
 0x53e   : > { %p3538_p0 = pnand %p3537_p5, %p7974_p10 }
 0x540   : > { %p3539_p6 = pneg %p3538_p0 }
 0x542   : > { %p3546_p2 = pnand %p3545_p7, %p3539_p6 }
 0x544   : > { %3549 = shalt.err (!%p3546_p2)
}
 0x545   : > { %s3550_s15 = scalar_lea.hbm %s7358_s11, 512  ;;  %s3554_s14 = scalar_lea.hbm %s7972_s9, 1024 }
 0x546   : > { %p3551_p13 = scmp.ne.s32.totalorder %s7358_s11, %s3550_s15  ;;  %p3555_p11 = scmp.lt.u32.totalorder %s7358_s11, %s7972_s9 }
 0x547   : > { %p3556_p1 = scmp.lt.u32.totalorder %s3554_s14, %s3550_s15  ;;  %p3558_p5 = scmp.lt.u32.totalorder %s3550_s15, %s7358_s11 }
 0x548   : > { %p3552_p3 = pnand %p3551_p13, %p7974_p10 }
 0x549   : > { %p3557_p12 = por %p3556_p1, %p3555_p11 }
 0x54a   : > { %p3553_p8 = pneg %p3552_p3 }
 0x54b   : > { %p3559_p0 = por %p3558_p5, %p3557_p12 }
 0x54d   : > { %p3560_p6 = pnand %p3559_p0, %p3553_p8 }
 0x54f   : > { %3563 = shalt.err (!%p3560_p6)
}
 0x550   : > { %s3713_s25 = smov 128   ;;  %s3714_s28 = smov 8  }
 0x551   : > { %3319 = dma.vmem_to_hbm [thread:$0]  (%p7974_p10), %s7361_s18, 512, %s7358_s11, %s7365_s20, %s3713_s25, %s3713_s25, %s3714_s28  }
 0x552 PF: > { %s7975_s12 = sld [smem:[#allocation12_spill]]  ;;  %s7976_s23 = sld [smem:[#allocation23_spill]] }
 0x553   : > { %p3333_p4 = scmp.ge.s32.totalorder %s3702_s13, 2 }
 0x558   : > { %s2983_s3 = sand.u32 1, %s7975_s12   ;;  %p7977_p9 = scmp.ne.s32.totalorder %s7976_s23, 0 }
 0x559   : > { %s2984_s10 = scalar_lea.sflag [#allocation5], %s2983_s3 }
 0x55a   : > { %p3329_p7 = pnand %p3333_p4, %p7977_p9 }
 0x55c   : > { %3637 = dma.done.wait (!%p3329_p7), %s2984_s10, 512  }
 0x55d   : > { %3639 = vsyncadd (!%p3329_p7), %s2984_s10, 4294966784  ;;  %s30_s13 = sadd.s32 1, %s3702_s13   ;;  %s7979_s17 = sld [smem:[#allocation13_spill]] }
 0x55e   : > { %p7394_p2 = scmp.ge.s32.totalorder %s30_s13, 10   ;;  %s7980_s20 = sld [smem:[#allocation14_spill]] }
 0x55f   : > { %s7981_s11 = sld [smem:[#allocation15_spill]]  ;;  %s7982_s25 = sld [smem:[#allocation28_spill]] }
 0x560   : > { %s7983_s26 = sld [smem:[#allocation19_spill]]  ;;  %s7984_s27 = sld [smem:[#allocation20_spill]] }
 0x561   : > { %s7985_s28 = sld [smem:[#allocation21_spill]]  ;;  %s7986_s29 = sld [smem:[#allocation24_spill]] }
 0x562   : > { %s7987_s15 = sld [smem:[#allocation26_spill]]  ;;  %s7988_s12 = sld [smem:[#allocation27_spill]] }
 0x563   : > { %s7989_s18 = smov %s3650_s19  ;;  %s7990_s19 = smov %s3997_s5 }
 0x564   : > { %s7991_s21 = smov %s3662_s22  ;;  %s7992_s22 = smov %s3994_s30 }
 0x565   : > { %s7993_s23 = smov %s3670_s24  ;;  %s7994_s24 = smov %s7981_s11 }
 0x566   :  { %29 = sbr.rel (!%p7394_p2) target bundleno = 26 (0x1a), region = 139 }
 0x568   : > { %s7995_s30 = smov %s7987_s15 }
 0x56d   :  { %2989 = vsyncpa [#allocation4], 1 }
 0x56e   :  { %2991 = vsyncpa [#allocation4 + $0x1], 1 }
 0x56f   :  { %2992 = vsyncpa [#allocation7], 1 }
 0x570   :  { %2994 = vsyncpa [#allocation7 + $0x1], 1 }
 0x571   :  { %2995 = vsyncpa [#allocation5], 1 }
 0x572   :  { %2997 = vsyncpa [#allocation5 + $0x1], 1 }

</bundles_post_ra>
